<compile_context>
chip_gen: v5e
topology: v5e:2x2
jax: 0.10.0
libtpu: 0.0.40
codegen_flags: <defaults>
</compile_context>

<pallas_src>
import jax
import jax.numpy as jnp
from jax.experimental import pallas as pl
from jax.experimental.pallas import tpu as pltpu


# ----------------------------------------------------------------------------
# Fully-fused forward kernel (single invocation, everything in VMEM)
# ----------------------------------------------------------------------------
def _model2_fused_kernel(*refs):
    # ref layout:
    #   inputs : x [T*B, F] (time-major rows t*B+b), demov [B, D],
    #            (w_ih_t, w_hh_t, b) * nlayers   (encoder),
    #            (w_ih_t, w_hh_t, b) * nlayers   (decoder),
    #            wdo_t [H,F], bdo [1,F], wc_t [H,C], bc [1,C],
    #            wrc [1,C], brc [1,1], wrv [1,D], brv [1,1]
    #   outputs: enc0 [B,H], decoded2d [T*B,F], logits [B,C], outcome [B,1]
    total = len(refs)
    nlayers = (total - 14) // 6
    n_in = 2 + 6 * nlayers + 8
    in_refs = refs[:n_in]
    enc0_ref, dec_ref, logits_ref, outcome_ref = refs[n_in:n_in + 4]

    x_ref, demov_ref = in_refs[0], in_refs[1]
    p = 2
    enc_layers, dec_layers = [], []
    for lst in (enc_layers, dec_layers):
        for _ in range(nlayers):
            lst.append((in_refs[p], in_refs[p + 1], in_refs[p + 2]))
            p += 3
    (wdo_ref, bdo_ref, wc_ref, bc_ref,
     wrc_ref, brc_ref, wrv_ref, brv_ref) = in_refs[p:p + 8]

    TB, _ = x_ref.shape
    B = demov_ref.shape[0]
    T = TB // B
    H = enc_layers[0][1].shape[0]          # w_hh_t is [H, 4H]
    f32 = jnp.float32

    def cell(gx_t, h, c, w_hh):
        # gx_t already contains W_ih @ x_t + b_ih + b_hh
        gates = gx_t + jnp.dot(h, w_hh, preferred_element_type=f32)     # [B, 4H]
        i = jax.nn.sigmoid(gates[:, 0 * H:1 * H])
        f = jax.nn.sigmoid(gates[:, 1 * H:2 * H])
        g = jnp.tanh(gates[:, 2 * H:3 * H])
        o = jax.nn.sigmoid(gates[:, 3 * H:4 * H])
        c_new = f * c + i * g
        h_new = o * jnp.tanh(c_new)
        return h_new, c_new

    x2d = x_ref[...]                        # [T*B, F], time-major
    zeros_bh = jnp.zeros((B, H), f32)

    # ------------------------------ Encoder ------------------------------
    enc_finals = []
    layer_in = x2d
    for l in range(nlayers):
        wih_ref, whh_ref, b_ref = enc_layers[l]
        w_hh = whh_ref[...]
        # hoisted input projection: one matmul for all T steps (both biases folded in)
        gx = jnp.dot(layer_in, wih_ref[...], preferred_element_type=f32) + b_ref[...]
        store = l < nlayers - 1             # last layer's sequence is never consumed
        h, c = zeros_bh, zeros_bh
        hs = []
        for t in range(T):                  # fully unrolled serial recurrence
            h, c = cell(gx[t * B:(t + 1) * B, :], h, c, w_hh)
            if store:
                hs.append(h)
        enc_finals.append((h, c))
        if store:
            layer_in = jnp.concatenate(hs, axis=0)   # [T*B, H], time-major

    # encoded_x[:, 0, :] of torch.flip(enc_out, [1]) == final hidden of top layer
    enc0 = enc_finals[-1][0]
    enc0_ref[...] = enc0

    # ------------------------------ Decoder ------------------------------
    # newinput[b, t] = 0 if t == 0 else x[b, T - t]   (zero-prepended, time-reversed x)
    dec_in = None
    fin = None
    for l in range(nlayers):
        wih_ref, whh_ref, b_ref = dec_layers[l]
        w_hh = whh_ref[...]
        bias = b_ref[...]
        h, c = enc_finals[l]                # decoder initial state = encoder final state
        is_last = l == nlayers - 1
        if l == 0:
            # hoisted projection of x; the t==0 step only sees the bias (zero input)
            gx_raw = jnp.dot(x2d, wih_ref[...], preferred_element_type=f32)
            gx_steps = [bias] + [gx_raw[(T - t) * B:(T - t + 1) * B, :] + bias
                                 for t in range(1, T)]
        else:
            gx = jnp.dot(dec_in, wih_ref[...], preferred_element_type=f32) + bias
            gx_steps = [gx[t * B:(t + 1) * B, :] for t in range(T)]
        hs = []
        for t in range(T):
            h, c = cell(gx_steps[t], h, c, w_hh)
            hs.append(h)
        if is_last:
            # time-reversed concat -> rows already in torch.flip(dec_out, [1]) order
            fin = jnp.concatenate(hs[::-1], axis=0)          # [T*B, H]
        else:
            dec_in = jnp.concatenate(hs, axis=0)             # [T*B, H]

    # linear_decoder_output applied to the flipped decoder sequence (one matmul)
    decoded = jnp.dot(fin, wdo_ref[...], preferred_element_type=f32) + bdo_ref[...]
    dec_ref[...] = decoded                  # [T*B, F], row t*B + b == decoded_x[b, t]

    # ---------------- classifier + softmax + logistic-regression head ----------------
    logits = jnp.dot(enc0, wc_ref[...], preferred_element_type=f32) + bc_ref[...]
    logits_ref[...] = logits                # output_c_no_activate
    m = jnp.max(logits, axis=1, keepdims=True)
    e = jnp.exp(logits - m)
    p_sm = e / jnp.sum(e, axis=1, keepdims=True)
    # output-dim-1 heads: elementwise mul + lane reduce (avoids N=1 MXU matmuls)
    out_c = jnp.sum(p_sm * wrc_ref[...], axis=1, keepdims=True) + brc_ref[...]
    out_v = jnp.sum(demov_ref[...] * wrv_ref[...], axis=1, keepdims=True) + brv_ref[...]
    outcome_ref[...] = jax.nn.sigmoid(out_c + out_v)


# ----------------------------------------------------------------------------
# Wrapper: one pallas_call for the whole forward
# ----------------------------------------------------------------------------
@jax.jit
def model2_forward_outcome(kernel_weights, x, demov):
    B, T, F = x.shape
    nlayers = (len(kernel_weights) - 8) // 6
    H = kernel_weights[1].shape[0]                    # enc layer-0 w_hh_t [H, 4H]
    C = kernel_weights[6 * nlayers + 2].shape[1]      # cls_w_t [H, C]

    # time-major flatten: row t*B + b == x[b, t]  (tiny one-off XLA transform)
    x_tm2d = jnp.transpose(x, (1, 0, 2)).reshape(T * B, F)

    out_shapes = (jax.ShapeDtypeStruct((B, H), jnp.float32),      # encoded_x[:,0,:]
                  jax.ShapeDtypeStruct((T * B, F), jnp.float32),  # decoded_x (time-major 2d)
                  jax.ShapeDtypeStruct((B, C), jnp.float32),      # output_c_no_activate
                  jax.ShapeDtypeStruct((B, 1), jnp.float32))      # output_outcome

    enc0, dec2d, logits, outcome = pl.pallas_call(
        _model2_fused_kernel,
        out_shape=out_shapes,
        compiler_params=pltpu.CompilerParams(vmem_limit_bytes=32 << 20),
    )(x_tm2d, demov, *kernel_weights)

    decoded_x = dec2d.reshape(T, B, F).transpose(1, 0, 2)         # -> [B, T, F]
    return enc0, decoded_x, logits, outcome


# ----------------------------------------------------------------------------
# Parameter init (deterministic, mirrors PyTorch init_weights) + kernel layout prep
# ----------------------------------------------------------------------------
def init_params(key, input_size, nhidden, nlayers, n_clusters, n_demov):
    def unif(k, shape):
        return jax.random.uniform(k, shape, jnp.float32, -0.1, 0.1)

    keys = iter(jax.random.split(key, 64))
    params = {}
    for name in ("enc", "dec"):                     # both LSTMs: uniform(-0.1, 0.1)
        layers = []
        for l in range(nlayers):
            in_sz = input_size if l == 0 else nhidden
            w_ih = unif(next(keys), (4 * nhidden, in_sz))
            w_hh = unif(next(keys), (4 * nhidden, nhidden))
            b_ih = unif(next(keys), (4 * nhidden,))
            b_hh = unif(next(keys), (4 * nhidden,))
            layers.append((w_ih, w_hh, b_ih, b_hh))
        params[name] = layers
    # Linear layers: weight uniform(-0.1, 0.1), bias 0  (PyTorch [out, in] convention)
    params["dec_out_w"] = unif(next(keys), (input_size, nhidden))
    params["dec_out_b"] = jnp.zeros((input_size,), jnp.float32)
    params["cls_w"] = unif(next(keys), (n_clusters, nhidden))
    params["cls_b"] = jnp.zeros((n_clusters,), jnp.float32)
    params["reg_c_w"] = unif(next(keys), (1, n_clusters))
    params["reg_c_b"] = jnp.zeros((1,), jnp.float32)
    params["reg_v_w"] = unif(next(keys), (1, n_demov))
    params["reg_v_b"] = jnp.zeros((1,), jnp.float32)
    return params


def prepare_kernel_weights(params):
    """One-time conversion PyTorch layout -> kernel layout (transposed, biases fused)."""
    flat = []
    for name in ("enc", "dec"):
        for (w_ih, w_hh, b_ih, b_hh) in params[name]:
            flat += [w_ih.T, w_hh.T, (b_ih + b_hh)[None, :]]
    flat += [params["dec_out_w"].T, params["dec_out_b"][None, :],
             params["cls_w"].T, params["cls_b"][None, :],
             params["reg_c_w"], params["reg_c_b"][None, :],      # kept as [1, C] row
             params["reg_v_w"], params["reg_v_b"][None, :]]      # kept as [1, D] row
    return tuple(jax.device_put(w) for w in flat)


# ----------------------------------------------------------------------------
# Pure-JAX reference (mirrors the PyTorch module) for a numerical self-check
# ----------------------------------------------------------------------------
def _lstm_ref(x_btf, layers, h0, c0):
    B, T, _ = x_btf.shape
    H = layers[0][1].shape[1]                       # w_hh is [4H, H]
    seq = x_btf
    hs, cs = [], []
    for l, (w_ih, w_hh, b_ih, b_hh) in enumerate(layers):
        h = jnp.zeros((B, H), jnp.float32) if h0 is None else h0[l]
        c = jnp.zeros((B, H), jnp.float32) if c0 is None else c0[l]
        outs = []
        for t in range(T):
            g = seq[:, t, :] @ w_ih.T + b_ih + h @ w_hh.T + b_hh
            i = jax.nn.sigmoid(g[:, :H]); f = jax.nn.sigmoid(g[:, H:2 * H])
            gg = jnp.tanh(g[:, 2 * H:3 * H]); o = jax.nn.sigmoid(g[:, 3 * H:])
            c = f * c + i * gg
            h = o * jnp.tanh(c)
            outs.append(h)
        seq = jnp.stack(outs, axis=1)
        hs.append(h); cs.append(c)
    return seq, jnp.stack(hs), jnp.stack(cs)


def model2_reference(params, x, demov):
    B, T, F = x.shape
    enc_out, hn, cn = _lstm_ref(x, params["enc"], None, None)
    encoded_x = jnp.flip(enc_out, axis=1)
    newinput = jnp.concatenate(
        [jnp.zeros((B, 1, F), x.dtype), jnp.flip(x, axis=1)], axis=1)[:, :-1, :]
    dec_out, _, _ = _lstm_ref(newinput, params["dec"], hn, cn)
    decoded = jnp.flip(dec_out, axis=1)
    decoded_x = decoded @ params["dec_out_w"].T + params["dec_out_b"]
    enc0 = encoded_x[:, 0, :]
    logits = enc0 @ params["cls_w"].T + params["cls_b"]
    p_sm = jax.nn.softmax(logits, axis=1)
    outcome = jax.nn.sigmoid(p_sm @ params["reg_c_w"].T + params["reg_c_b"]
                             + demov @ params["reg_v_w"].T + params["reg_v_b"])
    return enc0, decoded_x, logits, outcome


if __name__ == "__main__":
    key = jax.random.PRNGKey(0)
    B, T = 2, 8                    # batch, sequence length
    input_size, nhidden, nlayers = 4, 32, 2
    n_clusters, n_demov = 3, 5

    kp, kx, kd = jax.random.split(key, 3)
    params = init_params(kp, input_size, nhidden, nlayers, n_clusters, n_demov)
    kw = prepare_kernel_weights(params)
    x = jax.random.normal(kx, (B, T, input_size), jnp.float32)
    demov = jax.random.normal(kd, (B, n_demov), jnp.float32)

    outs = model2_forward_outcome(kw, x, demov)
    jax.block_until_ready(outs)
    enc0, decoded_x, logits, outcome = outs

    assert enc0.shape == (B, nhidden)
    assert decoded_x.shape == (B, T, input_size)
    assert logits.shape == (B, n_clusters)
    assert outcome.shape == (B, 1)

    # numerical self-check against the pure-JAX reference (loose tol: MXU vs XLA dot paths)
    refs = model2_reference(params, x, demov)
    for name, a, b in zip(("encoded_x", "decoded_x", "logits", "outcome"), outs, refs):
        assert jnp.allclose(a, b, rtol=3e-2, atol=3e-3), f"mismatch in {name}"

    print("KERNEL_OK")
</pallas_src>

<mosaic_0001>
module attributes {stable_mosaic.version = 11 : i64} {
  func.func @_model2_fused_kernel(%arg0: memref<16x4xf32, #tpu.memory_space<vmem>>, %arg1: memref<2x5xf32, #tpu.memory_space<vmem>>, %arg2: memref<4x128xf32, #tpu.memory_space<vmem>>, %arg3: memref<32x128xf32, #tpu.memory_space<vmem>>, %arg4: memref<1x128xf32, #tpu.memory_space<vmem>>, %arg5: memref<32x128xf32, #tpu.memory_space<vmem>>, %arg6: memref<32x128xf32, #tpu.memory_space<vmem>>, %arg7: memref<1x128xf32, #tpu.memory_space<vmem>>, %arg8: memref<4x128xf32, #tpu.memory_space<vmem>>, %arg9: memref<32x128xf32, #tpu.memory_space<vmem>>, %arg10: memref<1x128xf32, #tpu.memory_space<vmem>>, %arg11: memref<32x128xf32, #tpu.memory_space<vmem>>, %arg12: memref<32x128xf32, #tpu.memory_space<vmem>>, %arg13: memref<1x128xf32, #tpu.memory_space<vmem>>, %arg14: memref<32x4xf32, #tpu.memory_space<vmem>>, %arg15: memref<1x4xf32, #tpu.memory_space<vmem>>, %arg16: memref<32x3xf32, #tpu.memory_space<vmem>>, %arg17: memref<1x3xf32, #tpu.memory_space<vmem>>, %arg18: memref<1x3xf32, #tpu.memory_space<vmem>>, %arg19: memref<1x1xf32, #tpu.memory_space<vmem>>, %arg20: memref<1x5xf32, #tpu.memory_space<vmem>>, %arg21: memref<1x1xf32, #tpu.memory_space<vmem>>, %arg22: memref<2x32xf32, #tpu.memory_space<vmem>>, %arg23: memref<16x4xf32, #tpu.memory_space<vmem>>, %arg24: memref<2x3xf32, #tpu.memory_space<vmem>>, %arg25: memref<2x1xf32, #tpu.memory_space<vmem>>) attributes {dimension_semantics = [], scalar_prefetch = 0 : i64, scratch_operands = 0 : i64, tpu.core_type = #tpu.core_type<tc>} {
    %c0 = arith.constant 0 : index
    %c0_0 = arith.constant 0 : index
    %0 = vector.load %arg0[%c0, %c0_0] : memref<16x4xf32, #tpu.memory_space<vmem>>, vector<16x4xf32>
    %cst = arith.constant 0.000000e+00 : f32
    %1 = vector.broadcast %cst : f32 to vector<2x32xf32>
    %c0_1 = arith.constant 0 : index
    %c0_2 = arith.constant 0 : index
    %2 = vector.load %arg3[%c0_1, %c0_2] : memref<32x128xf32, #tpu.memory_space<vmem>>, vector<32x128xf32>
    %c0_3 = arith.constant 0 : index
    %c0_4 = arith.constant 0 : index
    %3 = vector.load %arg2[%c0_3, %c0_4] : memref<4x128xf32, #tpu.memory_space<vmem>>, vector<4x128xf32>
    %cst_5 = arith.constant dense<0.000000e+00> : vector<16x128xf32>
    %4 = tpu.matmul %0, %3, %cst_5 {dimension_numbers = #tpu.dot_dimension_numbers<[1], [0], [0], [1], [0, 0, 1, 1], [], []>} : vector<16x4xf32>, vector<4x128xf32>, vector<16x128xf32> -> vector<16x128xf32>
    %c0_6 = arith.constant 0 : index
    %c0_7 = arith.constant 0 : index
    %5 = vector.load %arg4[%c0_6, %c0_7] : memref<1x128xf32, #tpu.memory_space<vmem>>, vector<1x128xf32>
    %6 = vector.broadcast %5 : vector<1x128xf32> to vector<16x128xf32>
    %7 = arith.addf %4, %6 : vector<16x128xf32>
    %8 = vector.extract_strided_slice %7 {offsets = [0, 0], sizes = [2, 128], strides = [1, 1]} : vector<16x128xf32> to vector<2x128xf32>
    %cst_8 = arith.constant dense<0.000000e+00> : vector<2x128xf32>
    %9 = tpu.matmul %1, %2, %cst_8 {dimension_numbers = #tpu.dot_dimension_numbers<[1], [0], [0], [1], [0, 0, 1, 1], [], []>} : vector<2x32xf32>, vector<32x128xf32>, vector<2x128xf32> -> vector<2x128xf32>
    %10 = arith.addf %8, %9 : vector<2x128xf32>
    %11 = vector.extract_strided_slice %10 {offsets = [0, 0], sizes = [2, 32], strides = [1, 1]} : vector<2x128xf32> to vector<2x32xf32>
    %12 = arith.negf %11 : vector<2x32xf32>
    %13 = math.exp %12 : vector<2x32xf32>
    %cst_9 = arith.constant 1.000000e+00 : f32
    %14 = vector.broadcast %cst_9 : f32 to vector<2x32xf32>
    %15 = arith.addf %14, %13 : vector<2x32xf32>
    %16 = arith.divf %14, %15 : vector<2x32xf32>
    %17 = vector.extract_strided_slice %10 {offsets = [0, 32], sizes = [2, 32], strides = [1, 1]} : vector<2x128xf32> to vector<2x32xf32>
    %18 = arith.negf %17 : vector<2x32xf32>
    %19 = math.exp %18 : vector<2x32xf32>
    %cst_10 = arith.constant 1.000000e+00 : f32
    %20 = vector.broadcast %cst_10 : f32 to vector<2x32xf32>
    %21 = arith.addf %20, %19 : vector<2x32xf32>
    %22 = arith.divf %20, %21 : vector<2x32xf32>
    %23 = vector.extract_strided_slice %10 {offsets = [0, 64], sizes = [2, 32], strides = [1, 1]} : vector<2x128xf32> to vector<2x32xf32>
    %24 = math.tanh %23 : vector<2x32xf32>
    %25 = vector.extract_strided_slice %10 {offsets = [0, 96], sizes = [2, 32], strides = [1, 1]} : vector<2x128xf32> to vector<2x32xf32>
    %26 = arith.negf %25 : vector<2x32xf32>
    %27 = math.exp %26 : vector<2x32xf32>
    %cst_11 = arith.constant 1.000000e+00 : f32
    %28 = vector.broadcast %cst_11 : f32 to vector<2x32xf32>
    %29 = arith.addf %28, %27 : vector<2x32xf32>
    %30 = arith.divf %28, %29 : vector<2x32xf32>
    %31 = arith.mulf %22, %1 : vector<2x32xf32>
    %32 = arith.mulf %16, %24 : vector<2x32xf32>
    %33 = arith.addf %31, %32 : vector<2x32xf32>
    %34 = math.tanh %33 : vector<2x32xf32>
    %35 = arith.mulf %30, %34 : vector<2x32xf32>
    %36 = vector.extract_strided_slice %7 {offsets = [2, 0], sizes = [2, 128], strides = [1, 1]} : vector<16x128xf32> to vector<2x128xf32>
    %cst_12 = arith.constant dense<0.000000e+00> : vector<2x128xf32>
    %37 = tpu.matmul %35, %2, %cst_12 {dimension_numbers = #tpu.dot_dimension_numbers<[1], [0], [0], [1], [0, 0, 1, 1], [], []>} : vector<2x32xf32>, vector<32x128xf32>, vector<2x128xf32> -> vector<2x128xf32>
    %38 = arith.addf %36, %37 : vector<2x128xf32>
    %39 = vector.extract_strided_slice %38 {offsets = [0, 0], sizes = [2, 32], strides = [1, 1]} : vector<2x128xf32> to vector<2x32xf32>
    %40 = arith.negf %39 : vector<2x32xf32>
    %41 = math.exp %40 : vector<2x32xf32>
    %cst_13 = arith.constant 1.000000e+00 : f32
    %42 = vector.broadcast %cst_13 : f32 to vector<2x32xf32>
    %43 = arith.addf %42, %41 : vector<2x32xf32>
    %44 = arith.divf %42, %43 : vector<2x32xf32>
    %45 = vector.extract_strided_slice %38 {offsets = [0, 32], sizes = [2, 32], strides = [1, 1]} : vector<2x128xf32> to vector<2x32xf32>
    %46 = arith.negf %45 : vector<2x32xf32>
    %47 = math.exp %46 : vector<2x32xf32>
    %cst_14 = arith.constant 1.000000e+00 : f32
    %48 = vector.broadcast %cst_14 : f32 to vector<2x32xf32>
    %49 = arith.addf %48, %47 : vector<2x32xf32>
    %50 = arith.divf %48, %49 : vector<2x32xf32>
    %51 = vector.extract_strided_slice %38 {offsets = [0, 64], sizes = [2, 32], strides = [1, 1]} : vector<2x128xf32> to vector<2x32xf32>
    %52 = math.tanh %51 : vector<2x32xf32>
    %53 = vector.extract_strided_slice %38 {offsets = [0, 96], sizes = [2, 32], strides = [1, 1]} : vector<2x128xf32> to vector<2x32xf32>
    %54 = arith.negf %53 : vector<2x32xf32>
    %55 = math.exp %54 : vector<2x32xf32>
    %cst_15 = arith.constant 1.000000e+00 : f32
    %56 = vector.broadcast %cst_15 : f32 to vector<2x32xf32>
    %57 = arith.addf %56, %55 : vector<2x32xf32>
    %58 = arith.divf %56, %57 : vector<2x32xf32>
    %59 = arith.mulf %50, %33 : vector<2x32xf32>
    %60 = arith.mulf %44, %52 : vector<2x32xf32>
    %61 = arith.addf %59, %60 : vector<2x32xf32>
    %62 = math.tanh %61 : vector<2x32xf32>
    %63 = arith.mulf %58, %62 : vector<2x32xf32>
    %64 = vector.extract_strided_slice %7 {offsets = [4, 0], sizes = [2, 128], strides = [1, 1]} : vector<16x128xf32> to vector<2x128xf32>
    %cst_16 = arith.constant dense<0.000000e+00> : vector<2x128xf32>
    %65 = tpu.matmul %63, %2, %cst_16 {dimension_numbers = #tpu.dot_dimension_numbers<[1], [0], [0], [1], [0, 0, 1, 1], [], []>} : vector<2x32xf32>, vector<32x128xf32>, vector<2x128xf32> -> vector<2x128xf32>
    %66 = arith.addf %64, %65 : vector<2x128xf32>
    %67 = vector.extract_strided_slice %66 {offsets = [0, 0], sizes = [2, 32], strides = [1, 1]} : vector<2x128xf32> to vector<2x32xf32>
    %68 = arith.negf %67 : vector<2x32xf32>
    %69 = math.exp %68 : vector<2x32xf32>
    %cst_17 = arith.constant 1.000000e+00 : f32
    %70 = vector.broadcast %cst_17 : f32 to vector<2x32xf32>
    %71 = arith.addf %70, %69 : vector<2x32xf32>
    %72 = arith.divf %70, %71 : vector<2x32xf32>
    %73 = vector.extract_strided_slice %66 {offsets = [0, 32], sizes = [2, 32], strides = [1, 1]} : vector<2x128xf32> to vector<2x32xf32>
    %74 = arith.negf %73 : vector<2x32xf32>
    %75 = math.exp %74 : vector<2x32xf32>
    %cst_18 = arith.constant 1.000000e+00 : f32
    %76 = vector.broadcast %cst_18 : f32 to vector<2x32xf32>
    %77 = arith.addf %76, %75 : vector<2x32xf32>
    %78 = arith.divf %76, %77 : vector<2x32xf32>
    %79 = vector.extract_strided_slice %66 {offsets = [0, 64], sizes = [2, 32], strides = [1, 1]} : vector<2x128xf32> to vector<2x32xf32>
    %80 = math.tanh %79 : vector<2x32xf32>
    %81 = vector.extract_strided_slice %66 {offsets = [0, 96], sizes = [2, 32], strides = [1, 1]} : vector<2x128xf32> to vector<2x32xf32>
    %82 = arith.negf %81 : vector<2x32xf32>
    %83 = math.exp %82 : vector<2x32xf32>
    %cst_19 = arith.constant 1.000000e+00 : f32
    %84 = vector.broadcast %cst_19 : f32 to vector<2x32xf32>
    %85 = arith.addf %84, %83 : vector<2x32xf32>
    %86 = arith.divf %84, %85 : vector<2x32xf32>
    %87 = arith.mulf %78, %61 : vector<2x32xf32>
    %88 = arith.mulf %72, %80 : vector<2x32xf32>
    %89 = arith.addf %87, %88 : vector<2x32xf32>
    %90 = math.tanh %89 : vector<2x32xf32>
    %91 = arith.mulf %86, %90 : vector<2x32xf32>
    %92 = vector.extract_strided_slice %7 {offsets = [6, 0], sizes = [2, 128], strides = [1, 1]} : vector<16x128xf32> to vector<2x128xf32>
    %cst_20 = arith.constant dense<0.000000e+00> : vector<2x128xf32>
    %93 = tpu.matmul %91, %2, %cst_20 {dimension_numbers = #tpu.dot_dimension_numbers<[1], [0], [0], [1], [0, 0, 1, 1], [], []>} : vector<2x32xf32>, vector<32x128xf32>, vector<2x128xf32> -> vector<2x128xf32>
    %94 = arith.addf %92, %93 : vector<2x128xf32>
    %95 = vector.extract_strided_slice %94 {offsets = [0, 0], sizes = [2, 32], strides = [1, 1]} : vector<2x128xf32> to vector<2x32xf32>
    %96 = arith.negf %95 : vector<2x32xf32>
    %97 = math.exp %96 : vector<2x32xf32>
    %cst_21 = arith.constant 1.000000e+00 : f32
    %98 = vector.broadcast %cst_21 : f32 to vector<2x32xf32>
    %99 = arith.addf %98, %97 : vector<2x32xf32>
    %100 = arith.divf %98, %99 : vector<2x32xf32>
    %101 = vector.extract_strided_slice %94 {offsets = [0, 32], sizes = [2, 32], strides = [1, 1]} : vector<2x128xf32> to vector<2x32xf32>
    %102 = arith.negf %101 : vector<2x32xf32>
    %103 = math.exp %102 : vector<2x32xf32>
    %cst_22 = arith.constant 1.000000e+00 : f32
    %104 = vector.broadcast %cst_22 : f32 to vector<2x32xf32>
    %105 = arith.addf %104, %103 : vector<2x32xf32>
    %106 = arith.divf %104, %105 : vector<2x32xf32>
    %107 = vector.extract_strided_slice %94 {offsets = [0, 64], sizes = [2, 32], strides = [1, 1]} : vector<2x128xf32> to vector<2x32xf32>
    %108 = math.tanh %107 : vector<2x32xf32>
    %109 = vector.extract_strided_slice %94 {offsets = [0, 96], sizes = [2, 32], strides = [1, 1]} : vector<2x128xf32> to vector<2x32xf32>
    %110 = arith.negf %109 : vector<2x32xf32>
    %111 = math.exp %110 : vector<2x32xf32>
    %cst_23 = arith.constant 1.000000e+00 : f32
    %112 = vector.broadcast %cst_23 : f32 to vector<2x32xf32>
    %113 = arith.addf %112, %111 : vector<2x32xf32>
    %114 = arith.divf %112, %113 : vector<2x32xf32>
    %115 = arith.mulf %106, %89 : vector<2x32xf32>
    %116 = arith.mulf %100, %108 : vector<2x32xf32>
    %117 = arith.addf %115, %116 : vector<2x32xf32>
    %118 = math.tanh %117 : vector<2x32xf32>
    %119 = arith.mulf %114, %118 : vector<2x32xf32>
    %120 = vector.extract_strided_slice %7 {offsets = [8, 0], sizes = [2, 128], strides = [1, 1]} : vector<16x128xf32> to vector<2x128xf32>
    %cst_24 = arith.constant dense<0.000000e+00> : vector<2x128xf32>
    %121 = tpu.matmul %119, %2, %cst_24 {dimension_numbers = #tpu.dot_dimension_numbers<[1], [0], [0], [1], [0, 0, 1, 1], [], []>} : vector<2x32xf32>, vector<32x128xf32>, vector<2x128xf32> -> vector<2x128xf32>
    %122 = arith.addf %120, %121 : vector<2x128xf32>
    %123 = vector.extract_strided_slice %122 {offsets = [0, 0], sizes = [2, 32], strides = [1, 1]} : vector<2x128xf32> to vector<2x32xf32>
    %124 = arith.negf %123 : vector<2x32xf32>
    %125 = math.exp %124 : vector<2x32xf32>
    %cst_25 = arith.constant 1.000000e+00 : f32
    %126 = vector.broadcast %cst_25 : f32 to vector<2x32xf32>
    %127 = arith.addf %126, %125 : vector<2x32xf32>
    %128 = arith.divf %126, %127 : vector<2x32xf32>
    %129 = vector.extract_strided_slice %122 {offsets = [0, 32], sizes = [2, 32], strides = [1, 1]} : vector<2x128xf32> to vector<2x32xf32>
    %130 = arith.negf %129 : vector<2x32xf32>
    %131 = math.exp %130 : vector<2x32xf32>
    %cst_26 = arith.constant 1.000000e+00 : f32
    %132 = vector.broadcast %cst_26 : f32 to vector<2x32xf32>
    %133 = arith.addf %132, %131 : vector<2x32xf32>
    %134 = arith.divf %132, %133 : vector<2x32xf32>
    %135 = vector.extract_strided_slice %122 {offsets = [0, 64], sizes = [2, 32], strides = [1, 1]} : vector<2x128xf32> to vector<2x32xf32>
    %136 = math.tanh %135 : vector<2x32xf32>
    %137 = vector.extract_strided_slice %122 {offsets = [0, 96], sizes = [2, 32], strides = [1, 1]} : vector<2x128xf32> to vector<2x32xf32>
    %138 = arith.negf %137 : vector<2x32xf32>
    %139 = math.exp %138 : vector<2x32xf32>
    %cst_27 = arith.constant 1.000000e+00 : f32
    %140 = vector.broadcast %cst_27 : f32 to vector<2x32xf32>
    %141 = arith.addf %140, %139 : vector<2x32xf32>
    %142 = arith.divf %140, %141 : vector<2x32xf32>
    %143 = arith.mulf %134, %117 : vector<2x32xf32>
    %144 = arith.mulf %128, %136 : vector<2x32xf32>
    %145 = arith.addf %143, %144 : vector<2x32xf32>
    %146 = math.tanh %145 : vector<2x32xf32>
    %147 = arith.mulf %142, %146 : vector<2x32xf32>
    %148 = vector.extract_strided_slice %7 {offsets = [10, 0], sizes = [2, 128], strides = [1, 1]} : vector<16x128xf32> to vector<2x128xf32>
    %cst_28 = arith.constant dense<0.000000e+00> : vector<2x128xf32>
    %149 = tpu.matmul %147, %2, %cst_28 {dimension_numbers = #tpu.dot_dimension_numbers<[1], [0], [0], [1], [0, 0, 1, 1], [], []>} : vector<2x32xf32>, vector<32x128xf32>, vector<2x128xf32> -> vector<2x128xf32>
    %150 = arith.addf %148, %149 : vector<2x128xf32>
    %151 = vector.extract_strided_slice %150 {offsets = [0, 0], sizes = [2, 32], strides = [1, 1]} : vector<2x128xf32> to vector<2x32xf32>
    %152 = arith.negf %151 : vector<2x32xf32>
    %153 = math.exp %152 : vector<2x32xf32>
    %cst_29 = arith.constant 1.000000e+00 : f32
    %154 = vector.broadcast %cst_29 : f32 to vector<2x32xf32>
    %155 = arith.addf %154, %153 : vector<2x32xf32>
    %156 = arith.divf %154, %155 : vector<2x32xf32>
    %157 = vector.extract_strided_slice %150 {offsets = [0, 32], sizes = [2, 32], strides = [1, 1]} : vector<2x128xf32> to vector<2x32xf32>
    %158 = arith.negf %157 : vector<2x32xf32>
    %159 = math.exp %158 : vector<2x32xf32>
    %cst_30 = arith.constant 1.000000e+00 : f32
    %160 = vector.broadcast %cst_30 : f32 to vector<2x32xf32>
    %161 = arith.addf %160, %159 : vector<2x32xf32>
    %162 = arith.divf %160, %161 : vector<2x32xf32>
    %163 = vector.extract_strided_slice %150 {offsets = [0, 64], sizes = [2, 32], strides = [1, 1]} : vector<2x128xf32> to vector<2x32xf32>
    %164 = math.tanh %163 : vector<2x32xf32>
    %165 = vector.extract_strided_slice %150 {offsets = [0, 96], sizes = [2, 32], strides = [1, 1]} : vector<2x128xf32> to vector<2x32xf32>
    %166 = arith.negf %165 : vector<2x32xf32>
    %167 = math.exp %166 : vector<2x32xf32>
    %cst_31 = arith.constant 1.000000e+00 : f32
    %168 = vector.broadcast %cst_31 : f32 to vector<2x32xf32>
    %169 = arith.addf %168, %167 : vector<2x32xf32>
    %170 = arith.divf %168, %169 : vector<2x32xf32>
    %171 = arith.mulf %162, %145 : vector<2x32xf32>
    %172 = arith.mulf %156, %164 : vector<2x32xf32>
    %173 = arith.addf %171, %172 : vector<2x32xf32>
    %174 = math.tanh %173 : vector<2x32xf32>
    %175 = arith.mulf %170, %174 : vector<2x32xf32>
    %176 = vector.extract_strided_slice %7 {offsets = [12, 0], sizes = [2, 128], strides = [1, 1]} : vector<16x128xf32> to vector<2x128xf32>
    %cst_32 = arith.constant dense<0.000000e+00> : vector<2x128xf32>
    %177 = tpu.matmul %175, %2, %cst_32 {dimension_numbers = #tpu.dot_dimension_numbers<[1], [0], [0], [1], [0, 0, 1, 1], [], []>} : vector<2x32xf32>, vector<32x128xf32>, vector<2x128xf32> -> vector<2x128xf32>
    %178 = arith.addf %176, %177 : vector<2x128xf32>
    %179 = vector.extract_strided_slice %178 {offsets = [0, 0], sizes = [2, 32], strides = [1, 1]} : vector<2x128xf32> to vector<2x32xf32>
    %180 = arith.negf %179 : vector<2x32xf32>
    %181 = math.exp %180 : vector<2x32xf32>
    %cst_33 = arith.constant 1.000000e+00 : f32
    %182 = vector.broadcast %cst_33 : f32 to vector<2x32xf32>
    %183 = arith.addf %182, %181 : vector<2x32xf32>
    %184 = arith.divf %182, %183 : vector<2x32xf32>
    %185 = vector.extract_strided_slice %178 {offsets = [0, 32], sizes = [2, 32], strides = [1, 1]} : vector<2x128xf32> to vector<2x32xf32>
    %186 = arith.negf %185 : vector<2x32xf32>
    %187 = math.exp %186 : vector<2x32xf32>
    %cst_34 = arith.constant 1.000000e+00 : f32
    %188 = vector.broadcast %cst_34 : f32 to vector<2x32xf32>
    %189 = arith.addf %188, %187 : vector<2x32xf32>
    %190 = arith.divf %188, %189 : vector<2x32xf32>
    %191 = vector.extract_strided_slice %178 {offsets = [0, 64], sizes = [2, 32], strides = [1, 1]} : vector<2x128xf32> to vector<2x32xf32>
    %192 = math.tanh %191 : vector<2x32xf32>
    %193 = vector.extract_strided_slice %178 {offsets = [0, 96], sizes = [2, 32], strides = [1, 1]} : vector<2x128xf32> to vector<2x32xf32>
    %194 = arith.negf %193 : vector<2x32xf32>
    %195 = math.exp %194 : vector<2x32xf32>
    %cst_35 = arith.constant 1.000000e+00 : f32
    %196 = vector.broadcast %cst_35 : f32 to vector<2x32xf32>
    %197 = arith.addf %196, %195 : vector<2x32xf32>
    %198 = arith.divf %196, %197 : vector<2x32xf32>
    %199 = arith.mulf %190, %173 : vector<2x32xf32>
    %200 = arith.mulf %184, %192 : vector<2x32xf32>
    %201 = arith.addf %199, %200 : vector<2x32xf32>
    %202 = math.tanh %201 : vector<2x32xf32>
    %203 = arith.mulf %198, %202 : vector<2x32xf32>
    %204 = vector.extract_strided_slice %7 {offsets = [14, 0], sizes = [2, 128], strides = [1, 1]} : vector<16x128xf32> to vector<2x128xf32>
    %cst_36 = arith.constant dense<0.000000e+00> : vector<2x128xf32>
    %205 = tpu.matmul %203, %2, %cst_36 {dimension_numbers = #tpu.dot_dimension_numbers<[1], [0], [0], [1], [0, 0, 1, 1], [], []>} : vector<2x32xf32>, vector<32x128xf32>, vector<2x128xf32> -> vector<2x128xf32>
    %206 = arith.addf %204, %205 : vector<2x128xf32>
    %207 = vector.extract_strided_slice %206 {offsets = [0, 0], sizes = [2, 32], strides = [1, 1]} : vector<2x128xf32> to vector<2x32xf32>
    %208 = arith.negf %207 : vector<2x32xf32>
    %209 = math.exp %208 : vector<2x32xf32>
    %cst_37 = arith.constant 1.000000e+00 : f32
    %210 = vector.broadcast %cst_37 : f32 to vector<2x32xf32>
    %211 = arith.addf %210, %209 : vector<2x32xf32>
    %212 = arith.divf %210, %211 : vector<2x32xf32>
    %213 = vector.extract_strided_slice %206 {offsets = [0, 32], sizes = [2, 32], strides = [1, 1]} : vector<2x128xf32> to vector<2x32xf32>
    %214 = arith.negf %213 : vector<2x32xf32>
    %215 = math.exp %214 : vector<2x32xf32>
    %cst_38 = arith.constant 1.000000e+00 : f32
    %216 = vector.broadcast %cst_38 : f32 to vector<2x32xf32>
    %217 = arith.addf %216, %215 : vector<2x32xf32>
    %218 = arith.divf %216, %217 : vector<2x32xf32>
    %219 = vector.extract_strided_slice %206 {offsets = [0, 64], sizes = [2, 32], strides = [1, 1]} : vector<2x128xf32> to vector<2x32xf32>
    %220 = math.tanh %219 : vector<2x32xf32>
    %221 = vector.extract_strided_slice %206 {offsets = [0, 96], sizes = [2, 32], strides = [1, 1]} : vector<2x128xf32> to vector<2x32xf32>
    %222 = arith.negf %221 : vector<2x32xf32>
    %223 = math.exp %222 : vector<2x32xf32>
    %cst_39 = arith.constant 1.000000e+00 : f32
    %224 = vector.broadcast %cst_39 : f32 to vector<2x32xf32>
    %225 = arith.addf %224, %223 : vector<2x32xf32>
    %226 = arith.divf %224, %225 : vector<2x32xf32>
    %227 = arith.mulf %218, %201 : vector<2x32xf32>
    %228 = arith.mulf %212, %220 : vector<2x32xf32>
    %229 = arith.addf %227, %228 : vector<2x32xf32>
    %230 = math.tanh %229 : vector<2x32xf32>
    %231 = arith.mulf %226, %230 : vector<2x32xf32>
    %232 = tpu.concatenate %35, %63, %91, %119, %147, %175, %203, %231 in 0 : vector<2x32xf32>, vector<2x32xf32>, vector<2x32xf32>, vector<2x32xf32>, vector<2x32xf32>, vector<2x32xf32>, vector<2x32xf32>, vector<2x32xf32> -> vector<16x32xf32>
    %c0_40 = arith.constant 0 : index
    %c0_41 = arith.constant 0 : index
    %233 = vector.load %arg6[%c0_40, %c0_41] : memref<32x128xf32, #tpu.memory_space<vmem>>, vector<32x128xf32>
    %c0_42 = arith.constant 0 : index
    %c0_43 = arith.constant 0 : index
    %234 = vector.load %arg5[%c0_42, %c0_43] : memref<32x128xf32, #tpu.memory_space<vmem>>, vector<32x128xf32>
    %cst_44 = arith.constant dense<0.000000e+00> : vector<16x128xf32>
    %235 = tpu.matmul %232, %234, %cst_44 {dimension_numbers = #tpu.dot_dimension_numbers<[1], [0], [0], [1], [0, 0, 1, 1], [], []>} : vector<16x32xf32>, vector<32x128xf32>, vector<16x128xf32> -> vector<16x128xf32>
    %c0_45 = arith.constant 0 : index
    %c0_46 = arith.constant 0 : index
    %236 = vector.load %arg7[%c0_45, %c0_46] : memref<1x128xf32, #tpu.memory_space<vmem>>, vector<1x128xf32>
    %237 = vector.broadcast %236 : vector<1x128xf32> to vector<16x128xf32>
    %238 = arith.addf %235, %237 : vector<16x128xf32>
    %239 = vector.extract_strided_slice %238 {offsets = [0, 0], sizes = [2, 128], strides = [1, 1]} : vector<16x128xf32> to vector<2x128xf32>
    %cst_47 = arith.constant dense<0.000000e+00> : vector<2x128xf32>
    %240 = tpu.matmul %1, %233, %cst_47 {dimension_numbers = #tpu.dot_dimension_numbers<[1], [0], [0], [1], [0, 0, 1, 1], [], []>} : vector<2x32xf32>, vector<32x128xf32>, vector<2x128xf32> -> vector<2x128xf32>
    %241 = arith.addf %239, %240 : vector<2x128xf32>
    %242 = vector.extract_strided_slice %241 {offsets = [0, 0], sizes = [2, 32], strides = [1, 1]} : vector<2x128xf32> to vector<2x32xf32>
    %243 = arith.negf %242 : vector<2x32xf32>
    %244 = math.exp %243 : vector<2x32xf32>
    %cst_48 = arith.constant 1.000000e+00 : f32
    %245 = vector.broadcast %cst_48 : f32 to vector<2x32xf32>
    %246 = arith.addf %245, %244 : vector<2x32xf32>
    %247 = arith.divf %245, %246 : vector<2x32xf32>
    %248 = vector.extract_strided_slice %241 {offsets = [0, 32], sizes = [2, 32], strides = [1, 1]} : vector<2x128xf32> to vector<2x32xf32>
    %249 = arith.negf %248 : vector<2x32xf32>
    %250 = math.exp %249 : vector<2x32xf32>
    %cst_49 = arith.constant 1.000000e+00 : f32
    %251 = vector.broadcast %cst_49 : f32 to vector<2x32xf32>
    %252 = arith.addf %251, %250 : vector<2x32xf32>
    %253 = arith.divf %251, %252 : vector<2x32xf32>
    %254 = vector.extract_strided_slice %241 {offsets = [0, 64], sizes = [2, 32], strides = [1, 1]} : vector<2x128xf32> to vector<2x32xf32>
    %255 = math.tanh %254 : vector<2x32xf32>
    %256 = vector.extract_strided_slice %241 {offsets = [0, 96], sizes = [2, 32], strides = [1, 1]} : vector<2x128xf32> to vector<2x32xf32>
    %257 = arith.negf %256 : vector<2x32xf32>
    %258 = math.exp %257 : vector<2x32xf32>
    %cst_50 = arith.constant 1.000000e+00 : f32
    %259 = vector.broadcast %cst_50 : f32 to vector<2x32xf32>
    %260 = arith.addf %259, %258 : vector<2x32xf32>
    %261 = arith.divf %259, %260 : vector<2x32xf32>
    %262 = arith.mulf %253, %1 : vector<2x32xf32>
    %263 = arith.mulf %247, %255 : vector<2x32xf32>
    %264 = arith.addf %262, %263 : vector<2x32xf32>
    %265 = math.tanh %264 : vector<2x32xf32>
    %266 = arith.mulf %261, %265 : vector<2x32xf32>
    %267 = vector.extract_strided_slice %238 {offsets = [2, 0], sizes = [2, 128], strides = [1, 1]} : vector<16x128xf32> to vector<2x128xf32>
    %cst_51 = arith.constant dense<0.000000e+00> : vector<2x128xf32>
    %268 = tpu.matmul %266, %233, %cst_51 {dimension_numbers = #tpu.dot_dimension_numbers<[1], [0], [0], [1], [0, 0, 1, 1], [], []>} : vector<2x32xf32>, vector<32x128xf32>, vector<2x128xf32> -> vector<2x128xf32>
    %269 = arith.addf %267, %268 : vector<2x128xf32>
    %270 = vector.extract_strided_slice %269 {offsets = [0, 0], sizes = [2, 32], strides = [1, 1]} : vector<2x128xf32> to vector<2x32xf32>
    %271 = arith.negf %270 : vector<2x32xf32>
    %272 = math.exp %271 : vector<2x32xf32>
    %cst_52 = arith.constant 1.000000e+00 : f32
    %273 = vector.broadcast %cst_52 : f32 to vector<2x32xf32>
    %274 = arith.addf %273, %272 : vector<2x32xf32>
    %275 = arith.divf %273, %274 : vector<2x32xf32>
    %276 = vector.extract_strided_slice %269 {offsets = [0, 32], sizes = [2, 32], strides = [1, 1]} : vector<2x128xf32> to vector<2x32xf32>
    %277 = arith.negf %276 : vector<2x32xf32>
    %278 = math.exp %277 : vector<2x32xf32>
    %cst_53 = arith.constant 1.000000e+00 : f32
    %279 = vector.broadcast %cst_53 : f32 to vector<2x32xf32>
    %280 = arith.addf %279, %278 : vector<2x32xf32>
    %281 = arith.divf %279, %280 : vector<2x32xf32>
    %282 = vector.extract_strided_slice %269 {offsets = [0, 64], sizes = [2, 32], strides = [1, 1]} : vector<2x128xf32> to vector<2x32xf32>
    %283 = math.tanh %282 : vector<2x32xf32>
    %284 = vector.extract_strided_slice %269 {offsets = [0, 96], sizes = [2, 32], strides = [1, 1]} : vector<2x128xf32> to vector<2x32xf32>
    %285 = arith.negf %284 : vector<2x32xf32>
    %286 = math.exp %285 : vector<2x32xf32>
    %cst_54 = arith.constant 1.000000e+00 : f32
    %287 = vector.broadcast %cst_54 : f32 to vector<2x32xf32>
    %288 = arith.addf %287, %286 : vector<2x32xf32>
    %289 = arith.divf %287, %288 : vector<2x32xf32>
    %290 = arith.mulf %281, %264 : vector<2x32xf32>
    %291 = arith.mulf %275, %283 : vector<2x32xf32>
    %292 = arith.addf %290, %291 : vector<2x32xf32>
    %293 = math.tanh %292 : vector<2x32xf32>
    %294 = arith.mulf %289, %293 : vector<2x32xf32>
    %295 = vector.extract_strided_slice %238 {offsets = [4, 0], sizes = [2, 128], strides = [1, 1]} : vector<16x128xf32> to vector<2x128xf32>
    %cst_55 = arith.constant dense<0.000000e+00> : vector<2x128xf32>
    %296 = tpu.matmul %294, %233, %cst_55 {dimension_numbers = #tpu.dot_dimension_numbers<[1], [0], [0], [1], [0, 0, 1, 1], [], []>} : vector<2x32xf32>, vector<32x128xf32>, vector<2x128xf32> -> vector<2x128xf32>
    %297 = arith.addf %295, %296 : vector<2x128xf32>
    %298 = vector.extract_strided_slice %297 {offsets = [0, 0], sizes = [2, 32], strides = [1, 1]} : vector<2x128xf32> to vector<2x32xf32>
    %299 = arith.negf %298 : vector<2x32xf32>
    %300 = math.exp %299 : vector<2x32xf32>
    %cst_56 = arith.constant 1.000000e+00 : f32
    %301 = vector.broadcast %cst_56 : f32 to vector<2x32xf32>
    %302 = arith.addf %301, %300 : vector<2x32xf32>
    %303 = arith.divf %301, %302 : vector<2x32xf32>
    %304 = vector.extract_strided_slice %297 {offsets = [0, 32], sizes = [2, 32], strides = [1, 1]} : vector<2x128xf32> to vector<2x32xf32>
    %305 = arith.negf %304 : vector<2x32xf32>
    %306 = math.exp %305 : vector<2x32xf32>
    %cst_57 = arith.constant 1.000000e+00 : f32
    %307 = vector.broadcast %cst_57 : f32 to vector<2x32xf32>
    %308 = arith.addf %307, %306 : vector<2x32xf32>
    %309 = arith.divf %307, %308 : vector<2x32xf32>
    %310 = vector.extract_strided_slice %297 {offsets = [0, 64], sizes = [2, 32], strides = [1, 1]} : vector<2x128xf32> to vector<2x32xf32>
    %311 = math.tanh %310 : vector<2x32xf32>
    %312 = vector.extract_strided_slice %297 {offsets = [0, 96], sizes = [2, 32], strides = [1, 1]} : vector<2x128xf32> to vector<2x32xf32>
    %313 = arith.negf %312 : vector<2x32xf32>
    %314 = math.exp %313 : vector<2x32xf32>
    %cst_58 = arith.constant 1.000000e+00 : f32
    %315 = vector.broadcast %cst_58 : f32 to vector<2x32xf32>
    %316 = arith.addf %315, %314 : vector<2x32xf32>
    %317 = arith.divf %315, %316 : vector<2x32xf32>
    %318 = arith.mulf %309, %292 : vector<2x32xf32>
    %319 = arith.mulf %303, %311 : vector<2x32xf32>
    %320 = arith.addf %318, %319 : vector<2x32xf32>
    %321 = math.tanh %320 : vector<2x32xf32>
    %322 = arith.mulf %317, %321 : vector<2x32xf32>
    %323 = vector.extract_strided_slice %238 {offsets = [6, 0], sizes = [2, 128], strides = [1, 1]} : vector<16x128xf32> to vector<2x128xf32>
    %cst_59 = arith.constant dense<0.000000e+00> : vector<2x128xf32>
    %324 = tpu.matmul %322, %233, %cst_59 {dimension_numbers = #tpu.dot_dimension_numbers<[1], [0], [0], [1], [0, 0, 1, 1], [], []>} : vector<2x32xf32>, vector<32x128xf32>, vector<2x128xf32> -> vector<2x128xf32>
    %325 = arith.addf %323, %324 : vector<2x128xf32>
    %326 = vector.extract_strided_slice %325 {offsets = [0, 0], sizes = [2, 32], strides = [1, 1]} : vector<2x128xf32> to vector<2x32xf32>
    %327 = arith.negf %326 : vector<2x32xf32>
    %328 = math.exp %327 : vector<2x32xf32>
    %cst_60 = arith.constant 1.000000e+00 : f32
    %329 = vector.broadcast %cst_60 : f32 to vector<2x32xf32>
    %330 = arith.addf %329, %328 : vector<2x32xf32>
    %331 = arith.divf %329, %330 : vector<2x32xf32>
    %332 = vector.extract_strided_slice %325 {offsets = [0, 32], sizes = [2, 32], strides = [1, 1]} : vector<2x128xf32> to vector<2x32xf32>
    %333 = arith.negf %332 : vector<2x32xf32>
    %334 = math.exp %333 : vector<2x32xf32>
    %cst_61 = arith.constant 1.000000e+00 : f32
    %335 = vector.broadcast %cst_61 : f32 to vector<2x32xf32>
    %336 = arith.addf %335, %334 : vector<2x32xf32>
    %337 = arith.divf %335, %336 : vector<2x32xf32>
    %338 = vector.extract_strided_slice %325 {offsets = [0, 64], sizes = [2, 32], strides = [1, 1]} : vector<2x128xf32> to vector<2x32xf32>
    %339 = math.tanh %338 : vector<2x32xf32>
    %340 = vector.extract_strided_slice %325 {offsets = [0, 96], sizes = [2, 32], strides = [1, 1]} : vector<2x128xf32> to vector<2x32xf32>
    %341 = arith.negf %340 : vector<2x32xf32>
    %342 = math.exp %341 : vector<2x32xf32>
    %cst_62 = arith.constant 1.000000e+00 : f32
    %343 = vector.broadcast %cst_62 : f32 to vector<2x32xf32>
    %344 = arith.addf %343, %342 : vector<2x32xf32>
    %345 = arith.divf %343, %344 : vector<2x32xf32>
    %346 = arith.mulf %337, %320 : vector<2x32xf32>
    %347 = arith.mulf %331, %339 : vector<2x32xf32>
    %348 = arith.addf %346, %347 : vector<2x32xf32>
    %349 = math.tanh %348 : vector<2x32xf32>
    %350 = arith.mulf %345, %349 : vector<2x32xf32>
    %351 = vector.extract_strided_slice %238 {offsets = [8, 0], sizes = [2, 128], strides = [1, 1]} : vector<16x128xf32> to vector<2x128xf32>
    %cst_63 = arith.constant dense<0.000000e+00> : vector<2x128xf32>
    %352 = tpu.matmul %350, %233, %cst_63 {dimension_numbers = #tpu.dot_dimension_numbers<[1], [0], [0], [1], [0, 0, 1, 1], [], []>} : vector<2x32xf32>, vector<32x128xf32>, vector<2x128xf32> -> vector<2x128xf32>
    %353 = arith.addf %351, %352 : vector<2x128xf32>
    %354 = vector.extract_strided_slice %353 {offsets = [0, 0], sizes = [2, 32], strides = [1, 1]} : vector<2x128xf32> to vector<2x32xf32>
    %355 = arith.negf %354 : vector<2x32xf32>
    %356 = math.exp %355 : vector<2x32xf32>
    %cst_64 = arith.constant 1.000000e+00 : f32
    %357 = vector.broadcast %cst_64 : f32 to vector<2x32xf32>
    %358 = arith.addf %357, %356 : vector<2x32xf32>
    %359 = arith.divf %357, %358 : vector<2x32xf32>
    %360 = vector.extract_strided_slice %353 {offsets = [0, 32], sizes = [2, 32], strides = [1, 1]} : vector<2x128xf32> to vector<2x32xf32>
    %361 = arith.negf %360 : vector<2x32xf32>
    %362 = math.exp %361 : vector<2x32xf32>
    %cst_65 = arith.constant 1.000000e+00 : f32
    %363 = vector.broadcast %cst_65 : f32 to vector<2x32xf32>
    %364 = arith.addf %363, %362 : vector<2x32xf32>
    %365 = arith.divf %363, %364 : vector<2x32xf32>
    %366 = vector.extract_strided_slice %353 {offsets = [0, 64], sizes = [2, 32], strides = [1, 1]} : vector<2x128xf32> to vector<2x32xf32>
    %367 = math.tanh %366 : vector<2x32xf32>
    %368 = vector.extract_strided_slice %353 {offsets = [0, 96], sizes = [2, 32], strides = [1, 1]} : vector<2x128xf32> to vector<2x32xf32>
    %369 = arith.negf %368 : vector<2x32xf32>
    %370 = math.exp %369 : vector<2x32xf32>
    %cst_66 = arith.constant 1.000000e+00 : f32
    %371 = vector.broadcast %cst_66 : f32 to vector<2x32xf32>
    %372 = arith.addf %371, %370 : vector<2x32xf32>
    %373 = arith.divf %371, %372 : vector<2x32xf32>
    %374 = arith.mulf %365, %348 : vector<2x32xf32>
    %375 = arith.mulf %359, %367 : vector<2x32xf32>
    %376 = arith.addf %374, %375 : vector<2x32xf32>
    %377 = math.tanh %376 : vector<2x32xf32>
    %378 = arith.mulf %373, %377 : vector<2x32xf32>
    %379 = vector.extract_strided_slice %238 {offsets = [10, 0], sizes = [2, 128], strides = [1, 1]} : vector<16x128xf32> to vector<2x128xf32>
    %cst_67 = arith.constant dense<0.000000e+00> : vector<2x128xf32>
    %380 = tpu.matmul %378, %233, %cst_67 {dimension_numbers = #tpu.dot_dimension_numbers<[1], [0], [0], [1], [0, 0, 1, 1], [], []>} : vector<2x32xf32>, vector<32x128xf32>, vector<2x128xf32> -> vector<2x128xf32>
    %381 = arith.addf %379, %380 : vector<2x128xf32>
    %382 = vector.extract_strided_slice %381 {offsets = [0, 0], sizes = [2, 32], strides = [1, 1]} : vector<2x128xf32> to vector<2x32xf32>
    %383 = arith.negf %382 : vector<2x32xf32>
    %384 = math.exp %383 : vector<2x32xf32>
    %cst_68 = arith.constant 1.000000e+00 : f32
    %385 = vector.broadcast %cst_68 : f32 to vector<2x32xf32>
    %386 = arith.addf %385, %384 : vector<2x32xf32>
    %387 = arith.divf %385, %386 : vector<2x32xf32>
    %388 = vector.extract_strided_slice %381 {offsets = [0, 32], sizes = [2, 32], strides = [1, 1]} : vector<2x128xf32> to vector<2x32xf32>
    %389 = arith.negf %388 : vector<2x32xf32>
    %390 = math.exp %389 : vector<2x32xf32>
    %cst_69 = arith.constant 1.000000e+00 : f32
    %391 = vector.broadcast %cst_69 : f32 to vector<2x32xf32>
    %392 = arith.addf %391, %390 : vector<2x32xf32>
    %393 = arith.divf %391, %392 : vector<2x32xf32>
    %394 = vector.extract_strided_slice %381 {offsets = [0, 64], sizes = [2, 32], strides = [1, 1]} : vector<2x128xf32> to vector<2x32xf32>
    %395 = math.tanh %394 : vector<2x32xf32>
    %396 = vector.extract_strided_slice %381 {offsets = [0, 96], sizes = [2, 32], strides = [1, 1]} : vector<2x128xf32> to vector<2x32xf32>
    %397 = arith.negf %396 : vector<2x32xf32>
    %398 = math.exp %397 : vector<2x32xf32>
    %cst_70 = arith.constant 1.000000e+00 : f32
    %399 = vector.broadcast %cst_70 : f32 to vector<2x32xf32>
    %400 = arith.addf %399, %398 : vector<2x32xf32>
    %401 = arith.divf %399, %400 : vector<2x32xf32>
    %402 = arith.mulf %393, %376 : vector<2x32xf32>
    %403 = arith.mulf %387, %395 : vector<2x32xf32>
    %404 = arith.addf %402, %403 : vector<2x32xf32>
    %405 = math.tanh %404 : vector<2x32xf32>
    %406 = arith.mulf %401, %405 : vector<2x32xf32>
    %407 = vector.extract_strided_slice %238 {offsets = [12, 0], sizes = [2, 128], strides = [1, 1]} : vector<16x128xf32> to vector<2x128xf32>
    %cst_71 = arith.constant dense<0.000000e+00> : vector<2x128xf32>
    %408 = tpu.matmul %406, %233, %cst_71 {dimension_numbers = #tpu.dot_dimension_numbers<[1], [0], [0], [1], [0, 0, 1, 1], [], []>} : vector<2x32xf32>, vector<32x128xf32>, vector<2x128xf32> -> vector<2x128xf32>
    %409 = arith.addf %407, %408 : vector<2x128xf32>
    %410 = vector.extract_strided_slice %409 {offsets = [0, 0], sizes = [2, 32], strides = [1, 1]} : vector<2x128xf32> to vector<2x32xf32>
    %411 = arith.negf %410 : vector<2x32xf32>
    %412 = math.exp %411 : vector<2x32xf32>
    %cst_72 = arith.constant 1.000000e+00 : f32
    %413 = vector.broadcast %cst_72 : f32 to vector<2x32xf32>
    %414 = arith.addf %413, %412 : vector<2x32xf32>
    %415 = arith.divf %413, %414 : vector<2x32xf32>
    %416 = vector.extract_strided_slice %409 {offsets = [0, 32], sizes = [2, 32], strides = [1, 1]} : vector<2x128xf32> to vector<2x32xf32>
    %417 = arith.negf %416 : vector<2x32xf32>
    %418 = math.exp %417 : vector<2x32xf32>
    %cst_73 = arith.constant 1.000000e+00 : f32
    %419 = vector.broadcast %cst_73 : f32 to vector<2x32xf32>
    %420 = arith.addf %419, %418 : vector<2x32xf32>
    %421 = arith.divf %419, %420 : vector<2x32xf32>
    %422 = vector.extract_strided_slice %409 {offsets = [0, 64], sizes = [2, 32], strides = [1, 1]} : vector<2x128xf32> to vector<2x32xf32>
    %423 = math.tanh %422 : vector<2x32xf32>
    %424 = vector.extract_strided_slice %409 {offsets = [0, 96], sizes = [2, 32], strides = [1, 1]} : vector<2x128xf32> to vector<2x32xf32>
    %425 = arith.negf %424 : vector<2x32xf32>
    %426 = math.exp %425 : vector<2x32xf32>
    %cst_74 = arith.constant 1.000000e+00 : f32
    %427 = vector.broadcast %cst_74 : f32 to vector<2x32xf32>
    %428 = arith.addf %427, %426 : vector<2x32xf32>
    %429 = arith.divf %427, %428 : vector<2x32xf32>
    %430 = arith.mulf %421, %404 : vector<2x32xf32>
    %431 = arith.mulf %415, %423 : vector<2x32xf32>
    %432 = arith.addf %430, %431 : vector<2x32xf32>
    %433 = math.tanh %432 : vector<2x32xf32>
    %434 = arith.mulf %429, %433 : vector<2x32xf32>
    %435 = vector.extract_strided_slice %238 {offsets = [14, 0], sizes = [2, 128], strides = [1, 1]} : vector<16x128xf32> to vector<2x128xf32>
    %cst_75 = arith.constant dense<0.000000e+00> : vector<2x128xf32>
    %436 = tpu.matmul %434, %233, %cst_75 {dimension_numbers = #tpu.dot_dimension_numbers<[1], [0], [0], [1], [0, 0, 1, 1], [], []>} : vector<2x32xf32>, vector<32x128xf32>, vector<2x128xf32> -> vector<2x128xf32>
    %437 = arith.addf %435, %436 : vector<2x128xf32>
    %438 = vector.extract_strided_slice %437 {offsets = [0, 0], sizes = [2, 32], strides = [1, 1]} : vector<2x128xf32> to vector<2x32xf32>
    %439 = arith.negf %438 : vector<2x32xf32>
    %440 = math.exp %439 : vector<2x32xf32>
    %cst_76 = arith.constant 1.000000e+00 : f32
    %441 = vector.broadcast %cst_76 : f32 to vector<2x32xf32>
    %442 = arith.addf %441, %440 : vector<2x32xf32>
    %443 = arith.divf %441, %442 : vector<2x32xf32>
    %444 = vector.extract_strided_slice %437 {offsets = [0, 32], sizes = [2, 32], strides = [1, 1]} : vector<2x128xf32> to vector<2x32xf32>
    %445 = arith.negf %444 : vector<2x32xf32>
    %446 = math.exp %445 : vector<2x32xf32>
    %cst_77 = arith.constant 1.000000e+00 : f32
    %447 = vector.broadcast %cst_77 : f32 to vector<2x32xf32>
    %448 = arith.addf %447, %446 : vector<2x32xf32>
    %449 = arith.divf %447, %448 : vector<2x32xf32>
    %450 = vector.extract_strided_slice %437 {offsets = [0, 64], sizes = [2, 32], strides = [1, 1]} : vector<2x128xf32> to vector<2x32xf32>
    %451 = math.tanh %450 : vector<2x32xf32>
    %452 = vector.extract_strided_slice %437 {offsets = [0, 96], sizes = [2, 32], strides = [1, 1]} : vector<2x128xf32> to vector<2x32xf32>
    %453 = arith.negf %452 : vector<2x32xf32>
    %454 = math.exp %453 : vector<2x32xf32>
    %cst_78 = arith.constant 1.000000e+00 : f32
    %455 = vector.broadcast %cst_78 : f32 to vector<2x32xf32>
    %456 = arith.addf %455, %454 : vector<2x32xf32>
    %457 = arith.divf %455, %456 : vector<2x32xf32>
    %458 = arith.mulf %449, %432 : vector<2x32xf32>
    %459 = arith.mulf %443, %451 : vector<2x32xf32>
    %460 = arith.addf %458, %459 : vector<2x32xf32>
    %461 = math.tanh %460 : vector<2x32xf32>
    %462 = arith.mulf %457, %461 : vector<2x32xf32>
    %c0_79 = arith.constant 0 : index
    %c0_80 = arith.constant 0 : index
    %463 = vector.load %arg22[%c0_79, %c0_80] : memref<2x32xf32, #tpu.memory_space<vmem>>, vector<2x32xf32>
    tpu.vector_store %arg22[%c0_79, %c0_80], %462 {strides = array<i32>} : memref<2x32xf32, #tpu.memory_space<vmem>>, vector<2x32xf32>,
    %c0_81 = arith.constant 0 : index
    %c0_82 = arith.constant 0 : index
    %464 = vector.load %arg9[%c0_81, %c0_82] : memref<32x128xf32, #tpu.memory_space<vmem>>, vector<32x128xf32>
    %c0_83 = arith.constant 0 : index
    %c0_84 = arith.constant 0 : index
    %465 = vector.load %arg10[%c0_83, %c0_84] : memref<1x128xf32, #tpu.memory_space<vmem>>, vector<1x128xf32>
    %c0_85 = arith.constant 0 : index
    %c0_86 = arith.constant 0 : index
    %466 = vector.load %arg8[%c0_85, %c0_86] : memref<4x128xf32, #tpu.memory_space<vmem>>, vector<4x128xf32>
    %cst_87 = arith.constant dense<0.000000e+00> : vector<16x128xf32>
    %467 = tpu.matmul %0, %466, %cst_87 {dimension_numbers = #tpu.dot_dimension_numbers<[1], [0], [0], [1], [0, 0, 1, 1], [], []>} : vector<16x4xf32>, vector<4x128xf32>, vector<16x128xf32> -> vector<16x128xf32>
    %468 = vector.extract_strided_slice %467 {offsets = [14, 0], sizes = [2, 128], strides = [1, 1]} : vector<16x128xf32> to vector<2x128xf32>
    %469 = vector.broadcast %465 : vector<1x128xf32> to vector<2x128xf32>
    %470 = arith.addf %468, %469 : vector<2x128xf32>
    %471 = vector.extract_strided_slice %467 {offsets = [12, 0], sizes = [2, 128], strides = [1, 1]} : vector<16x128xf32> to vector<2x128xf32>
    %472 = vector.broadcast %465 : vector<1x128xf32> to vector<2x128xf32>
    %473 = arith.addf %471, %472 : vector<2x128xf32>
    %474 = vector.extract_strided_slice %467 {offsets = [10, 0], sizes = [2, 128], strides = [1, 1]} : vector<16x128xf32> to vector<2x128xf32>
    %475 = vector.broadcast %465 : vector<1x128xf32> to vector<2x128xf32>
    %476 = arith.addf %474, %475 : vector<2x128xf32>
    %477 = vector.extract_strided_slice %467 {offsets = [8, 0], sizes = [2, 128], strides = [1, 1]} : vector<16x128xf32> to vector<2x128xf32>
    %478 = vector.broadcast %465 : vector<1x128xf32> to vector<2x128xf32>
    %479 = arith.addf %477, %478 : vector<2x128xf32>
    %480 = vector.extract_strided_slice %467 {offsets = [6, 0], sizes = [2, 128], strides = [1, 1]} : vector<16x128xf32> to vector<2x128xf32>
    %481 = vector.broadcast %465 : vector<1x128xf32> to vector<2x128xf32>
    %482 = arith.addf %480, %481 : vector<2x128xf32>
    %483 = vector.extract_strided_slice %467 {offsets = [4, 0], sizes = [2, 128], strides = [1, 1]} : vector<16x128xf32> to vector<2x128xf32>
    %484 = vector.broadcast %465 : vector<1x128xf32> to vector<2x128xf32>
    %485 = arith.addf %483, %484 : vector<2x128xf32>
    %486 = vector.extract_strided_slice %467 {offsets = [2, 0], sizes = [2, 128], strides = [1, 1]} : vector<16x128xf32> to vector<2x128xf32>
    %487 = vector.broadcast %465 : vector<1x128xf32> to vector<2x128xf32>
    %488 = arith.addf %486, %487 : vector<2x128xf32>
    %cst_88 = arith.constant dense<0.000000e+00> : vector<2x128xf32>
    %489 = tpu.matmul %231, %464, %cst_88 {dimension_numbers = #tpu.dot_dimension_numbers<[1], [0], [0], [1], [0, 0, 1, 1], [], []>} : vector<2x32xf32>, vector<32x128xf32>, vector<2x128xf32> -> vector<2x128xf32>
    %490 = vector.broadcast %465 : vector<1x128xf32> to vector<2x128xf32>
    %491 = arith.addf %490, %489 : vector<2x128xf32>
    %492 = vector.extract_strided_slice %491 {offsets = [0, 0], sizes = [2, 32], strides = [1, 1]} : vector<2x128xf32> to vector<2x32xf32>
    %493 = arith.negf %492 : vector<2x32xf32>
    %494 = math.exp %493 : vector<2x32xf32>
    %cst_89 = arith.constant 1.000000e+00 : f32
    %495 = vector.broadcast %cst_89 : f32 to vector<2x32xf32>
    %496 = arith.addf %495, %494 : vector<2x32xf32>
    %497 = arith.divf %495, %496 : vector<2x32xf32>
    %498 = vector.extract_strided_slice %491 {offsets = [0, 32], sizes = [2, 32], strides = [1, 1]} : vector<2x128xf32> to vector<2x32xf32>
    %499 = arith.negf %498 : vector<2x32xf32>
    %500 = math.exp %499 : vector<2x32xf32>
    %cst_90 = arith.constant 1.000000e+00 : f32
    %501 = vector.broadcast %cst_90 : f32 to vector<2x32xf32>
    %502 = arith.addf %501, %500 : vector<2x32xf32>
    %503 = arith.divf %501, %502 : vector<2x32xf32>
    %504 = vector.extract_strided_slice %491 {offsets = [0, 64], sizes = [2, 32], strides = [1, 1]} : vector<2x128xf32> to vector<2x32xf32>
    %505 = math.tanh %504 : vector<2x32xf32>
    %506 = vector.extract_strided_slice %491 {offsets = [0, 96], sizes = [2, 32], strides = [1, 1]} : vector<2x128xf32> to vector<2x32xf32>
    %507 = arith.negf %506 : vector<2x32xf32>
    %508 = math.exp %507 : vector<2x32xf32>
    %cst_91 = arith.constant 1.000000e+00 : f32
    %509 = vector.broadcast %cst_91 : f32 to vector<2x32xf32>
    %510 = arith.addf %509, %508 : vector<2x32xf32>
    %511 = arith.divf %509, %510 : vector<2x32xf32>
    %512 = arith.mulf %503, %229 : vector<2x32xf32>
    %513 = arith.mulf %497, %505 : vector<2x32xf32>
    %514 = arith.addf %512, %513 : vector<2x32xf32>
    %515 = math.tanh %514 : vector<2x32xf32>
    %516 = arith.mulf %511, %515 : vector<2x32xf32>
    %cst_92 = arith.constant dense<0.000000e+00> : vector<2x128xf32>
    %517 = tpu.matmul %516, %464, %cst_92 {dimension_numbers = #tpu.dot_dimension_numbers<[1], [0], [0], [1], [0, 0, 1, 1], [], []>} : vector<2x32xf32>, vector<32x128xf32>, vector<2x128xf32> -> vector<2x128xf32>
    %518 = arith.addf %470, %517 : vector<2x128xf32>
    %519 = vector.extract_strided_slice %518 {offsets = [0, 0], sizes = [2, 32], strides = [1, 1]} : vector<2x128xf32> to vector<2x32xf32>
    %520 = arith.negf %519 : vector<2x32xf32>
    %521 = math.exp %520 : vector<2x32xf32>
    %cst_93 = arith.constant 1.000000e+00 : f32
    %522 = vector.broadcast %cst_93 : f32 to vector<2x32xf32>
    %523 = arith.addf %522, %521 : vector<2x32xf32>
    %524 = arith.divf %522, %523 : vector<2x32xf32>
    %525 = vector.extract_strided_slice %518 {offsets = [0, 32], sizes = [2, 32], strides = [1, 1]} : vector<2x128xf32> to vector<2x32xf32>
    %526 = arith.negf %525 : vector<2x32xf32>
    %527 = math.exp %526 : vector<2x32xf32>
    %cst_94 = arith.constant 1.000000e+00 : f32
    %528 = vector.broadcast %cst_94 : f32 to vector<2x32xf32>
    %529 = arith.addf %528, %527 : vector<2x32xf32>
    %530 = arith.divf %528, %529 : vector<2x32xf32>
    %531 = vector.extract_strided_slice %518 {offsets = [0, 64], sizes = [2, 32], strides = [1, 1]} : vector<2x128xf32> to vector<2x32xf32>
    %532 = math.tanh %531 : vector<2x32xf32>
    %533 = vector.extract_strided_slice %518 {offsets = [0, 96], sizes = [2, 32], strides = [1, 1]} : vector<2x128xf32> to vector<2x32xf32>
    %534 = arith.negf %533 : vector<2x32xf32>
    %535 = math.exp %534 : vector<2x32xf32>
    %cst_95 = arith.constant 1.000000e+00 : f32
    %536 = vector.broadcast %cst_95 : f32 to vector<2x32xf32>
    %537 = arith.addf %536, %535 : vector<2x32xf32>
    %538 = arith.divf %536, %537 : vector<2x32xf32>
    %539 = arith.mulf %530, %514 : vector<2x32xf32>
    %540 = arith.mulf %524, %532 : vector<2x32xf32>
    %541 = arith.addf %539, %540 : vector<2x32xf32>
    %542 = math.tanh %541 : vector<2x32xf32>
    %543 = arith.mulf %538, %542 : vector<2x32xf32>
    %cst_96 = arith.constant dense<0.000000e+00> : vector<2x128xf32>
    %544 = tpu.matmul %543, %464, %cst_96 {dimension_numbers = #tpu.dot_dimension_numbers<[1], [0], [0], [1], [0, 0, 1, 1], [], []>} : vector<2x32xf32>, vector<32x128xf32>, vector<2x128xf32> -> vector<2x128xf32>
    %545 = arith.addf %473, %544 : vector<2x128xf32>
    %546 = vector.extract_strided_slice %545 {offsets = [0, 0], sizes = [2, 32], strides = [1, 1]} : vector<2x128xf32> to vector<2x32xf32>
    %547 = arith.negf %546 : vector<2x32xf32>
    %548 = math.exp %547 : vector<2x32xf32>
    %cst_97 = arith.constant 1.000000e+00 : f32
    %549 = vector.broadcast %cst_97 : f32 to vector<2x32xf32>
    %550 = arith.addf %549, %548 : vector<2x32xf32>
    %551 = arith.divf %549, %550 : vector<2x32xf32>
    %552 = vector.extract_strided_slice %545 {offsets = [0, 32], sizes = [2, 32], strides = [1, 1]} : vector<2x128xf32> to vector<2x32xf32>
    %553 = arith.negf %552 : vector<2x32xf32>
    %554 = math.exp %553 : vector<2x32xf32>
    %cst_98 = arith.constant 1.000000e+00 : f32
    %555 = vector.broadcast %cst_98 : f32 to vector<2x32xf32>
    %556 = arith.addf %555, %554 : vector<2x32xf32>
    %557 = arith.divf %555, %556 : vector<2x32xf32>
    %558 = vector.extract_strided_slice %545 {offsets = [0, 64], sizes = [2, 32], strides = [1, 1]} : vector<2x128xf32> to vector<2x32xf32>
    %559 = math.tanh %558 : vector<2x32xf32>
    %560 = vector.extract_strided_slice %545 {offsets = [0, 96], sizes = [2, 32], strides = [1, 1]} : vector<2x128xf32> to vector<2x32xf32>
    %561 = arith.negf %560 : vector<2x32xf32>
    %562 = math.exp %561 : vector<2x32xf32>
    %cst_99 = arith.constant 1.000000e+00 : f32
    %563 = vector.broadcast %cst_99 : f32 to vector<2x32xf32>
    %564 = arith.addf %563, %562 : vector<2x32xf32>
    %565 = arith.divf %563, %564 : vector<2x32xf32>
    %566 = arith.mulf %557, %541 : vector<2x32xf32>
    %567 = arith.mulf %551, %559 : vector<2x32xf32>
    %568 = arith.addf %566, %567 : vector<2x32xf32>
    %569 = math.tanh %568 : vector<2x32xf32>
    %570 = arith.mulf %565, %569 : vector<2x32xf32>
    %cst_100 = arith.constant dense<0.000000e+00> : vector<2x128xf32>
    %571 = tpu.matmul %570, %464, %cst_100 {dimension_numbers = #tpu.dot_dimension_numbers<[1], [0], [0], [1], [0, 0, 1, 1], [], []>} : vector<2x32xf32>, vector<32x128xf32>, vector<2x128xf32> -> vector<2x128xf32>
    %572 = arith.addf %476, %571 : vector<2x128xf32>
    %573 = vector.extract_strided_slice %572 {offsets = [0, 0], sizes = [2, 32], strides = [1, 1]} : vector<2x128xf32> to vector<2x32xf32>
    %574 = arith.negf %573 : vector<2x32xf32>
    %575 = math.exp %574 : vector<2x32xf32>
    %cst_101 = arith.constant 1.000000e+00 : f32
    %576 = vector.broadcast %cst_101 : f32 to vector<2x32xf32>
    %577 = arith.addf %576, %575 : vector<2x32xf32>
    %578 = arith.divf %576, %577 : vector<2x32xf32>
    %579 = vector.extract_strided_slice %572 {offsets = [0, 32], sizes = [2, 32], strides = [1, 1]} : vector<2x128xf32> to vector<2x32xf32>
    %580 = arith.negf %579 : vector<2x32xf32>
    %581 = math.exp %580 : vector<2x32xf32>
    %cst_102 = arith.constant 1.000000e+00 : f32
    %582 = vector.broadcast %cst_102 : f32 to vector<2x32xf32>
    %583 = arith.addf %582, %581 : vector<2x32xf32>
    %584 = arith.divf %582, %583 : vector<2x32xf32>
    %585 = vector.extract_strided_slice %572 {offsets = [0, 64], sizes = [2, 32], strides = [1, 1]} : vector<2x128xf32> to vector<2x32xf32>
    %586 = math.tanh %585 : vector<2x32xf32>
    %587 = vector.extract_strided_slice %572 {offsets = [0, 96], sizes = [2, 32], strides = [1, 1]} : vector<2x128xf32> to vector<2x32xf32>
    %588 = arith.negf %587 : vector<2x32xf32>
    %589 = math.exp %588 : vector<2x32xf32>
    %cst_103 = arith.constant 1.000000e+00 : f32
    %590 = vector.broadcast %cst_103 : f32 to vector<2x32xf32>
    %591 = arith.addf %590, %589 : vector<2x32xf32>
    %592 = arith.divf %590, %591 : vector<2x32xf32>
    %593 = arith.mulf %584, %568 : vector<2x32xf32>
    %594 = arith.mulf %578, %586 : vector<2x32xf32>
    %595 = arith.addf %593, %594 : vector<2x32xf32>
    %596 = math.tanh %595 : vector<2x32xf32>
    %597 = arith.mulf %592, %596 : vector<2x32xf32>
    %cst_104 = arith.constant dense<0.000000e+00> : vector<2x128xf32>
    %598 = tpu.matmul %597, %464, %cst_104 {dimension_numbers = #tpu.dot_dimension_numbers<[1], [0], [0], [1], [0, 0, 1, 1], [], []>} : vector<2x32xf32>, vector<32x128xf32>, vector<2x128xf32> -> vector<2x128xf32>
    %599 = arith.addf %479, %598 : vector<2x128xf32>
    %600 = vector.extract_strided_slice %599 {offsets = [0, 0], sizes = [2, 32], strides = [1, 1]} : vector<2x128xf32> to vector<2x32xf32>
    %601 = arith.negf %600 : vector<2x32xf32>
    %602 = math.exp %601 : vector<2x32xf32>
    %cst_105 = arith.constant 1.000000e+00 : f32
    %603 = vector.broadcast %cst_105 : f32 to vector<2x32xf32>
    %604 = arith.addf %603, %602 : vector<2x32xf32>
    %605 = arith.divf %603, %604 : vector<2x32xf32>
    %606 = vector.extract_strided_slice %599 {offsets = [0, 32], sizes = [2, 32], strides = [1, 1]} : vector<2x128xf32> to vector<2x32xf32>
    %607 = arith.negf %606 : vector<2x32xf32>
    %608 = math.exp %607 : vector<2x32xf32>
    %cst_106 = arith.constant 1.000000e+00 : f32
    %609 = vector.broadcast %cst_106 : f32 to vector<2x32xf32>
    %610 = arith.addf %609, %608 : vector<2x32xf32>
    %611 = arith.divf %609, %610 : vector<2x32xf32>
    %612 = vector.extract_strided_slice %599 {offsets = [0, 64], sizes = [2, 32], strides = [1, 1]} : vector<2x128xf32> to vector<2x32xf32>
    %613 = math.tanh %612 : vector<2x32xf32>
    %614 = vector.extract_strided_slice %599 {offsets = [0, 96], sizes = [2, 32], strides = [1, 1]} : vector<2x128xf32> to vector<2x32xf32>
    %615 = arith.negf %614 : vector<2x32xf32>
    %616 = math.exp %615 : vector<2x32xf32>
    %cst_107 = arith.constant 1.000000e+00 : f32
    %617 = vector.broadcast %cst_107 : f32 to vector<2x32xf32>
    %618 = arith.addf %617, %616 : vector<2x32xf32>
    %619 = arith.divf %617, %618 : vector<2x32xf32>
    %620 = arith.mulf %611, %595 : vector<2x32xf32>
    %621 = arith.mulf %605, %613 : vector<2x32xf32>
    %622 = arith.addf %620, %621 : vector<2x32xf32>
    %623 = math.tanh %622 : vector<2x32xf32>
    %624 = arith.mulf %619, %623 : vector<2x32xf32>
    %cst_108 = arith.constant dense<0.000000e+00> : vector<2x128xf32>
    %625 = tpu.matmul %624, %464, %cst_108 {dimension_numbers = #tpu.dot_dimension_numbers<[1], [0], [0], [1], [0, 0, 1, 1], [], []>} : vector<2x32xf32>, vector<32x128xf32>, vector<2x128xf32> -> vector<2x128xf32>
    %626 = arith.addf %482, %625 : vector<2x128xf32>
    %627 = vector.extract_strided_slice %626 {offsets = [0, 0], sizes = [2, 32], strides = [1, 1]} : vector<2x128xf32> to vector<2x32xf32>
    %628 = arith.negf %627 : vector<2x32xf32>
    %629 = math.exp %628 : vector<2x32xf32>
    %cst_109 = arith.constant 1.000000e+00 : f32
    %630 = vector.broadcast %cst_109 : f32 to vector<2x32xf32>
    %631 = arith.addf %630, %629 : vector<2x32xf32>
    %632 = arith.divf %630, %631 : vector<2x32xf32>
    %633 = vector.extract_strided_slice %626 {offsets = [0, 32], sizes = [2, 32], strides = [1, 1]} : vector<2x128xf32> to vector<2x32xf32>
    %634 = arith.negf %633 : vector<2x32xf32>
    %635 = math.exp %634 : vector<2x32xf32>
    %cst_110 = arith.constant 1.000000e+00 : f32
    %636 = vector.broadcast %cst_110 : f32 to vector<2x32xf32>
    %637 = arith.addf %636, %635 : vector<2x32xf32>
    %638 = arith.divf %636, %637 : vector<2x32xf32>
    %639 = vector.extract_strided_slice %626 {offsets = [0, 64], sizes = [2, 32], strides = [1, 1]} : vector<2x128xf32> to vector<2x32xf32>
    %640 = math.tanh %639 : vector<2x32xf32>
    %641 = vector.extract_strided_slice %626 {offsets = [0, 96], sizes = [2, 32], strides = [1, 1]} : vector<2x128xf32> to vector<2x32xf32>
    %642 = arith.negf %641 : vector<2x32xf32>
    %643 = math.exp %642 : vector<2x32xf32>
    %cst_111 = arith.constant 1.000000e+00 : f32
    %644 = vector.broadcast %cst_111 : f32 to vector<2x32xf32>
    %645 = arith.addf %644, %643 : vector<2x32xf32>
    %646 = arith.divf %644, %645 : vector<2x32xf32>
    %647 = arith.mulf %638, %622 : vector<2x32xf32>
    %648 = arith.mulf %632, %640 : vector<2x32xf32>
    %649 = arith.addf %647, %648 : vector<2x32xf32>
    %650 = math.tanh %649 : vector<2x32xf32>
    %651 = arith.mulf %646, %650 : vector<2x32xf32>
    %cst_112 = arith.constant dense<0.000000e+00> : vector<2x128xf32>
    %652 = tpu.matmul %651, %464, %cst_112 {dimension_numbers = #tpu.dot_dimension_numbers<[1], [0], [0], [1], [0, 0, 1, 1], [], []>} : vector<2x32xf32>, vector<32x128xf32>, vector<2x128xf32> -> vector<2x128xf32>
    %653 = arith.addf %485, %652 : vector<2x128xf32>
    %654 = vector.extract_strided_slice %653 {offsets = [0, 0], sizes = [2, 32], strides = [1, 1]} : vector<2x128xf32> to vector<2x32xf32>
    %655 = arith.negf %654 : vector<2x32xf32>
    %656 = math.exp %655 : vector<2x32xf32>
    %cst_113 = arith.constant 1.000000e+00 : f32
    %657 = vector.broadcast %cst_113 : f32 to vector<2x32xf32>
    %658 = arith.addf %657, %656 : vector<2x32xf32>
    %659 = arith.divf %657, %658 : vector<2x32xf32>
    %660 = vector.extract_strided_slice %653 {offsets = [0, 32], sizes = [2, 32], strides = [1, 1]} : vector<2x128xf32> to vector<2x32xf32>
    %661 = arith.negf %660 : vector<2x32xf32>
    %662 = math.exp %661 : vector<2x32xf32>
    %cst_114 = arith.constant 1.000000e+00 : f32
    %663 = vector.broadcast %cst_114 : f32 to vector<2x32xf32>
    %664 = arith.addf %663, %662 : vector<2x32xf32>
    %665 = arith.divf %663, %664 : vector<2x32xf32>
    %666 = vector.extract_strided_slice %653 {offsets = [0, 64], sizes = [2, 32], strides = [1, 1]} : vector<2x128xf32> to vector<2x32xf32>
    %667 = math.tanh %666 : vector<2x32xf32>
    %668 = vector.extract_strided_slice %653 {offsets = [0, 96], sizes = [2, 32], strides = [1, 1]} : vector<2x128xf32> to vector<2x32xf32>
    %669 = arith.negf %668 : vector<2x32xf32>
    %670 = math.exp %669 : vector<2x32xf32>
    %cst_115 = arith.constant 1.000000e+00 : f32
    %671 = vector.broadcast %cst_115 : f32 to vector<2x32xf32>
    %672 = arith.addf %671, %670 : vector<2x32xf32>
    %673 = arith.divf %671, %672 : vector<2x32xf32>
    %674 = arith.mulf %665, %649 : vector<2x32xf32>
    %675 = arith.mulf %659, %667 : vector<2x32xf32>
    %676 = arith.addf %674, %675 : vector<2x32xf32>
    %677 = math.tanh %676 : vector<2x32xf32>
    %678 = arith.mulf %673, %677 : vector<2x32xf32>
    %cst_116 = arith.constant dense<0.000000e+00> : vector<2x128xf32>
    %679 = tpu.matmul %678, %464, %cst_116 {dimension_numbers = #tpu.dot_dimension_numbers<[1], [0], [0], [1], [0, 0, 1, 1], [], []>} : vector<2x32xf32>, vector<32x128xf32>, vector<2x128xf32> -> vector<2x128xf32>
    %680 = arith.addf %488, %679 : vector<2x128xf32>
    %681 = vector.extract_strided_slice %680 {offsets = [0, 0], sizes = [2, 32], strides = [1, 1]} : vector<2x128xf32> to vector<2x32xf32>
    %682 = arith.negf %681 : vector<2x32xf32>
    %683 = math.exp %682 : vector<2x32xf32>
    %cst_117 = arith.constant 1.000000e+00 : f32
    %684 = vector.broadcast %cst_117 : f32 to vector<2x32xf32>
    %685 = arith.addf %684, %683 : vector<2x32xf32>
    %686 = arith.divf %684, %685 : vector<2x32xf32>
    %687 = vector.extract_strided_slice %680 {offsets = [0, 32], sizes = [2, 32], strides = [1, 1]} : vector<2x128xf32> to vector<2x32xf32>
    %688 = arith.negf %687 : vector<2x32xf32>
    %689 = math.exp %688 : vector<2x32xf32>
    %cst_118 = arith.constant 1.000000e+00 : f32
    %690 = vector.broadcast %cst_118 : f32 to vector<2x32xf32>
    %691 = arith.addf %690, %689 : vector<2x32xf32>
    %692 = arith.divf %690, %691 : vector<2x32xf32>
    %693 = vector.extract_strided_slice %680 {offsets = [0, 64], sizes = [2, 32], strides = [1, 1]} : vector<2x128xf32> to vector<2x32xf32>
    %694 = math.tanh %693 : vector<2x32xf32>
    %695 = vector.extract_strided_slice %680 {offsets = [0, 96], sizes = [2, 32], strides = [1, 1]} : vector<2x128xf32> to vector<2x32xf32>
    %696 = arith.negf %695 : vector<2x32xf32>
    %697 = math.exp %696 : vector<2x32xf32>
    %cst_119 = arith.constant 1.000000e+00 : f32
    %698 = vector.broadcast %cst_119 : f32 to vector<2x32xf32>
    %699 = arith.addf %698, %697 : vector<2x32xf32>
    %700 = arith.divf %698, %699 : vector<2x32xf32>
    %701 = arith.mulf %692, %676 : vector<2x32xf32>
    %702 = arith.mulf %686, %694 : vector<2x32xf32>
    %703 = arith.addf %701, %702 : vector<2x32xf32>
    %704 = math.tanh %703 : vector<2x32xf32>
    %705 = arith.mulf %700, %704 : vector<2x32xf32>
    %706 = tpu.concatenate %516, %543, %570, %597, %624, %651, %678, %705 in 0 : vector<2x32xf32>, vector<2x32xf32>, vector<2x32xf32>, vector<2x32xf32>, vector<2x32xf32>, vector<2x32xf32>, vector<2x32xf32>, vector<2x32xf32> -> vector<16x32xf32>
    %c0_120 = arith.constant 0 : index
    %c0_121 = arith.constant 0 : index
    %707 = vector.load %arg12[%c0_120, %c0_121] : memref<32x128xf32, #tpu.memory_space<vmem>>, vector<32x128xf32>
    %c0_122 = arith.constant 0 : index
    %c0_123 = arith.constant 0 : index
    %708 = vector.load %arg13[%c0_122, %c0_123] : memref<1x128xf32, #tpu.memory_space<vmem>>, vector<1x128xf32>
    %c0_124 = arith.constant 0 : index
    %c0_125 = arith.constant 0 : index
    %709 = vector.load %arg11[%c0_124, %c0_125] : memref<32x128xf32, #tpu.memory_space<vmem>>, vector<32x128xf32>
    %cst_126 = arith.constant dense<0.000000e+00> : vector<16x128xf32>
    %710 = tpu.matmul %706, %709, %cst_126 {dimension_numbers = #tpu.dot_dimension_numbers<[1], [0], [0], [1], [0, 0, 1, 1], [], []>} : vector<16x32xf32>, vector<32x128xf32>, vector<16x128xf32> -> vector<16x128xf32>
    %711 = vector.broadcast %708 : vector<1x128xf32> to vector<16x128xf32>
    %712 = arith.addf %710, %711 : vector<16x128xf32>
    %713 = vector.extract_strided_slice %712 {offsets = [0, 0], sizes = [2, 128], strides = [1, 1]} : vector<16x128xf32> to vector<2x128xf32>
    %714 = vector.extract_strided_slice %712 {offsets = [2, 0], sizes = [2, 128], strides = [1, 1]} : vector<16x128xf32> to vector<2x128xf32>
    %715 = vector.extract_strided_slice %712 {offsets = [4, 0], sizes = [2, 128], strides = [1, 1]} : vector<16x128xf32> to vector<2x128xf32>
    %716 = vector.extract_strided_slice %712 {offsets = [6, 0], sizes = [2, 128], strides = [1, 1]} : vector<16x128xf32> to vector<2x128xf32>
    %717 = vector.extract_strided_slice %712 {offsets = [8, 0], sizes = [2, 128], strides = [1, 1]} : vector<16x128xf32> to vector<2x128xf32>
    %718 = vector.extract_strided_slice %712 {offsets = [10, 0], sizes = [2, 128], strides = [1, 1]} : vector<16x128xf32> to vector<2x128xf32>
    %719 = vector.extract_strided_slice %712 {offsets = [12, 0], sizes = [2, 128], strides = [1, 1]} : vector<16x128xf32> to vector<2x128xf32>
    %720 = vector.extract_strided_slice %712 {offsets = [14, 0], sizes = [2, 128], strides = [1, 1]} : vector<16x128xf32> to vector<2x128xf32>
    %cst_127 = arith.constant dense<0.000000e+00> : vector<2x128xf32>
    %721 = tpu.matmul %462, %707, %cst_127 {dimension_numbers = #tpu.dot_dimension_numbers<[1], [0], [0], [1], [0, 0, 1, 1], [], []>} : vector<2x32xf32>, vector<32x128xf32>, vector<2x128xf32> -> vector<2x128xf32>
    %722 = arith.addf %713, %721 : vector<2x128xf32>
    %723 = vector.extract_strided_slice %722 {offsets = [0, 0], sizes = [2, 32], strides = [1, 1]} : vector<2x128xf32> to vector<2x32xf32>
    %724 = arith.negf %723 : vector<2x32xf32>
    %725 = math.exp %724 : vector<2x32xf32>
    %cst_128 = arith.constant 1.000000e+00 : f32
    %726 = vector.broadcast %cst_128 : f32 to vector<2x32xf32>
    %727 = arith.addf %726, %725 : vector<2x32xf32>
    %728 = arith.divf %726, %727 : vector<2x32xf32>
    %729 = vector.extract_strided_slice %722 {offsets = [0, 32], sizes = [2, 32], strides = [1, 1]} : vector<2x128xf32> to vector<2x32xf32>
    %730 = arith.negf %729 : vector<2x32xf32>
    %731 = math.exp %730 : vector<2x32xf32>
    %cst_129 = arith.constant 1.000000e+00 : f32
    %732 = vector.broadcast %cst_129 : f32 to vector<2x32xf32>
    %733 = arith.addf %732, %731 : vector<2x32xf32>
    %734 = arith.divf %732, %733 : vector<2x32xf32>
    %735 = vector.extract_strided_slice %722 {offsets = [0, 64], sizes = [2, 32], strides = [1, 1]} : vector<2x128xf32> to vector<2x32xf32>
    %736 = math.tanh %735 : vector<2x32xf32>
    %737 = vector.extract_strided_slice %722 {offsets = [0, 96], sizes = [2, 32], strides = [1, 1]} : vector<2x128xf32> to vector<2x32xf32>
    %738 = arith.negf %737 : vector<2x32xf32>
    %739 = math.exp %738 : vector<2x32xf32>
    %cst_130 = arith.constant 1.000000e+00 : f32
    %740 = vector.broadcast %cst_130 : f32 to vector<2x32xf32>
    %741 = arith.addf %740, %739 : vector<2x32xf32>
    %742 = arith.divf %740, %741 : vector<2x32xf32>
    %743 = arith.mulf %734, %460 : vector<2x32xf32>
    %744 = arith.mulf %728, %736 : vector<2x32xf32>
    %745 = arith.addf %743, %744 : vector<2x32xf32>
    %746 = math.tanh %745 : vector<2x32xf32>
    %747 = arith.mulf %742, %746 : vector<2x32xf32>
    %cst_131 = arith.constant dense<0.000000e+00> : vector<2x128xf32>
    %748 = tpu.matmul %747, %707, %cst_131 {dimension_numbers = #tpu.dot_dimension_numbers<[1], [0], [0], [1], [0, 0, 1, 1], [], []>} : vector<2x32xf32>, vector<32x128xf32>, vector<2x128xf32> -> vector<2x128xf32>
    %749 = arith.addf %714, %748 : vector<2x128xf32>
    %750 = vector.extract_strided_slice %749 {offsets = [0, 0], sizes = [2, 32], strides = [1, 1]} : vector<2x128xf32> to vector<2x32xf32>
    %751 = arith.negf %750 : vector<2x32xf32>
    %752 = math.exp %751 : vector<2x32xf32>
    %cst_132 = arith.constant 1.000000e+00 : f32
    %753 = vector.broadcast %cst_132 : f32 to vector<2x32xf32>
    %754 = arith.addf %753, %752 : vector<2x32xf32>
    %755 = arith.divf %753, %754 : vector<2x32xf32>
    %756 = vector.extract_strided_slice %749 {offsets = [0, 32], sizes = [2, 32], strides = [1, 1]} : vector<2x128xf32> to vector<2x32xf32>
    %757 = arith.negf %756 : vector<2x32xf32>
    %758 = math.exp %757 : vector<2x32xf32>
    %cst_133 = arith.constant 1.000000e+00 : f32
    %759 = vector.broadcast %cst_133 : f32 to vector<2x32xf32>
    %760 = arith.addf %759, %758 : vector<2x32xf32>
    %761 = arith.divf %759, %760 : vector<2x32xf32>
    %762 = vector.extract_strided_slice %749 {offsets = [0, 64], sizes = [2, 32], strides = [1, 1]} : vector<2x128xf32> to vector<2x32xf32>
    %763 = math.tanh %762 : vector<2x32xf32>
    %764 = vector.extract_strided_slice %749 {offsets = [0, 96], sizes = [2, 32], strides = [1, 1]} : vector<2x128xf32> to vector<2x32xf32>
    %765 = arith.negf %764 : vector<2x32xf32>
    %766 = math.exp %765 : vector<2x32xf32>
    %cst_134 = arith.constant 1.000000e+00 : f32
    %767 = vector.broadcast %cst_134 : f32 to vector<2x32xf32>
    %768 = arith.addf %767, %766 : vector<2x32xf32>
    %769 = arith.divf %767, %768 : vector<2x32xf32>
    %770 = arith.mulf %761, %745 : vector<2x32xf32>
    %771 = arith.mulf %755, %763 : vector<2x32xf32>
    %772 = arith.addf %770, %771 : vector<2x32xf32>
    %773 = math.tanh %772 : vector<2x32xf32>
    %774 = arith.mulf %769, %773 : vector<2x32xf32>
    %cst_135 = arith.constant dense<0.000000e+00> : vector<2x128xf32>
    %775 = tpu.matmul %774, %707, %cst_135 {dimension_numbers = #tpu.dot_dimension_numbers<[1], [0], [0], [1], [0, 0, 1, 1], [], []>} : vector<2x32xf32>, vector<32x128xf32>, vector<2x128xf32> -> vector<2x128xf32>
    %776 = arith.addf %715, %775 : vector<2x128xf32>
    %777 = vector.extract_strided_slice %776 {offsets = [0, 0], sizes = [2, 32], strides = [1, 1]} : vector<2x128xf32> to vector<2x32xf32>
    %778 = arith.negf %777 : vector<2x32xf32>
    %779 = math.exp %778 : vector<2x32xf32>
    %cst_136 = arith.constant 1.000000e+00 : f32
    %780 = vector.broadcast %cst_136 : f32 to vector<2x32xf32>
    %781 = arith.addf %780, %779 : vector<2x32xf32>
    %782 = arith.divf %780, %781 : vector<2x32xf32>
    %783 = vector.extract_strided_slice %776 {offsets = [0, 32], sizes = [2, 32], strides = [1, 1]} : vector<2x128xf32> to vector<2x32xf32>
    %784 = arith.negf %783 : vector<2x32xf32>
    %785 = math.exp %784 : vector<2x32xf32>
    %cst_137 = arith.constant 1.000000e+00 : f32
    %786 = vector.broadcast %cst_137 : f32 to vector<2x32xf32>
    %787 = arith.addf %786, %785 : vector<2x32xf32>
    %788 = arith.divf %786, %787 : vector<2x32xf32>
    %789 = vector.extract_strided_slice %776 {offsets = [0, 64], sizes = [2, 32], strides = [1, 1]} : vector<2x128xf32> to vector<2x32xf32>
    %790 = math.tanh %789 : vector<2x32xf32>
    %791 = vector.extract_strided_slice %776 {offsets = [0, 96], sizes = [2, 32], strides = [1, 1]} : vector<2x128xf32> to vector<2x32xf32>
    %792 = arith.negf %791 : vector<2x32xf32>
    %793 = math.exp %792 : vector<2x32xf32>
    %cst_138 = arith.constant 1.000000e+00 : f32
    %794 = vector.broadcast %cst_138 : f32 to vector<2x32xf32>
    %795 = arith.addf %794, %793 : vector<2x32xf32>
    %796 = arith.divf %794, %795 : vector<2x32xf32>
    %797 = arith.mulf %788, %772 : vector<2x32xf32>
    %798 = arith.mulf %782, %790 : vector<2x32xf32>
    %799 = arith.addf %797, %798 : vector<2x32xf32>
    %800 = math.tanh %799 : vector<2x32xf32>
    %801 = arith.mulf %796, %800 : vector<2x32xf32>
    %cst_139 = arith.constant dense<0.000000e+00> : vector<2x128xf32>
    %802 = tpu.matmul %801, %707, %cst_139 {dimension_numbers = #tpu.dot_dimension_numbers<[1], [0], [0], [1], [0, 0, 1, 1], [], []>} : vector<2x32xf32>, vector<32x128xf32>, vector<2x128xf32> -> vector<2x128xf32>
    %803 = arith.addf %716, %802 : vector<2x128xf32>
    %804 = vector.extract_strided_slice %803 {offsets = [0, 0], sizes = [2, 32], strides = [1, 1]} : vector<2x128xf32> to vector<2x32xf32>
    %805 = arith.negf %804 : vector<2x32xf32>
    %806 = math.exp %805 : vector<2x32xf32>
    %cst_140 = arith.constant 1.000000e+00 : f32
    %807 = vector.broadcast %cst_140 : f32 to vector<2x32xf32>
    %808 = arith.addf %807, %806 : vector<2x32xf32>
    %809 = arith.divf %807, %808 : vector<2x32xf32>
    %810 = vector.extract_strided_slice %803 {offsets = [0, 32], sizes = [2, 32], strides = [1, 1]} : vector<2x128xf32> to vector<2x32xf32>
    %811 = arith.negf %810 : vector<2x32xf32>
    %812 = math.exp %811 : vector<2x32xf32>
    %cst_141 = arith.constant 1.000000e+00 : f32
    %813 = vector.broadcast %cst_141 : f32 to vector<2x32xf32>
    %814 = arith.addf %813, %812 : vector<2x32xf32>
    %815 = arith.divf %813, %814 : vector<2x32xf32>
    %816 = vector.extract_strided_slice %803 {offsets = [0, 64], sizes = [2, 32], strides = [1, 1]} : vector<2x128xf32> to vector<2x32xf32>
    %817 = math.tanh %816 : vector<2x32xf32>
    %818 = vector.extract_strided_slice %803 {offsets = [0, 96], sizes = [2, 32], strides = [1, 1]} : vector<2x128xf32> to vector<2x32xf32>
    %819 = arith.negf %818 : vector<2x32xf32>
    %820 = math.exp %819 : vector<2x32xf32>
    %cst_142 = arith.constant 1.000000e+00 : f32
    %821 = vector.broadcast %cst_142 : f32 to vector<2x32xf32>
    %822 = arith.addf %821, %820 : vector<2x32xf32>
    %823 = arith.divf %821, %822 : vector<2x32xf32>
    %824 = arith.mulf %815, %799 : vector<2x32xf32>
    %825 = arith.mulf %809, %817 : vector<2x32xf32>
    %826 = arith.addf %824, %825 : vector<2x32xf32>
    %827 = math.tanh %826 : vector<2x32xf32>
    %828 = arith.mulf %823, %827 : vector<2x32xf32>
    %cst_143 = arith.constant dense<0.000000e+00> : vector<2x128xf32>
    %829 = tpu.matmul %828, %707, %cst_143 {dimension_numbers = #tpu.dot_dimension_numbers<[1], [0], [0], [1], [0, 0, 1, 1], [], []>} : vector<2x32xf32>, vector<32x128xf32>, vector<2x128xf32> -> vector<2x128xf32>
    %830 = arith.addf %717, %829 : vector<2x128xf32>
    %831 = vector.extract_strided_slice %830 {offsets = [0, 0], sizes = [2, 32], strides = [1, 1]} : vector<2x128xf32> to vector<2x32xf32>
    %832 = arith.negf %831 : vector<2x32xf32>
    %833 = math.exp %832 : vector<2x32xf32>
    %cst_144 = arith.constant 1.000000e+00 : f32
    %834 = vector.broadcast %cst_144 : f32 to vector<2x32xf32>
    %835 = arith.addf %834, %833 : vector<2x32xf32>
    %836 = arith.divf %834, %835 : vector<2x32xf32>
    %837 = vector.extract_strided_slice %830 {offsets = [0, 32], sizes = [2, 32], strides = [1, 1]} : vector<2x128xf32> to vector<2x32xf32>
    %838 = arith.negf %837 : vector<2x32xf32>
    %839 = math.exp %838 : vector<2x32xf32>
    %cst_145 = arith.constant 1.000000e+00 : f32
    %840 = vector.broadcast %cst_145 : f32 to vector<2x32xf32>
    %841 = arith.addf %840, %839 : vector<2x32xf32>
    %842 = arith.divf %840, %841 : vector<2x32xf32>
    %843 = vector.extract_strided_slice %830 {offsets = [0, 64], sizes = [2, 32], strides = [1, 1]} : vector<2x128xf32> to vector<2x32xf32>
    %844 = math.tanh %843 : vector<2x32xf32>
    %845 = vector.extract_strided_slice %830 {offsets = [0, 96], sizes = [2, 32], strides = [1, 1]} : vector<2x128xf32> to vector<2x32xf32>
    %846 = arith.negf %845 : vector<2x32xf32>
    %847 = math.exp %846 : vector<2x32xf32>
    %cst_146 = arith.constant 1.000000e+00 : f32
    %848 = vector.broadcast %cst_146 : f32 to vector<2x32xf32>
    %849 = arith.addf %848, %847 : vector<2x32xf32>
    %850 = arith.divf %848, %849 : vector<2x32xf32>
    %851 = arith.mulf %842, %826 : vector<2x32xf32>
    %852 = arith.mulf %836, %844 : vector<2x32xf32>
    %853 = arith.addf %851, %852 : vector<2x32xf32>
    %854 = math.tanh %853 : vector<2x32xf32>
    %855 = arith.mulf %850, %854 : vector<2x32xf32>
    %cst_147 = arith.constant dense<0.000000e+00> : vector<2x128xf32>
    %856 = tpu.matmul %855, %707, %cst_147 {dimension_numbers = #tpu.dot_dimension_numbers<[1], [0], [0], [1], [0, 0, 1, 1], [], []>} : vector<2x32xf32>, vector<32x128xf32>, vector<2x128xf32> -> vector<2x128xf32>
    %857 = arith.addf %718, %856 : vector<2x128xf32>
    %858 = vector.extract_strided_slice %857 {offsets = [0, 0], sizes = [2, 32], strides = [1, 1]} : vector<2x128xf32> to vector<2x32xf32>
    %859 = arith.negf %858 : vector<2x32xf32>
    %860 = math.exp %859 : vector<2x32xf32>
    %cst_148 = arith.constant 1.000000e+00 : f32
    %861 = vector.broadcast %cst_148 : f32 to vector<2x32xf32>
    %862 = arith.addf %861, %860 : vector<2x32xf32>
    %863 = arith.divf %861, %862 : vector<2x32xf32>
    %864 = vector.extract_strided_slice %857 {offsets = [0, 32], sizes = [2, 32], strides = [1, 1]} : vector<2x128xf32> to vector<2x32xf32>
    %865 = arith.negf %864 : vector<2x32xf32>
    %866 = math.exp %865 : vector<2x32xf32>
    %cst_149 = arith.constant 1.000000e+00 : f32
    %867 = vector.broadcast %cst_149 : f32 to vector<2x32xf32>
    %868 = arith.addf %867, %866 : vector<2x32xf32>
    %869 = arith.divf %867, %868 : vector<2x32xf32>
    %870 = vector.extract_strided_slice %857 {offsets = [0, 64], sizes = [2, 32], strides = [1, 1]} : vector<2x128xf32> to vector<2x32xf32>
    %871 = math.tanh %870 : vector<2x32xf32>
    %872 = vector.extract_strided_slice %857 {offsets = [0, 96], sizes = [2, 32], strides = [1, 1]} : vector<2x128xf32> to vector<2x32xf32>
    %873 = arith.negf %872 : vector<2x32xf32>
    %874 = math.exp %873 : vector<2x32xf32>
    %cst_150 = arith.constant 1.000000e+00 : f32
    %875 = vector.broadcast %cst_150 : f32 to vector<2x32xf32>
    %876 = arith.addf %875, %874 : vector<2x32xf32>
    %877 = arith.divf %875, %876 : vector<2x32xf32>
    %878 = arith.mulf %869, %853 : vector<2x32xf32>
    %879 = arith.mulf %863, %871 : vector<2x32xf32>
    %880 = arith.addf %878, %879 : vector<2x32xf32>
    %881 = math.tanh %880 : vector<2x32xf32>
    %882 = arith.mulf %877, %881 : vector<2x32xf32>
    %cst_151 = arith.constant dense<0.000000e+00> : vector<2x128xf32>
    %883 = tpu.matmul %882, %707, %cst_151 {dimension_numbers = #tpu.dot_dimension_numbers<[1], [0], [0], [1], [0, 0, 1, 1], [], []>} : vector<2x32xf32>, vector<32x128xf32>, vector<2x128xf32> -> vector<2x128xf32>
    %884 = arith.addf %719, %883 : vector<2x128xf32>
    %885 = vector.extract_strided_slice %884 {offsets = [0, 0], sizes = [2, 32], strides = [1, 1]} : vector<2x128xf32> to vector<2x32xf32>
    %886 = arith.negf %885 : vector<2x32xf32>
    %887 = math.exp %886 : vector<2x32xf32>
    %cst_152 = arith.constant 1.000000e+00 : f32
    %888 = vector.broadcast %cst_152 : f32 to vector<2x32xf32>
    %889 = arith.addf %888, %887 : vector<2x32xf32>
    %890 = arith.divf %888, %889 : vector<2x32xf32>
    %891 = vector.extract_strided_slice %884 {offsets = [0, 32], sizes = [2, 32], strides = [1, 1]} : vector<2x128xf32> to vector<2x32xf32>
    %892 = arith.negf %891 : vector<2x32xf32>
    %893 = math.exp %892 : vector<2x32xf32>
    %cst_153 = arith.constant 1.000000e+00 : f32
    %894 = vector.broadcast %cst_153 : f32 to vector<2x32xf32>
    %895 = arith.addf %894, %893 : vector<2x32xf32>
    %896 = arith.divf %894, %895 : vector<2x32xf32>
    %897 = vector.extract_strided_slice %884 {offsets = [0, 64], sizes = [2, 32], strides = [1, 1]} : vector<2x128xf32> to vector<2x32xf32>
    %898 = math.tanh %897 : vector<2x32xf32>
    %899 = vector.extract_strided_slice %884 {offsets = [0, 96], sizes = [2, 32], strides = [1, 1]} : vector<2x128xf32> to vector<2x32xf32>
    %900 = arith.negf %899 : vector<2x32xf32>
    %901 = math.exp %900 : vector<2x32xf32>
    %cst_154 = arith.constant 1.000000e+00 : f32
    %902 = vector.broadcast %cst_154 : f32 to vector<2x32xf32>
    %903 = arith.addf %902, %901 : vector<2x32xf32>
    %904 = arith.divf %902, %903 : vector<2x32xf32>
    %905 = arith.mulf %896, %880 : vector<2x32xf32>
    %906 = arith.mulf %890, %898 : vector<2x32xf32>
    %907 = arith.addf %905, %906 : vector<2x32xf32>
    %908 = math.tanh %907 : vector<2x32xf32>
    %909 = arith.mulf %904, %908 : vector<2x32xf32>
    %cst_155 = arith.constant dense<0.000000e+00> : vector<2x128xf32>
    %910 = tpu.matmul %909, %707, %cst_155 {dimension_numbers = #tpu.dot_dimension_numbers<[1], [0], [0], [1], [0, 0, 1, 1], [], []>} : vector<2x32xf32>, vector<32x128xf32>, vector<2x128xf32> -> vector<2x128xf32>
    %911 = arith.addf %720, %910 : vector<2x128xf32>
    %912 = vector.extract_strided_slice %911 {offsets = [0, 0], sizes = [2, 32], strides = [1, 1]} : vector<2x128xf32> to vector<2x32xf32>
    %913 = arith.negf %912 : vector<2x32xf32>
    %914 = math.exp %913 : vector<2x32xf32>
    %cst_156 = arith.constant 1.000000e+00 : f32
    %915 = vector.broadcast %cst_156 : f32 to vector<2x32xf32>
    %916 = arith.addf %915, %914 : vector<2x32xf32>
    %917 = arith.divf %915, %916 : vector<2x32xf32>
    %918 = vector.extract_strided_slice %911 {offsets = [0, 32], sizes = [2, 32], strides = [1, 1]} : vector<2x128xf32> to vector<2x32xf32>
    %919 = arith.negf %918 : vector<2x32xf32>
    %920 = math.exp %919 : vector<2x32xf32>
    %cst_157 = arith.constant 1.000000e+00 : f32
    %921 = vector.broadcast %cst_157 : f32 to vector<2x32xf32>
    %922 = arith.addf %921, %920 : vector<2x32xf32>
    %923 = arith.divf %921, %922 : vector<2x32xf32>
    %924 = vector.extract_strided_slice %911 {offsets = [0, 64], sizes = [2, 32], strides = [1, 1]} : vector<2x128xf32> to vector<2x32xf32>
    %925 = math.tanh %924 : vector<2x32xf32>
    %926 = vector.extract_strided_slice %911 {offsets = [0, 96], sizes = [2, 32], strides = [1, 1]} : vector<2x128xf32> to vector<2x32xf32>
    %927 = arith.negf %926 : vector<2x32xf32>
    %928 = math.exp %927 : vector<2x32xf32>
    %cst_158 = arith.constant 1.000000e+00 : f32
    %929 = vector.broadcast %cst_158 : f32 to vector<2x32xf32>
    %930 = arith.addf %929, %928 : vector<2x32xf32>
    %931 = arith.divf %929, %930 : vector<2x32xf32>
    %932 = arith.mulf %923, %907 : vector<2x32xf32>
    %933 = arith.mulf %917, %925 : vector<2x32xf32>
    %934 = arith.addf %932, %933 : vector<2x32xf32>
    %935 = math.tanh %934 : vector<2x32xf32>
    %936 = arith.mulf %931, %935 : vector<2x32xf32>
    %937 = tpu.concatenate %936, %909, %882, %855, %828, %801, %774, %747 in 0 : vector<2x32xf32>, vector<2x32xf32>, vector<2x32xf32>, vector<2x32xf32>, vector<2x32xf32>, vector<2x32xf32>, vector<2x32xf32>, vector<2x32xf32> -> vector<16x32xf32>
    %c0_159 = arith.constant 0 : index
    %c0_160 = arith.constant 0 : index
    %938 = vector.load %arg14[%c0_159, %c0_160] : memref<32x4xf32, #tpu.memory_space<vmem>>, vector<32x4xf32>
    %cst_161 = arith.constant dense<0.000000e+00> : vector<16x4xf32>
    %939 = tpu.matmul %937, %938, %cst_161 {dimension_numbers = #tpu.dot_dimension_numbers<[1], [0], [0], [1], [0, 0, 1, 1], [], []>} : vector<16x32xf32>, vector<32x4xf32>, vector<16x4xf32> -> vector<16x4xf32>
    %c0_162 = arith.constant 0 : index
    %c0_163 = arith.constant 0 : index
    %940 = vector.load %arg15[%c0_162, %c0_163] : memref<1x4xf32, #tpu.memory_space<vmem>>, vector<1x4xf32>
    %941 = vector.broadcast %940 : vector<1x4xf32> to vector<16x4xf32>
    %942 = arith.addf %939, %941 : vector<16x4xf32>
    %c0_164 = arith.constant 0 : index
    %c0_165 = arith.constant 0 : index
    %943 = vector.load %arg23[%c0_164, %c0_165] : memref<16x4xf32, #tpu.memory_space<vmem>>, vector<16x4xf32>
    tpu.vector_store %arg23[%c0_164, %c0_165], %942 {strides = array<i32>} : memref<16x4xf32, #tpu.memory_space<vmem>>, vector<16x4xf32>,
    %c0_166 = arith.constant 0 : index
    %c0_167 = arith.constant 0 : index
    %944 = vector.load %arg16[%c0_166, %c0_167] : memref<32x3xf32, #tpu.memory_space<vmem>>, vector<32x3xf32>
    %cst_168 = arith.constant dense<0.000000e+00> : vector<2x3xf32>
    %945 = tpu.matmul %462, %944, %cst_168 {dimension_numbers = #tpu.dot_dimension_numbers<[1], [0], [0], [1], [0, 0, 1, 1], [], []>} : vector<2x32xf32>, vector<32x3xf32>, vector<2x3xf32> -> vector<2x3xf32>
    %c0_169 = arith.constant 0 : index
    %c0_170 = arith.constant 0 : index
    %946 = vector.load %arg17[%c0_169, %c0_170] : memref<1x3xf32, #tpu.memory_space<vmem>>, vector<1x3xf32>
    %947 = vector.broadcast %946 : vector<1x3xf32> to vector<2x3xf32>
    %948 = arith.addf %945, %947 : vector<2x3xf32>
    %c0_171 = arith.constant 0 : index
    %c0_172 = arith.constant 0 : index
    %949 = vector.load %arg24[%c0_171, %c0_172] : memref<2x3xf32, #tpu.memory_space<vmem>>, vector<2x3xf32>
    tpu.vector_store %arg24[%c0_171, %c0_172], %948 {strides = array<i32>} : memref<2x3xf32, #tpu.memory_space<vmem>>, vector<2x3xf32>,
    %cst_173 = arith.constant dense<0xFF800000> : vector<2xf32>
    %950 = vector.multi_reduction <maximumf>, %948, %cst_173 [1] : vector<2x3xf32> to vector<2xf32>
    %951 = vector.shape_cast %950 : vector<2xf32> to vector<2x1xf32>
    %952 = vector.broadcast %951 : vector<2x1xf32> to vector<2x3xf32>
    %953 = arith.subf %948, %952 : vector<2x3xf32>
    %954 = math.exp %953 : vector<2x3xf32>
    %cst_174 = arith.constant dense<0.000000e+00> : vector<2xf32>
    %955 = vector.multi_reduction <add>, %954, %cst_174 [1] : vector<2x3xf32> to vector<2xf32>
    %956 = vector.shape_cast %955 : vector<2xf32> to vector<2x1xf32>
    %957 = vector.broadcast %956 : vector<2x1xf32> to vector<2x3xf32>
    %958 = arith.divf %954, %957 : vector<2x3xf32>
    %c0_175 = arith.constant 0 : index
    %c0_176 = arith.constant 0 : index
    %959 = vector.load %arg18[%c0_175, %c0_176] : memref<1x3xf32, #tpu.memory_space<vmem>>, vector<1x3xf32>
    %960 = vector.broadcast %959 : vector<1x3xf32> to vector<2x3xf32>
    %961 = arith.mulf %958, %960 : vector<2x3xf32>
    %cst_177 = arith.constant dense<0.000000e+00> : vector<2xf32>
    %962 = vector.multi_reduction <add>, %961, %cst_177 [1] : vector<2x3xf32> to vector<2xf32>
    %963 = vector.shape_cast %962 : vector<2xf32> to vector<2x1xf32>
    %c0_178 = arith.constant 0 : index
    %c0_179 = arith.constant 0 : index
    %964 = vector.load %arg19[%c0_178, %c0_179] : memref<1x1xf32, #tpu.memory_space<vmem>>, vector<1x1xf32>
    %965 = vector.broadcast %964 : vector<1x1xf32> to vector<2x1xf32>
    %966 = arith.addf %963, %965 : vector<2x1xf32>
    %c0_180 = arith.constant 0 : index
    %c0_181 = arith.constant 0 : index
    %967 = vector.load %arg1[%c0_180, %c0_181] : memref<2x5xf32, #tpu.memory_space<vmem>>, vector<2x5xf32>
    %c0_182 = arith.constant 0 : index
    %c0_183 = arith.constant 0 : index
    %968 = vector.load %arg20[%c0_182, %c0_183] : memref<1x5xf32, #tpu.memory_space<vmem>>, vector<1x5xf32>
    %969 = vector.broadcast %968 : vector<1x5xf32> to vector<2x5xf32>
    %970 = arith.mulf %967, %969 : vector<2x5xf32>
    %cst_184 = arith.constant dense<0.000000e+00> : vector<2xf32>
    %971 = vector.multi_reduction <add>, %970, %cst_184 [1] : vector<2x5xf32> to vector<2xf32>
    %972 = vector.shape_cast %971 : vector<2xf32> to vector<2x1xf32>
    %c0_185 = arith.constant 0 : index
    %c0_186 = arith.constant 0 : index
    %973 = vector.load %arg21[%c0_185, %c0_186] : memref<1x1xf32, #tpu.memory_space<vmem>>, vector<1x1xf32>
    %974 = vector.broadcast %973 : vector<1x1xf32> to vector<2x1xf32>
    %975 = arith.addf %972, %974 : vector<2x1xf32>
    %976 = arith.addf %966, %975 : vector<2x1xf32>
    %977 = arith.negf %976 : vector<2x1xf32>
    %978 = math.exp %977 : vector<2x1xf32>
    %cst_187 = arith.constant 1.000000e+00 : f32
    %979 = vector.broadcast %cst_187 : f32 to vector<2x1xf32>
    %980 = arith.addf %979, %978 : vector<2x1xf32>
    %981 = arith.divf %979, %980 : vector<2x1xf32>
    %c0_188 = arith.constant 0 : index
    %c0_189 = arith.constant 0 : index
    %982 = vector.load %arg25[%c0_188, %c0_189] : memref<2x1xf32, #tpu.memory_space<vmem>>, vector<2x1xf32>
    tpu.vector_store %arg25[%c0_188, %c0_189], %981 {strides = array<i32>} : memref<2x1xf32, #tpu.memory_space<vmem>>, vector<2x1xf32>,
    return
  }
}

</mosaic_0001>

<bundles_post_ra>
// kernel: model2_forward_outcome.1
= control target key start
LH: loop header
LB: loop body
LE: loop exit
PB: predicated region body
PF: predicated region fallthrough
CT: control target
= control target key end

     0   :  { %s4108_s0 = inlined_call_operand.vmem [shape: f32[16,4], index: 0, kind: input, shape index: {}]   ;;  %s4109_s1 = inlined_call_operand.vmem [shape: f32[2,5], index: 1, kind: input, shape index: {}]   ;;  %s4110_s2 = inlined_call_operand.vmem [shape: f32[4,128], index: 2, kind: input, shape index: {}]   ;;  %s4111_s3 = inlined_call_operand.vmem [shape: f32[32,128], index: 3, kind: input, shape index: {}]   ;;  %s4112_s4 = inlined_call_operand.vmem [shape: f32[1,128], index: 4, kind: input, shape index: {}]   ;;  %s4113_s5 = inlined_call_operand.vmem [shape: f32[32,128], index: 5, kind: input, shape index: {}]   ;;  %s4114_s6 = inlined_call_operand.hbm [shape: f32[32,128], index: 6, kind: input, shape index: {}]   ;;  %s4115_s7 = inlined_call_operand.vmem [shape: f32[1,128], index: 7, kind: input, shape index: {}]   ;;  %s4116_s8 = inlined_call_operand.vmem [shape: f32[4,128], index: 8, kind: input, shape index: {}]   ;;  %s4117_s9 = inlined_call_operand.hbm [shape: f32[32,128], index: 9, kind: input, shape index: {}]   ;;  %s4118_s10 = inlined_call_operand.vmem [shape: f32[1,128], index: 10, kind: input, shape index: {}]   ;;  %s4119_s11 = inlined_call_operand.hbm [shape: f32[32,128], index: 11, kind: input, shape index: {}]   ;;  %s4120_s12 = inlined_call_operand.hbm [shape: f32[32,128], index: 12, kind: input, shape index: {}]   ;;  %s4121_s13 = inlined_call_operand.vmem [shape: f32[1,128], index: 13, kind: input, shape index: {}]   ;;  %s4122_s14 = inlined_call_operand.vmem [shape: f32[32,4], index: 14, kind: input, shape index: {}]   ;;  %s4123_s15 = inlined_call_operand.vmem [shape: f32[1,4], index: 15, kind: input, shape index: {}]   ;;  %s4124_s16 = inlined_call_operand.vmem [shape: f32[32,3], index: 16, kind: input, shape index: {}]   ;;  %s4125_s17 = inlined_call_operand.vmem [shape: f32[1,3], index: 17, kind: input, shape index: {}]   ;;  %s4126_s18 = inlined_call_operand.vmem [shape: f32[1,3], index: 18, kind: input, shape index: {}]   ;;  %s4127_s19 = inlined_call_operand.<no memory space> [shape: f32[1,1], index: 19, kind: input, shape index: {}]   ;;  %s4128_s20 = inlined_call_operand.vmem [shape: f32[1,5], index: 20, kind: input, shape index: {}]   ;;  %s4129_s22 = inlined_call_operand.hbm [shape: f32[2,32], index: 22, kind: output, shape index: {0}]   ;;  %s4130_s23 = inlined_call_operand.vmem [shape: f32[16,4], index: 23, kind: output, shape index: {1}]   ;;  %s4131_s24 = inlined_call_operand.hbm [shape: f32[2,3], index: 24, kind: output, shape index: {2}]   ;;  %s4132_s25 = inlined_call_operand.vmem [shape: f32[2,1], index: 25, kind: output, shape index: {3}]   ;;  %s4133_s21 = inlined_call_operand.<no memory space> [shape: f32[1,1], index: 21, kind: input, shape index: {}]  }
   0x1   :  { %4137 = sst [smem:[#allocation20_spill]] %s4108_s0  ;;  %v31_v0 = vstv %s4127_s19  ;;  %v33_v1 = vstv %s4133_s21 }
   0x2   :  { %4138 = sst [smem:[#allocation21_spill]] %s4109_s1  ;;  %32 = vst [vmem:[#allocation2] sm:$0x1] %v31_v0 }
   0x3   :  { %4139 = sst [smem:[#allocation22_spill]] %s4110_s2  ;;  %34 = vst [vmem:[#allocation3] sm:$0x1] %v33_v1 }
   0x4   :  { %4140 = sst [smem:[#allocation23_spill]] %s4111_s3 }
   0x5   :  { %4141 = sst [smem:[#allocation24_spill]] %s4112_s4 }
   0x6   :  { %4142 = sst [smem:[#allocation25_spill]] %s4113_s5 }
   0x7   :  { %4143 = sst [smem:[#allocation26_spill]] %s4114_s6 }
   0x8   :  { %4144 = sst [smem:[#allocation27_spill]] %s4115_s7 }
   0x9   :  { %4145 = sst [smem:[#allocation28_spill]] %s4116_s8 }
   0xa   :  { %4146 = sst [smem:[#allocation29_spill]] %s4117_s9 }
   0xb   :  { %35 = vsyncpa [#allocation5], 0 }
   0xc   :  { %36 = vsyncpa [#allocation8], 0 }
   0xd   :  { %37 = vsyncpa [#allocation11], 0 }
   0xe   :  { %38 = vsyncpa [#allocation6], 0 }
   0xf   :  { %39 = vsyncpa [#allocation14], 0  ;;  %s4147_s26 = sld [smem:[#allocation29_spill]]  ;;  %s3268_s8 = smov [#allocation7]  }
  0x10   :  { %s75_s27 = sshll.u32 %s3268_s8, 4  ;;  %s4148_s28 = sld [smem:[#allocation26_spill]]  ;;  %s76_s27 = int_to_ptr.vmem [resolvable:$true] %s75_s27 }
  0x11   :  { %s3269_s21 = smov 128   ;;  %s3270_s5 = smov 8  }
  0x12   :  { %s3271_s0 = smov [#allocation4]   ;;  %s88_s30 = sshll.u32 %s4119_s11, 4  ;;  %s89_s30 = int_to_ptr.hbm [resolvable:$true] %s88_s30 }
  0x13   :  { %s58_s29 = sshll.u32 %s3271_s0, 4  ;;  %s3272_s8 = smov [#allocation9]   ;;  %s59_s29 = int_to_ptr.vmem [resolvable:$true] %s58_s29 }
  0x14   :  { %s90_s19 = sshll.u32 %s3272_s8, 4  ;;  %s91_s19 = int_to_ptr.vmem [resolvable:$true] %s90_s19 }
  0x15   :  { %s73_s1 = sshll.u32 %s4147_s26, 4  ;;  %s101_s26 = sshll.u32 %s4120_s12, 4  ;;  %s74_s1 = int_to_ptr.hbm [resolvable:$true] %s73_s1  ;;  %s102_s26 = int_to_ptr.hbm [resolvable:$true] %s101_s26 }
  0x16   :  { %s56_s9 = sshll.u32 %s4148_s28, 4  ;;  %s57_s9 = int_to_ptr.hbm [resolvable:$true] %s56_s9 }
  0x17   :  { %81 = dma.hbm_to_vmem [thread:$0]  %s74_s1, 512, %s76_s27, [#allocation8], %s3269_s21, %s3269_s21, %s3270_s5  }
  0x18   :  { %64 = dma.hbm_to_vmem [thread:$0]  %s57_s9, 512, %s59_s29, [#allocation5], %s3269_s21, %s3269_s21, %s3270_s5  }
  0x19   :  { %96 = dma.hbm_to_vmem [thread:$0]  %s89_s30, 512, %s91_s19, [#allocation8], %s3269_s21, %s3269_s21, %s3270_s5  }
  0x1a   :  { %s3273_s1 = smov [#allocation10]  }
  0x1b   :  { %s103_s27 = sshll.u32 %s3273_s1, 4  ;;  %s104_s27 = int_to_ptr.vmem [resolvable:$true] %s103_s27 }
  0x1c   :  { %109 = dma.hbm_to_vmem [thread:$0]  %s102_s26, 512, %s104_s27, [#allocation11], %s3269_s21, %s3269_s21, %s3270_s5  }
  0x1d   :  { %3258 = dma.done.wait [#allocation5], 512  }
  0x1e   :  { %3259 = vsyncadd [#allocation5], 4294966784 }
  0x1f   :  { %3260 = dma.done.wait [#allocation8], 1024  }
  0x20   :  { %3261 = vsyncadd [#allocation8], 4294966272 }
  0x21   :  { %3262 = dma.done.wait [#allocation11], 512  }
  0x22   :  { %3263 = vsyncadd [#allocation11], 4294966784  ;;  %vm162_vm0 = vcmask 1043456   ;;  %vm155_vm1 = vcmask 31744   ;;  %s4149_s12 = sld [smem:[#allocation23_spill]]  ;;  %v3274_v8 = vmov 0.0  }
  0x23   :  { %s4150_s5 = sld [smem:[#allocation22_spill]]  ;;  %s3275_s27 = smov 64   ;;  %vm189_vm6 = vcmask 261120   ;;  %vm736_vm15 = vcmask 1041408  }
  0x24   :  { %s4151_s7 = sld [smem:[#allocation20_spill]]  ;;  %s3276_s11 = smov 32  }
  0x25   :  { %s4152_s1 = sld [smem:[#allocation24_spill]]  ;;  %s2714_s30 = sshll.u32 %s4129_s22, 4  ;;  %s2715_s30 = int_to_ptr.hbm [resolvable:$true] %s2714_s30 }
  0x26   :  { %s4153_s0 = sld [smem:[#allocation25_spill]]  ;;  %s3278_s3 = smov [#allocation13]  }
  0x27   :  { %s4154_s8 = sld [smem:[#allocation27_spill]]  ;;  %s2725_s26 = sshll.u32 %s3278_s3, 4  ;;  %s2726_s26 = int_to_ptr.vmem [resolvable:$true] %s2725_s26 }
  0x28   :  { %v3430_v2 = vld [vmem:[%s4149_s12 + $0x18] sm:$0xff]  ;;  %v3435_v3 = vld [vmem:[%s4149_s12 + $0x10] sm:$0xff]  ;;  %v3445_v5 = vld [vmem:[%s4149_s12 + $0x8] sm:$0xff] }
  0x29   :  { %v150_v4 = vld [vmem:[%s4150_s5] sm:$0xf]  ;;  %205 = vmatpush.msra.mxu1 %v3430_v2  ;;  %338 = vmatpush.msra.mxu3 %v3430_v2 }
  0x2a   :  { %2750 = vmatpush.msk.msra.mxu0 %vm162_vm0, %v150_v4  ;;  %v144_v6 = vld [vmem:[%s4151_s7] sm:$0xff]  ;;  %2826 = vmatpush.msk.msra.mxu2 %vm162_vm0, %v150_v4  ;;  %v145_v34 = vld [vmem:[%s4151_s7 + $0x8] sm:$0xff] }
  0x2b   :  { %2751 = vmatmul.msk.f32.vlgmr.msra.gmra.mxu0 %vm155_vm1, %v144_v6  ;;  %v3454_v7 = vld [vmem:[%s4149_s12] sm:$0xff]  ;;  %206 = vmatpush.msra.mxu1 %v3435_v3  ;;  %s4155_s12 = sld [smem:[#allocation28_spill]] }
  0x2c   :  { %268 = vmatpush.msrb.mxu2 %v3430_v2  ;;  %614 = vmatpush.msrb.mxu0 %v3430_v2  ;;  %v3488_v9 = vld [vmem:[%s4152_s1] ss:$0 sm:$0xff] }
  0x2d   :  { %207 = vmatpush.msra.mxu1 %v3445_v5  ;;  %339 = vmatpush.msra.mxu3 %v3435_v3 }
  0x2e   :  { %269 = vmatpush.msrb.mxu2 %v3435_v3  ;;  %615 = vmatpush.msrb.mxu0 %v3435_v3 }
  0x2f   :  { %208 = vmatpush.msra.mxu1 %v3454_v7  ;;  %340 = vmatpush.msra.mxu3 %v3445_v5 }
  0x30   :  { %270 = vmatpush.msrb.mxu2 %v3445_v5  ;;  %209 = vmatmul.f32.vlgmr.msra.gmra.mxu1 %v3274_v8 }
  0x31   :  { %408 = vmatpush.msrb.mxu1 %v3430_v2  ;;  %341 = vmatpush.msra.mxu3 %v3454_v7 }
  0x32   :  { %271 = vmatpush.msrb.mxu2 %v3454_v7  ;;  %616 = vmatpush.msrb.mxu0 %v3445_v5 }
  0x33   :  { %409 = vmatpush.msrb.mxu1 %v3435_v3  ;;  %544 = vmatpush.msrb.mxu3 %v3430_v2 }
  0x34   :  { %617 = vmatpush.msrb.mxu0 %v3454_v7  ;;  %2752 = vmatmul.msk.f32.vlgmr.msra.gmra.mxu2 %vm155_vm1, %v145_v34 }
  0x35   :  { %410 = vmatpush.msrb.mxu1 %v3445_v5  ;;  %545 = vmatpush.msrb.mxu3 %v3435_v3 }
  0x36   :  { %478 = vmatpush.msra.mxu2 %v3430_v2 }
  0x37   :  { %411 = vmatpush.msrb.mxu1 %v3454_v7  ;;  %546 = vmatpush.msrb.mxu3 %v3445_v5 }
  0x38   :  { %479 = vmatpush.msra.mxu2 %v3435_v3 }
  0x39   :  { %684 = vmatpush.msra.mxu1 %v3430_v2  ;;  %547 = vmatpush.msrb.mxu3 %v3454_v7 }
  0x3a   :  { %480 = vmatpush.msra.mxu2 %v3445_v5 }
  0x3b   :  { %685 = vmatpush.msra.mxu1 %v3435_v3 }
  0x3c   :  { %481 = vmatpush.msra.mxu2 %v3454_v7 }
  0x3d   :  { %686 = vmatpush.msra.mxu1 %v3445_v5 }
  0x3f   :  { %687 = vmatpush.msra.mxu1 %v3454_v7 }
  0xa8   :  { %v183_v10 = vpop.f32.mrf.mxu0 }
  0xa9   :  { %v3491_v11 = vadd.f32 %v3488_v9, %v183_v10 }
  0xad   :  { %v210_v12 = vpop.f32.mrf.mxu1 }
  0xae   :  { %v213_v13 = vadd.f32 %v210_v12, %v3491_v11 }
  0xb0   :  { %2848 = vtanh.f32 %v213_v13  ;;  %v2753_v15 = vmul.f32 -1.442695, %v213_v13 }
  0xb2   :  { %2850 = vpow2.f32 %v2753_v15 }
  0xb6   :  { %v2849_v14 = vpop.eup %2848 }
  0xb7   :  { %236 = vrot.lane.b32.xlu0 %v2849_v14, %s3275_s27  ;;  %v3510_v38 = vpop.f32.mrf.mxu2 }
  0xb8   :  { %v2851_v16 = vpop.eup %2850 }
  0xb9   :  { %v217_v17 = vadd.f32 1.0, %v2851_v16 }
  0xbb   :  { %2852 = vrcp.f32 %v217_v17  ;;  %v229_v23 = vand.u32 2147483648, %v217_v17  ;;  %vm223_vm3 = vweird.f32 %v217_v17  ;;  %v227_v24 = vand.u32 2147483647, %v217_v17 }
  0xbd   :  { %v230_v26 = vor.u32 1.1754944e-38, %v229_v23  ;;  %vm228_vm5 = vcmp.eq.f32.partialorder %v227_v24, 8.507059e+37 }
  0xc1   :  { %v2853_v18 = vpop.eup %2852 }
  0xc2   :  { %v219_v19 = vmul.f32 %v2853_v18, %v217_v17  ;;  %vm224_vm2 = vweird.f32 %v2853_v18 }
  0xc3   :  { %vm225_vm4 = vmor %vm223_vm3, %vm224_vm2 }
  0xc4   :  { %v220_v20 = vsub.f32 1.0, %v219_v19 }
  0xc6   :  { %v221_v21 = vmul.f32 %v2853_v18, %v220_v20 }
  0xc8   :  { %v222_v22 = vadd.f32 %v2853_v18, %v221_v21 }
  0xca   :  { %v226_v25 = vsel %vm225_vm4, %v2853_v18, %v222_v22 }
  0xcb   :  { %v231_v28 = vsel %vm228_vm5, %v230_v26, %v226_v25 }
  0xcc   :  { %v234_v30 = vmul.f32 0.0, %v231_v28 }
 0x129   :  { %v237_v27 = vpop.permute.xlu0 %236 }
 0x12a   :  { %v239_v29 = vmul.f32 %v237_v27, %v231_v28 }
 0x12c   :  { %241 = vrot.lane.b32.xlu0 %v239_v29, %s3276_s11 }
 0x19e   :  { %v242_v31 = vpop.permute.xlu0 %241 }
 0x19f   :  { %v244_v32 = vadd.f32 %v242_v31, %v234_v30 }
 0x1a1   :  { %2854 = vtanh.f32 %v244_v32  ;;  %v301_v58 = vrot.slane %v244_v32, 6 }
 0x1a7   :  { %v2855_v33 = vpop.eup %2854 }
 0x1a8   :  { %247 = vrot.lane.b32.xlu1 %v2855_v33, %s3275_s27 }
 0x21a   :  { %v248_v35 = vpop.permute.xlu1 %247 }
 0x21b   :  { %v3505_v36 = vmul.f32 %v248_v35, %v231_v28 }
 0x21d   :  { %252 = vrot.lane.b32.xlu1 %v3505_v36, %s3276_s11 }
 0x28f   :  { %v253_v37 = vpop.permute.xlu1 %252 }
 0x290   :  { %2754 = vmatmul.msk.f32.vlgmr.msrb.gmra.mxu2 %vm189_vm6, %v253_v37 }
 0x313   :  { %v273_v39 = vpop.f32.mrf.mxu2 }
 0x314   :  { %v277_v40 = vrot.slane %v273_v39, 6 }
 0x316   :  { %v279_v41 = vadd.f32 %v277_v40, %v3491_v11 }
 0x318   :  { %2856 = vtanh.f32 %v279_v41  ;;  %v2755_v43 = vmul.f32 -1.442695, %v279_v41 }
 0x31a   :  { %2858 = vpow2.f32 %v2755_v43 }
 0x31e   :  { %v2857_v42 = vpop.eup %2856 }
 0x31f   :  { %305 = vrot.lane.b32.xlu2 %v2857_v42, %s3275_s27 }
 0x320   :  { %v2859_v44 = vpop.eup %2858 }
 0x321   :  { %v283_v45 = vadd.f32 1.0, %v2859_v44 }
 0x323   :  { %2860 = vrcp.f32 %v283_v45  ;;  %v295_v51 = vand.u32 2147483648, %v283_v45  ;;  %vm289_vm8 = vweird.f32 %v283_v45  ;;  %v293_v52 = vand.u32 2147483647, %v283_v45 }
 0x325   :  { %v296_v54 = vor.u32 1.1754944e-38, %v295_v51  ;;  %vm294_vm10 = vcmp.eq.f32.partialorder %v293_v52, 8.507059e+37 }
 0x329   :  { %v2861_v46 = vpop.eup %2860 }
 0x32a   :  { %v285_v47 = vmul.f32 %v2861_v46, %v283_v45  ;;  %vm290_vm7 = vweird.f32 %v2861_v46 }
 0x32b   :  { %vm291_vm9 = vmor %vm289_vm8, %vm290_vm7  ;;  %vm739_vm7 = vcmask 1045504  }
 0x32c   :  { %v286_v48 = vsub.f32 1.0, %v285_v47 }
 0x32e   :  { %v287_v49 = vmul.f32 %v2861_v46, %v286_v48 }
 0x330   :  { %v288_v50 = vadd.f32 %v2861_v46, %v287_v49 }
 0x332   :  { %v292_v53 = vsel %vm291_vm9, %v2861_v46, %v288_v50 }
 0x333   :  { %v297_v56 = vsel %vm294_vm10, %v296_v54, %v292_v53 }
 0x334   :  { %v303_v59 = vmul.f32 %v301_v58, %v297_v56 }
 0x379   :  { %v306_v55 = vpop.permute.xlu2 %305 }
 0x37a   :  { %v308_v57 = vmul.f32 %v306_v55, %v297_v56 }
 0x37c   :  { %310 = vrot.lane.b32.xlu2 %v308_v57, %s3276_s11 }
 0x3d6   :  { %v311_v60 = vpop.permute.xlu2 %310 }
 0x3d7   :  { %v313_v61 = vadd.f32 %v311_v60, %v303_v59 }
 0x3d9   :  { %2862 = vtanh.f32 %v313_v61  ;;  %v371_v25 = vrot.slane %v313_v61, 6 }
 0x3df   :  { %v2863_v62 = vpop.eup %2862 }
 0x3e0   :  { %316 = vrot.lane.b32.xlu0 %v2863_v62, %s3275_s27 }
 0x452   :  { %v317_v63 = vpop.permute.xlu0 %316 }
 0x453   :  { %v319_v0 = vmul.f32 %v317_v63, %v297_v56 }
 0x455   :  { %v321_v1 = vrot.slane %v319_v0, 2  ;;  %v737_v32 = vsel %vm736_vm15, %v3505_v36, %v319_v0 }
 0x457   :  { %322 = vrot.lane.b32.xlu1 %v321_v1, %s3276_s11  ;;  %v3536_v1 = vadd.f32 %v3488_v9, %v3510_v38 }
 0x4c9   :  { %v323_v2 = vpop.permute.xlu1 %322 }
 0x4ca   :  { %2756 = vmatmul.msk.f32.vlgmr.msra.gmra.mxu3 %vm189_vm6, %v323_v2 }
 0x54d   :  { %v343_v3 = vpop.f32.mrf.mxu3 }
 0x54e   :  { %v347_v4 = vrot.slane %v343_v3, 4 }
 0x550   :  { %v349_v5 = vadd.f32 %v347_v4, %v3491_v11 }
 0x552   :  { %2864 = vtanh.f32 %v349_v5  ;;  %v2757_v7 = vmul.f32 -1.442695, %v349_v5 }
 0x554   :  { %2866 = vpow2.f32 %v2757_v7 }
 0x558   :  { %v2865_v6 = vpop.eup %2864 }
 0x559   :  { %375 = vrot.lane.b32.xlu2 %v2865_v6, %s3275_s27 }
 0x55a   :  { %v2867_v10 = vpop.eup %2866 }
 0x55b   :  { %v353_v12 = vadd.f32 1.0, %v2867_v10 }
 0x55d   :  { %2868 = vrcp.f32 %v353_v12  ;;  %v365_v18 = vand.u32 2147483648, %v353_v12  ;;  %vm359_vm12 = vweird.f32 %v353_v12  ;;  %v363_v19 = vand.u32 2147483647, %v353_v12 }
 0x55f   :  { %v366_v21 = vor.u32 1.1754944e-38, %v365_v18  ;;  %vm364_vm14 = vcmp.eq.f32.partialorder %v363_v19, 8.507059e+37 }
 0x563   :  { %v2869_v13 = vpop.eup %2868 }
 0x564   :  { %v355_v14 = vmul.f32 %v2869_v13, %v353_v12  ;;  %vm360_vm11 = vweird.f32 %v2869_v13 }
 0x565   :  { %vm361_vm13 = vmor %vm359_vm12, %vm360_vm11 }
 0x566   :  { %v356_v15 = vsub.f32 1.0, %v355_v14 }
 0x568   :  { %v357_v16 = vmul.f32 %v2869_v13, %v356_v15 }
 0x56a   :  { %v358_v17 = vadd.f32 %v2869_v13, %v357_v16 }
 0x56c   :  { %v362_v20 = vsel %vm361_vm13, %v2869_v13, %v358_v17 }
 0x56d   :  { %v367_v23 = vsel %vm364_vm14, %v366_v21, %v362_v20  ;;  %v751_v21 = vld [vmem:[%s4153_s0 + $0x18] sm:$0xff] }
 0x56e   :  { %v373_v26 = vmul.f32 %v371_v25, %v367_v23  ;;  %778 = vmatpush.msrb.mxu2 %v751_v21 }
 0x5b3   :  { %v376_v22 = vpop.permute.xlu2 %375 }
 0x5b4   :  { %v378_v24 = vmul.f32 %v376_v22, %v367_v23  ;;  %v750_v22 = vld [vmem:[%s4153_s0 + $0x10] sm:$0xff] }
 0x5b5   :  { %779 = vmatpush.msrb.mxu2 %v750_v22 }
 0x5b6   :  { %380 = vrot.lane.b32.xlu0 %v378_v24, %s3276_s11  ;;  %v748_v24 = vld [vmem:[%s4153_s0] sm:$0xff] }
 0x628   :  { %v381_v27 = vpop.permute.xlu0 %380 }
 0x629   :  { %v383_v28 = vadd.f32 %v381_v27, %v373_v26 }
 0x62b   :  { %2870 = vtanh.f32 %v383_v28  ;;  %v441_v55 = vrot.slane %v383_v28, 6 }
 0x631   :  { %v2871_v29 = vpop.eup %2870 }
 0x632   :  { %386 = vrot.lane.b32.xlu1 %v2871_v29, %s3275_s27 }
 0x6a4   :  { %v387_v30 = vpop.permute.xlu1 %386 }
 0x6a5   :  { %v389_v31 = vmul.f32 %v387_v30, %v367_v23  ;;  %v749_v23 = vld [vmem:[%s4153_s0 + $0x8] sm:$0xff] }
 0x6a6   :  { %780 = vmatpush.msrb.mxu2 %v749_v23 }
 0x6a7   :  { %v391_v33 = vrot.slane %v389_v31, 4  ;;  %v738_v34 = vsel %vm162_vm0, %v737_v32, %v389_v31 }
 0x6a8   :  { %781 = vmatpush.msrb.mxu2 %v748_v24 }
 0x6a9   :  { %392 = vrot.lane.b32.xlu2 %v391_v33, %s3276_s11  ;;  %v3563_v33 = vld [vmem:[#allocation4 + $0x18] sm:$0xff] }
 0x6aa   :  { %801 = vmatpush.msra.mxu3 %v3563_v33  ;;  %864 = vmatpush.msra.mxu0 %v3563_v33 }
 0x703   :  { %v393_v35 = vpop.permute.xlu2 %392 }
 0x704   :  { %2758 = vmatmul.msk.f32.vlgmr.msrb.gmra.mxu1 %vm189_vm6, %v393_v35  ;;  %v3569_v35 = vld [vmem:[#allocation4 + $0x8] sm:$0xff] }
 0x705   :  { %934 = vmatpush.msrb.mxu1 %v3563_v33 }
 0x781   :  { %v413_v37 = vpop.f32.mrf.mxu1 }
 0x782   :  { %v417_v39 = vrot.slane %v413_v37, 2  ;;  %v3575_v37 = vld [vmem:[#allocation4] sm:$0xff] }
 0x784   :  { %v419_v40 = vadd.f32 %v417_v39, %v3491_v11 }
 0x786   :  { %2872 = vtanh.f32 %v419_v40  ;;  %v2759_v42 = vmul.f32 -1.442695, %v419_v40 }
 0x788   :  { %2874 = vpow2.f32 %v2759_v42  ;;  %v3600_v42 = vld [vmem:[%s4154_s8] ss:$0 sm:$0xff] }
 0x78c   :  { %v2873_v41 = vpop.eup %2872 }
 0x78d   :  { %445 = vrot.lane.b32.xlu0 %v2873_v41, %s3275_s27 }
 0x78e   :  { %v2875_v43 = vpop.eup %2874 }
 0x78f   :  { %v423_v36 = vadd.f32 1.0, %v2875_v43 }
 0x791   :  { %2876 = vrcp.f32 %v423_v36  ;;  %v435_v49 = vand.u32 2147483648, %v423_v36  ;;  %vm429_vm3 = vweird.f32 %v423_v36  ;;  %v433_v50 = vand.u32 2147483647, %v423_v36 }
 0x793   :  { %v436_v51 = vor.u32 1.1754944e-38, %v435_v49  ;;  %vm434_vm5 = vcmp.eq.f32.partialorder %v433_v50, 8.507059e+37 }
 0x797   :  { %v2877_v44 = vpop.eup %2876 }
 0x798   :  { %v425_v45 = vmul.f32 %v2877_v44, %v423_v36  ;;  %vm430_vm2 = vweird.f32 %v2877_v44 }
 0x799   :  { %vm431_vm4 = vmor %vm429_vm3, %vm430_vm2 }
 0x79a   :  { %v426_v46 = vsub.f32 1.0, %v425_v45 }
 0x79c   :  { %v427_v47 = vmul.f32 %v2877_v44, %v426_v46 }
 0x79e   :  { %v428_v48 = vadd.f32 %v2877_v44, %v427_v47 }
 0x7a0   :  { %v432_v11 = vsel %vm431_vm4, %v2877_v44, %v428_v48 }
 0x7a1   :  { %v437_v53 = vsel %vm434_vm5, %v436_v51, %v432_v11 }
 0x7a2   :  { %v443_v56 = vmul.f32 %v441_v55, %v437_v53 }
 0x7ff   :  { %v446_v52 = vpop.permute.xlu0 %445 }
 0x800   :  { %v448_v54 = vmul.f32 %v446_v52, %v437_v53 }
 0x802   :  { %450 = vrot.lane.b32.xlu1 %v448_v54, %s3276_s11 }
 0x874   :  { %v451_v57 = vpop.permute.xlu1 %450 }
 0x875   :  { %v453_v58 = vadd.f32 %v451_v57, %v443_v56 }
 0x877   :  { %2878 = vtanh.f32 %v453_v58  ;;  %v508_v25 = vrot.slane %v453_v58, 6 }
 0x87d   :  { %v2879_v59 = vpop.eup %2878 }
 0x87e   :  { %456 = vrot.lane.b32.xlu2 %v2879_v59, %s3275_s27 }
 0x8d8   :  { %v457_v60 = vpop.permute.xlu2 %456 }
 0x8d9   :  { %v459_v61 = vmul.f32 %v457_v60, %v437_v53 }
 0x8db   :  { %v461_v62 = vrot.slane %v459_v61, 6  ;;  %v740_v63 = vsel %vm739_vm7, %v738_v34, %v459_v61  ;;  %v3565_v34 = vld [vmem:[#allocation4 + $0x10] sm:$0xff] }
 0x8dc   :  { %802 = vmatpush.msra.mxu3 %v3565_v34  ;;  %865 = vmatpush.msra.mxu0 %v3565_v34 }
 0x8dd   :  { %462 = vrot.lane.b32.xlu0 %v461_v62, %s3276_s11  ;;  %935 = vmatpush.msrb.mxu1 %v3565_v34 }
 0x8de   :  { %803 = vmatpush.msra.mxu3 %v3569_v35  ;;  %866 = vmatpush.msra.mxu0 %v3569_v35 }
 0x8df   :  { %936 = vmatpush.msrb.mxu1 %v3569_v35 }
 0x8e0   :  { %804 = vmatpush.msra.mxu3 %v3575_v37  ;;  %867 = vmatpush.msra.mxu0 %v3575_v37 }
 0x8e1   :  { %937 = vmatpush.msrb.mxu1 %v3575_v37 }
 0x94f   :  { %v463_v0 = vpop.permute.xlu0 %462 }
 0x950   :  { %2760 = vmatmul.msk.f32.vlgmr.msra.gmra.mxu2 %vm189_vm6, %v463_v0 }
 0x951   :  { %1210 = vmatpush.msra.mxu2 %v3563_v33 }
 0x953   :  { %1211 = vmatpush.msra.mxu2 %v3565_v34 }
 0x955   :  { %1212 = vmatpush.msra.mxu2 %v3569_v35 }
 0x957   :  { %1213 = vmatpush.msra.mxu2 %v3575_v37 }
 0x9d3   :  { %v483_v2 = vpop.f32.mrf.mxu2 }
 0x9d4   :  { %v486_v3 = vadd.f32 %v483_v2, %v3536_v1 }
 0x9d6   :  { %2880 = vtanh.f32 %v486_v3  ;;  %v2761_v5 = vmul.f32 -1.442695, %v486_v3 }
 0x9d8   :  { %2882 = vpow2.f32 %v2761_v5 }
 0x9dc   :  { %v2881_v4 = vpop.eup %2880 }
 0x9dd   :  { %512 = vrot.lane.b32.xlu1 %v2881_v4, %s3275_s27 }
 0x9de   :  { %v2883_v6 = vpop.eup %2882 }
 0x9df   :  { %v490_v7 = vadd.f32 1.0, %v2883_v6 }
 0x9e1   :  { %2884 = vrcp.f32 %v490_v7  ;;  %v502_v9 = vand.u32 2147483648, %v490_v7  ;;  %vm496_vm9 = vweird.f32 %v490_v7  ;;  %v500_v38 = vand.u32 2147483647, %v490_v7 }
 0x9e3   :  { %v503_v17 = vor.u32 1.1754944e-38, %v502_v9  ;;  %vm501_vm11 = vcmp.eq.f32.partialorder %v500_v38, 8.507059e+37 }
 0x9e7   :  { %v2885_v10 = vpop.eup %2884 }
 0x9e8   :  { %v492_v12 = vmul.f32 %v2885_v10, %v490_v7  ;;  %vm497_vm8 = vweird.f32 %v2885_v10 }
 0x9e9   :  { %vm498_vm10 = vmor %vm496_vm9, %vm497_vm8 }
 0x9ea   :  { %v493_v13 = vsub.f32 1.0, %v492_v12 }
 0x9ec   :  { %v494_v14 = vmul.f32 %v2885_v10, %v493_v13 }
 0x9ee   :  { %v495_v15 = vadd.f32 %v2885_v10, %v494_v14 }
 0x9f0   :  { %v499_v16 = vsel %vm498_vm10, %v2885_v10, %v495_v15 }
 0x9f1   :  { %v504_v19 = vsel %vm501_vm11, %v503_v17, %v499_v16 }
 0x9f2   :  { %v510_v26 = vmul.f32 %v508_v25, %v504_v19 }
 0xa4f   :  { %v513_v18 = vpop.permute.xlu1 %512 }
 0xa50   :  { %v515_v20 = vmul.f32 %v513_v18, %v504_v19 }
 0xa52   :  { %517 = vrot.lane.b32.xlu2 %v515_v20, %s3276_s11 }
 0xa5a   :  { %758 = vrot.lane.b32.xlu2 %v740_v63, %s3276_s11 }
 0xaac   :  { %v518_v27 = vpop.permute.xlu2 %517 }
 0xaad   :  { %v3554_v28 = vadd.f32 %v518_v27, %v510_v26 }
 0xaaf   :  { %2886 = vtanh.f32 %v3554_v28  ;;  %v577_v38 = vrot.slane %v3554_v28, 6 }
 0xab4   :  { %v759_v29 = vpop.permute.xlu2 %758 }
 0xab5   :  { %v2887_v30 = vpop.eup %2886  ;;  %2768 = vmatmul.msk.f32.vlgmr.msrb.gmra.mxu2 %vm189_vm6, %v759_v29 }
 0xab6   :  { %523 = vrot.lane.b32.xlu0 %v2887_v30, %s3275_s27 }
 0xb28   :  { %v524_v31 = vpop.permute.xlu0 %523 }
 0xb29   :  { %v3559_v32 = vmul.f32 %v524_v31, %v504_v19 }
 0xb2b   :  { %528 = vrot.lane.b32.xlu1 %v3559_v32, %s3276_s11 }
 0xb38   :  { %v783_v36 = vpop.f32.mrf.mxu2 }
 0xb9d   :  { %v529_v39 = vpop.permute.xlu1 %528 }
 0xb9e   :  { %2762 = vmatmul.msk.f32.vlgmr.msrb.gmra.mxu3 %vm189_vm6, %v529_v39 }
 0xb9f   :  { %1004 = vmatpush.msrb.mxu3 %v3563_v33 }
 0xba1   :  { %1005 = vmatpush.msrb.mxu3 %v3565_v34 }
 0xba3   :  { %1006 = vmatpush.msrb.mxu3 %v3569_v35 }
 0xba5   :  { %1007 = vmatpush.msrb.mxu3 %v3575_v37 }
 0xba6   :  { %805 = vmatmul.f32.vlgmr.msra.gmra.mxu3 %v3274_v8  ;;  %v3604_v8 = vadd.f32 %v3600_v42, %v783_v36 }
 0xba7   :  { %1280 = vmatpush.msra.mxu3 %v3563_v33 }
 0xba9   :  { %1281 = vmatpush.msra.mxu3 %v3565_v34 }
 0xbab   :  { %1282 = vmatpush.msra.mxu3 %v3569_v35 }
 0xbad   :  { %1283 = vmatpush.msra.mxu3 %v3575_v37 }
 0xc21   :  { %v549_v40 = vpop.f32.mrf.mxu3 }
 0xc22   :  { %v553_v41 = vrot.slane %v549_v40, 6 }
 0xc24   :  { %v555_v43 = vadd.f32 %v553_v41, %v3536_v1 }
 0xc26   :  { %2888 = vtanh.f32 %v555_v43  ;;  %v2763_v48 = vmul.f32 -1.442695, %v555_v43 }
 0xc29   :  { %v806_v44 = vpop.f32.mrf.mxu3 }
 0xc2a   :  { %v809_v45 = vadd.f32 %v806_v44, %v3604_v8 }
 0xc2c   :  { %v2889_v46 = vpop.eup %2888  ;;  %2890 = vtanh.f32 %v809_v45  ;;  %v2770_v49 = vmul.f32 -1.442695, %v809_v45 }
 0xc2d   :  { %581 = vrot.lane.b32.xlu0 %v2889_v46, %s3275_s27  ;;  %2892 = vpow2.f32 %v2763_v48 }
 0xc2e   :  { %2894 = vpow2.f32 %v2770_v49 }
 0xc32   :  { %v2891_v47 = vpop.eup %2890 }
 0xc33   :  { %832 = vrot.lane.b32.xlu1 %v2891_v47, %s3275_s27  ;;  %v2893_v50 = vpop.eup %2892 }
 0xc34   :  { %v559_v11 = vadd.f32 1.0, %v2893_v50  ;;  %v2895_v51 = vpop.eup %2894 }
 0xc35   :  { %v813_v52 = vadd.f32 1.0, %v2895_v51 }
 0xc36   :  { %2896 = vrcp.f32 %v559_v11  ;;  %v571_v61 = vand.u32 2147483648, %v559_v11  ;;  %vm565_vm13 = vweird.f32 %v559_v11  ;;  %v569_v62 = vand.u32 2147483647, %v559_v11 }
 0xc37   :  { %2898 = vrcp.f32 %v813_v52  ;;  %v825_v6 = vand.u32 2147483648, %v813_v52  ;;  %vm819_vm4 = vweird.f32 %v813_v52  ;;  %v823_v10 = vand.u32 2147483647, %v813_v52 }
 0xc38   :  { %v572_v2 = vor.u32 1.1754944e-38, %v571_v61  ;;  %vm570_vm2 = vcmp.eq.f32.partialorder %v569_v62, 8.507059e+37 }
 0xc39   :  { %v826_v13 = vor.u32 1.1754944e-38, %v825_v6  ;;  %vm824_vm8 = vcmp.eq.f32.partialorder %v823_v10, 8.507059e+37 }
 0xc3c   :  { %v2897_v53 = vpop.eup %2896 }
 0xc3d   :  { %v561_v54 = vmul.f32 %v2897_v53, %v559_v11  ;;  %v2899_v55 = vpop.eup %2898  ;;  %vm566_vm12 = vweird.f32 %v2897_v53 }
 0xc3e   :  { %v815_v57 = vmul.f32 %v2899_v55, %v813_v52  ;;  %vm567_vm14 = vmor %vm565_vm13, %vm566_vm12  ;;  %vm820_vm3 = vweird.f32 %v2899_v55 }
 0xc3f   :  { %v562_v56 = vsub.f32 1.0, %v561_v54  ;;  %vm821_vm5 = vmor %vm819_vm4, %vm820_vm3 }
 0xc40   :  { %v816_v59 = vsub.f32 1.0, %v815_v57 }
 0xc41   :  { %v563_v58 = vmul.f32 %v2897_v53, %v562_v56 }
 0xc42   :  { %v817_v63 = vmul.f32 %v2899_v55, %v816_v59 }
 0xc43   :  { %v564_v60 = vadd.f32 %v2897_v53, %v563_v58 }
 0xc44   :  { %v818_v3 = vadd.f32 %v2899_v55, %v817_v63 }
 0xc45   :  { %v568_v0 = vsel %vm567_vm14, %v2897_v53, %v564_v60 }
 0xc46   :  { %v573_v5 = vsel %vm570_vm2, %v572_v2, %v568_v0  ;;  %v822_v12 = vsel %vm821_vm5, %v2899_v55, %v818_v3 }
 0xc47   :  { %v827_v15 = vsel %vm824_vm8, %v826_v13, %v822_v12  ;;  %v579_v16 = vmul.f32 %v577_v38, %v573_v5 }
 0xc48   :  { %v830_v20 = vmul.f32 0.0, %v827_v15 }
 0xc9f   :  { %v582_v4 = vpop.permute.xlu0 %581 }
 0xca0   :  { %v584_v7 = vmul.f32 %v582_v4, %v573_v5 }
 0xca2   :  { %586 = vrot.lane.b32.xlu2 %v584_v7, %s3276_s11 }
 0xca5   :  { %v833_v14 = vpop.permute.xlu1 %832 }
 0xca6   :  { %v835_v9 = vmul.f32 %v833_v14, %v827_v15 }
 0xca8   :  { %837 = vrot.lane.b32.xlu0 %v835_v9, %s3276_s11 }
 0xcfc   :  { %v587_v17 = vpop.permute.xlu2 %586 }
 0xcfd   :  { %v3612_v18 = vadd.f32 %v587_v17, %v579_v16 }
 0xcff   :  { %2900 = vtanh.f32 %v3612_v18 }
 0xd05   :  { %v2901_v19 = vpop.eup %2900 }
 0xd06   :  { %592 = vrot.lane.b32.xlu1 %v2901_v19, %s3275_s27 }
 0xd1a   :  { %v838_v21 = vpop.permute.xlu0 %837 }
 0xd1b   :  { %v3616_v22 = vadd.f32 %v838_v21, %v830_v20 }
 0xd1d   :  { %2902 = vtanh.f32 %v3616_v22  ;;  %v897_v17 = vrot.slane %v3616_v22, 6 }
 0xd23   :  { %v2903_v23 = vpop.eup %2902 }
 0xd24   :  { %843 = vrot.lane.b32.xlu2 %v2903_v23, %s3275_s27 }
 0xd78   :  { %v593_v24 = vpop.permute.xlu1 %592 }
 0xd79   :  { %v3620_v25 = vmul.f32 %v593_v24, %v573_v5 }
 0xd7b   :  { %v597_v26 = vrot.slane %v3620_v25, 2 }
 0xd7d   :  { %598 = vrot.lane.b32.xlu0 %v597_v26, %s3276_s11 }
 0xd7e   :  { %v844_v27 = vpop.permute.xlu2 %843 }
 0xd7f   :  { %v846_v28 = vmul.f32 %v844_v27, %v827_v15  ;;  %v647_v15 = vrot.slane %v3612_v18, 6  ;;  %v741_v27 = vsel %vm736_vm15, %v3559_v32, %v3620_v25 }
 0xd81   :  { %848 = vrot.lane.b32.xlu1 %v846_v28, %s3276_s11 }
 0xdef   :  { %v599_v29 = vpop.permute.xlu0 %598 }
 0xdf0   :  { %2764 = vmatmul.msk.f32.vlgmr.msrb.gmra.mxu0 %vm189_vm6, %v599_v29 }
 0xdf1   :  { %1074 = vmatpush.msrb.mxu0 %v3563_v33 }
 0xdf3   :  { %1075 = vmatpush.msrb.mxu0 %v3565_v34  ;;  %v849_v30 = vpop.permute.xlu1 %848 }
 0xdf5   :  { %1076 = vmatpush.msrb.mxu0 %v3569_v35 }
 0xdf7   :  { %1077 = vmatpush.msrb.mxu0 %v3575_v37 }
 0xdf8   :  { %2771 = vmatmul.msk.f32.vlgmr.msra.gmra.mxu0 %vm189_vm6, %v849_v30 }
 0xe6d   :  { %v619_v31 = vpop.f32.mrf.mxu0 }
 0xe6e   :  { %v623_v39 = vrot.slane %v619_v31, 4 }
 0xe70   :  { %v625_v40 = vadd.f32 %v623_v39, %v3536_v1 }
 0xe72   :  { %2904 = vtanh.f32 %v625_v40  ;;  %v2765_v46 = vmul.f32 -1.442695, %v625_v40 }
 0xe75   :  { %v869_v41 = vpop.f32.mrf.mxu0 }
 0xe76   :  { %v873_v43 = vrot.slane %v869_v41, 6 }
 0xe78   :  { %v2905_v36 = vpop.eup %2904  ;;  %v875_v44 = vadd.f32 %v873_v43, %v3604_v8 }
 0xe79   :  { %651 = vrot.lane.b32.xlu2 %v2905_v36, %s3275_s27 }
 0xe7a   :  { %2906 = vtanh.f32 %v875_v44  ;;  %v2772_v51 = vmul.f32 -1.442695, %v875_v44 }
 0xe7b   :  { %2908 = vpow2.f32 %v2765_v46 }
 0xe80   :  { %v2907_v45 = vpop.eup %2906 }
 0xe81   :  { %901 = vrot.lane.b32.xlu0 %v2907_v45, %s3275_s27  ;;  %v2909_v47 = vpop.eup %2908 }
 0xe82   :  { %v629_v48 = vadd.f32 1.0, %v2909_v47 }
 0xe84   :  { %2910 = vrcp.f32 %v629_v48  ;;  %v641_v54 = vand.u32 2147483648, %v629_v48  ;;  %vm635_vm10 = vweird.f32 %v629_v48  ;;  %v639_v55 = vand.u32 2147483647, %v629_v48 }
 0xe85   :  { %2912 = vpow2.f32 %v2772_v51 }
 0xe86   :  { %v642_v58 = vor.u32 1.1754944e-38, %v641_v54  ;;  %vm640_vm12 = vcmp.eq.f32.partialorder %v639_v55, 8.507059e+37 }
 0xe8a   :  { %v2911_v49 = vpop.eup %2910 }
 0xe8b   :  { %v631_v50 = vmul.f32 %v2911_v49, %v629_v48  ;;  %vm636_vm9 = vweird.f32 %v2911_v49  ;;  %v2913_v56 = vpop.eup %2912 }
 0xe8c   :  { %vm637_vm11 = vmor %vm635_vm10, %vm636_vm9  ;;  %v879_v59 = vadd.f32 1.0, %v2913_v56 }
 0xe8d   :  { %v632_v11 = vsub.f32 1.0, %v631_v50 }
 0xe8e   :  { %2914 = vrcp.f32 %v879_v59  ;;  %v891_v5 = vand.u32 2147483648, %v879_v59  ;;  %vm885_vm14 = vweird.f32 %v879_v59  ;;  %v889_v6 = vand.u32 2147483647, %v879_v59 }
 0xe8f   :  { %v633_v52 = vmul.f32 %v2911_v49, %v632_v11 }
 0xe90   :  { %v892_v10 = vor.u32 1.1754944e-38, %v891_v5  ;;  %vm890_vm3 = vcmp.eq.f32.partialorder %v889_v6, 8.507059e+37 }
 0xe91   :  { %v634_v53 = vadd.f32 %v2911_v49, %v633_v52 }
 0xe93   :  { %v638_v57 = vsel %vm637_vm11, %v2911_v49, %v634_v53 }
 0xe94   :  { %v643_v61 = vsel %vm640_vm12, %v642_v58, %v638_v57  ;;  %v2915_v63 = vpop.eup %2914 }
 0xe95   :  { %v881_v0 = vmul.f32 %v2915_v63, %v879_v59  ;;  %vm886_vm13 = vweird.f32 %v2915_v63  ;;  %v649_v9 = vmul.f32 %v647_v15, %v643_v61 }
 0xe96   :  { %vm887_vm2 = vmor %vm885_vm14, %vm886_vm13 }
 0xe97   :  { %v882_v2 = vsub.f32 1.0, %v881_v0 }
 0xe99   :  { %v883_v3 = vmul.f32 %v2915_v63, %v882_v2 }
 0xe9b   :  { %v884_v4 = vadd.f32 %v2915_v63, %v883_v3 }
 0xe9d   :  { %v888_v7 = vsel %vm887_vm2, %v2915_v63, %v884_v4 }
 0xe9e   :  { %v893_v13 = vsel %vm890_vm3, %v892_v10, %v888_v7 }
 0xe9f   :  { %v899_v19 = vmul.f32 %v897_v17, %v893_v13 }
 0xed3   :  { %v652_v60 = vpop.permute.xlu2 %651 }
 0xed4   :  { %v654_v62 = vmul.f32 %v652_v60, %v643_v61 }
 0xed6   :  { %656 = vrot.lane.b32.xlu1 %v654_v62, %s3276_s11 }
 0xef3   :  { %v902_v12 = vpop.permute.xlu0 %901 }
 0xef4   :  { %v904_v14 = vmul.f32 %v902_v12, %v893_v13 }
 0xef6   :  { %906 = vrot.lane.b32.xlu2 %v904_v14, %s3276_s11 }
 0xf48   :  { %v657_v38 = vpop.permute.xlu1 %656 }
 0xf49   :  { %v3638_v16 = vadd.f32 %v657_v38, %v649_v9 }
 0xf4b   :  { %2916 = vtanh.f32 %v3638_v16 }
 0xf50   :  { %v907_v20 = vpop.permute.xlu2 %906 }
 0xf51   :  { %v2917_v21 = vpop.eup %2916  ;;  %v909_v23 = vadd.f32 %v907_v20, %v899_v19 }
 0xf52   :  { %662 = vrot.lane.b32.xlu0 %v2917_v21, %s3275_s27 }
 0xf53   :  { %2918 = vtanh.f32 %v909_v23  ;;  %v967_v57 = vrot.slane %v909_v23, 6 }
 0xf59   :  { %v2919_v24 = vpop.eup %2918 }
 0xf5a   :  { %912 = vrot.lane.b32.xlu1 %v2919_v24, %s3275_s27  ;;  %v717_v24 = vrot.slane %v3638_v16, 6 }
 0xfc4   :  { %v663_v26 = vpop.permute.xlu0 %662 }
 0xfc5   :  { %v665_v18 = vmul.f32 %v663_v26, %v643_v61 }
 0xfc7   :  { %v667_v28 = vrot.slane %v665_v18, 4  ;;  %v3648_v29 = vsel %vm162_vm0, %v741_v27, %v665_v18 }
 0xfc9   :  { %668 = vrot.lane.b32.xlu2 %v667_v28, %s3276_s11 }
 0xfcc   :  { %v913_v22 = vpop.permute.xlu1 %912 }
 0xfcd   :  { %v915_v30 = vmul.f32 %v913_v22, %v893_v13 }
 0xfcf   :  { %v917_v31 = vrot.slane %v915_v30, 2 }
 0xfd1   :  { %918 = vrot.lane.b32.xlu0 %v917_v31, %s3276_s11 }
0x1023   :  { %v669_v39 = vpop.permute.xlu2 %668 }
0x1024   :  { %2766 = vmatmul.msk.f32.vlgmr.msra.gmra.mxu1 %vm189_vm6, %v669_v39 }
0x1025   :  { %1140 = vmatpush.msra.mxu1 %v3563_v33 }
0x1027   :  { %1141 = vmatpush.msra.mxu1 %v3565_v34 }
0x1029   :  { %1142 = vmatpush.msra.mxu1 %v3569_v35 }
0x102b   :  { %1143 = vmatpush.msra.mxu1 %v3575_v37 }
0x1043   :  { %v919_v32 = vpop.permute.xlu0 %918 }
0x1044   :  { %2773 = vmatmul.msk.f32.vlgmr.msrb.gmra.mxu1 %vm189_vm6, %v919_v32 }
0x10a1   :  { %v689_v25 = vpop.f32.mrf.mxu1 }
0x10a2   :  { %v693_v50 = vrot.slane %v689_v25, 2 }
0x10a4   :  { %v695_v52 = vadd.f32 %v693_v50, %v3536_v1 }
0x10a6   :  { %v2767_v1 = vmul.f32 -1.442695, %v695_v52 }
0x10c1   :  { %v939_v40 = vpop.f32.mrf.mxu1 }
0x10c2   :  { %v943_v41 = vrot.slane %v939_v40, 4 }
0x10c4   :  { %v945_v43 = vadd.f32 %v943_v41, %v3604_v8 }
0x10c6   :  { %2920 = vtanh.f32 %v945_v43  ;;  %v2774_v44 = vmul.f32 -1.442695, %v945_v43 }
0x10c8   :  { %2922 = vpow2.f32 %v2774_v44 }
0x10cc   :  { %v2921_v36 = vpop.eup %2920 }
0x10cd   :  { %971 = vrot.lane.b32.xlu1 %v2921_v36, %s3275_s27 }
0x10ce   :  { %v2923_v33 = vpop.eup %2922 }
0x10cf   :  { %v949_v34 = vadd.f32 1.0, %v2923_v33 }
0x10d1   :  { %2924 = vrcp.f32 %v949_v34  ;;  %v961_v48 = vand.u32 2147483648, %v949_v34  ;;  %vm955_vm5 = vweird.f32 %v949_v34  ;;  %v959_v49 = vand.u32 2147483647, %v949_v34 }
0x10d2   :  { %2926 = vtanh.f32 %v695_v52 }
0x10d3   :  { %v962_v51 = vor.u32 1.1754944e-38, %v961_v48  ;;  %vm960_vm9 = vcmp.eq.f32.partialorder %v959_v49, 8.507059e+37 }
0x10d7   :  { %v2925_v35 = vpop.eup %2924 }
0x10d8   :  { %v951_v45 = vmul.f32 %v2925_v35, %v949_v34  ;;  %vm956_vm4 = vweird.f32 %v2925_v35  ;;  %v2927_v56 = vpop.eup %2926 }
0x10d9   :  { %vm957_vm8 = vmor %vm955_vm5, %vm956_vm4 }
0x10da   :  { %v952_v37 = vsub.f32 1.0, %v951_v45 }
0x10dc   :  { %v953_v46 = vmul.f32 %v2925_v35, %v952_v37 }
0x10de   :  { %v954_v47 = vadd.f32 %v2925_v35, %v953_v46 }
0x10e0   :  { %v958_v11 = vsel %vm957_vm8, %v2925_v35, %v954_v47 }
0x10e1   :  { %v963_v54 = vsel %vm960_vm9, %v962_v51, %v958_v11 }
0x10e2   :  { %v969_v58 = vmul.f32 %v967_v57, %v963_v54 }
0x113f   :  { %v972_v53 = vpop.permute.xlu1 %971 }
0x1140   :  { %v974_v55 = vmul.f32 %v972_v53, %v963_v54 }
0x1142   :  { %976 = vrot.lane.b32.xlu2 %v974_v55, %s3276_s11 }
0x114a   :  { %721 = vrot.lane.b32.xlu2 %v2927_v56, %s3275_s27 }
0x119c   :  { %v977_v59 = vpop.permute.xlu2 %976 }
0x119d   :  { %v3663_v60 = vadd.f32 %v977_v59, %v969_v58 }
0x119f   :  { %2928 = vtanh.f32 %v3663_v60  ;;  %v1037_v47 = vrot.slane %v3663_v60, 6 }
0x11a0   :  { %2930 = vpow2.f32 %v2767_v1 }
0x11a4   :  { %v722_v9 = vpop.permute.xlu2 %721 }
0x11a5   :  { %v2929_v61 = vpop.eup %2928 }
0x11a6   :  { %982 = vrot.lane.b32.xlu0 %v2929_v61, %s3275_s27  ;;  %v2931_v62 = vpop.eup %2930 }
0x11a7   :  { %v699_v63 = vadd.f32 1.0, %v2931_v62 }
0x11a9   :  { %2932 = vrcp.f32 %v699_v63  ;;  %v711_v12 = vand.u32 2147483648, %v699_v63  ;;  %vm705_vm11 = vweird.f32 %v699_v63  ;;  %v709_v13 = vand.u32 2147483647, %v699_v63 }
0x11ab   :  { %v712_v15 = vor.u32 1.1754944e-38, %v711_v12  ;;  %vm710_vm13 = vcmp.eq.f32.partialorder %v709_v13, 8.507059e+37 }
0x11af   :  { %v2933_v0 = vpop.eup %2932 }
0x11b0   :  { %v701_v2 = vmul.f32 %v2933_v0, %v699_v63  ;;  %vm706_vm10 = vweird.f32 %v2933_v0 }
0x11b1   :  { %vm707_vm12 = vmor %vm705_vm11, %vm706_vm10 }
0x11b2   :  { %v702_v3 = vsub.f32 1.0, %v701_v2 }
0x11b4   :  { %v703_v4 = vmul.f32 %v2933_v0, %v702_v3 }
0x11b6   :  { %v704_v7 = vadd.f32 %v2933_v0, %v703_v4 }
0x11b8   :  { %v708_v14 = vsel %vm707_vm12, %v2933_v0, %v704_v7 }
0x11b9   :  { %v713_v38 = vsel %vm710_vm13, %v712_v15, %v708_v14 }
0x11ba   :  { %v724_v17 = vmul.f32 %v722_v9, %v713_v38  ;;  %v719_v18 = vmul.f32 %v717_v24, %v713_v38  ;;  %v3704_v24 = vld [vmem:[#allocation7 + $0x8] sm:$0xff] }
0x1218   :  { %v983_v5 = vpop.permute.xlu0 %982 }
0x1219   :  { %v985_v6 = vmul.f32 %v983_v5, %v963_v54 }
0x121b   :  { %v987_v10 = vrot.slane %v985_v6, 4 }
0x121d   :  { %988 = vrot.lane.b32.xlu1 %v987_v10, %s3276_s11 }
0x1225   :  { %726 = vrot.lane.b32.xlu1 %v724_v17, %s3276_s11 }
0x128f   :  { %v989_v19 = vpop.permute.xlu1 %988 }
0x1290   :  { %2775 = vmatmul.msk.f32.vlgmr.msrb.gmra.mxu3 %vm189_vm6, %v989_v19 }
0x1297   :  { %v727_v26 = vpop.permute.xlu1 %726 }
0x1298   :  { %v3672_v27 = vadd.f32 %v727_v26, %v719_v18  ;;  %v3709_v26 = vld [vmem:[#allocation7] sm:$0xff] }
0x1313   :  { %v1009_v20 = vpop.f32.mrf.mxu3 }
0x1314   :  { %v1013_v21 = vrot.slane %v1009_v20, 2 }
0x1316   :  { %v1015_v23 = vadd.f32 %v1013_v21, %v3604_v8  ;;  %v3698_v21 = vld [vmem:[#allocation7 + $0x18] sm:$0xff] }
0x1317   :  { %1393 = vmatpush.msrb.mxu1 %v3698_v21  ;;  %1459 = vmatpush.msrb.mxu2 %v3698_v21 }
0x1318   :  { %2934 = vtanh.f32 %v1015_v23  ;;  %v2776_v30 = vmul.f32 -1.442695, %v1015_v23  ;;  %v3700_v23 = vld [vmem:[#allocation7 + $0x10] sm:$0xff]  ;;  %1529 = vmatpush.msrb.mxu3 %v3698_v21 }
0x1319   :  { %2936 = vtanh.f32 %v3672_v27  ;;  %1394 = vmatpush.msrb.mxu1 %v3700_v23  ;;  %1460 = vmatpush.msrb.mxu2 %v3700_v23 }
0x131a   :  { %2938 = vpow2.f32 %v2776_v30  ;;  %1530 = vmatpush.msrb.mxu3 %v3700_v23 }
0x131b   :  { %1395 = vmatpush.msrb.mxu1 %v3704_v24  ;;  %1461 = vmatpush.msrb.mxu2 %v3704_v24 }
0x131c   :  { %1531 = vmatpush.msrb.mxu3 %v3704_v24 }
0x131d   :  { %1396 = vmatpush.msrb.mxu1 %v3709_v26  ;;  %1462 = vmatpush.msrb.mxu2 %v3709_v26 }
0x131e   :  { %v2935_v28 = vpop.eup %2934  ;;  %1532 = vmatpush.msrb.mxu3 %v3709_v26 }
0x131f   :  { %1041 = vrot.lane.b32.xlu0 %v2935_v28, %s3275_s27  ;;  %v2937_v22 = vpop.eup %2936 }
0x1320   :  { %v2939_v31 = vpop.eup %2938 }
0x1321   :  { %v1019_v39 = vadd.f32 1.0, %v2939_v31 }
0x1323   :  { %2940 = vrcp.f32 %v1019_v39  ;;  %v1031_v41 = vand.u32 2147483648, %v1019_v39  ;;  %vm1025_vm2 = vweird.f32 %v1019_v39  ;;  %v1029_v43 = vand.u32 2147483647, %v1019_v39 }
0x1325   :  { %v1032_v44 = vor.u32 1.1754944e-38, %v1031_v41  ;;  %vm1030_vm4 = vcmp.eq.f32.partialorder %v1029_v43, 8.507059e+37 }
0x1327   :  { %732 = vrot.lane.b32.xlu0 %v2937_v22, %s3275_s27 }
0x1329   :  { %v2941_v8 = vpop.eup %2940 }
0x132a   :  { %v1021_v16 = vmul.f32 %v2941_v8, %v1019_v39  ;;  %vm1026_vm14 = vweird.f32 %v2941_v8  ;;  %v3732_v39 = vld [vmem:[%s4118_s10] ss:$0 sm:$0xff] }
0x132b   :  { %vm1027_vm3 = vmor %vm1025_vm2, %vm1026_vm14 }
0x132c   :  { %v1022_v32 = vsub.f32 1.0, %v1021_v16 }
0x132e   :  { %v1023_v25 = vmul.f32 %v2941_v8, %v1022_v32 }
0x1330   :  { %v1024_v40 = vadd.f32 %v2941_v8, %v1023_v25 }
0x1332   :  { %v1028_v36 = vsel %vm1027_vm3, %v2941_v8, %v1024_v40 }
0x1333   :  { %v1033_v34 = vsel %vm1030_vm4, %v1032_v44, %v1028_v36 }
0x1334   :  { %v1039_v48 = vmul.f32 %v1037_v47, %v1033_v34 }
0x1391   :  { %v1042_v33 = vpop.permute.xlu0 %1041 }
0x1392   :  { %v1044_v35 = vmul.f32 %v1042_v33, %v1033_v34 }
0x1394   :  { %1046 = vrot.lane.b32.xlu2 %v1044_v35, %s3276_s11 }
0x1399   :  { %v733_v45 = vpop.permute.xlu0 %732 }
0x139a   :  { %v735_v37 = vmul.f32 %v733_v45, %v713_v38 }
0x139c   :  { %v743_v46 = vsel %vm739_vm7, %v3648_v29, %v735_v37  ;;  %v1376_v13 = vrot.slane %v735_v37, 6 }
0x139d   :  { %760 = vrot.lane.b32.xlu2 %v743_v46, %s3276_s11 }
0x13ee   :  { %v1047_v49 = vpop.permute.xlu2 %1046 }
0x13ef   :  { %v1049_v50 = vadd.f32 %v1047_v49, %v1039_v48 }
0x13f1   :  { %2942 = vtanh.f32 %v1049_v50  ;;  %v1104_v14 = vrot.slane %v1049_v50, 6 }
0x13f7   :  { %v2943_v11 = vpop.eup %2942  ;;  %v761_v51 = vpop.permute.xlu2 %760 }
0x13f8   :  { %1052 = vrot.lane.b32.xlu1 %v2943_v11, %s3275_s27  ;;  %2769 = vmatmul.msk.f32.gmra.mxu2 %vm189_vm6, %v761_v51 }
0x146a   :  { %v1053_v52 = vpop.permute.xlu1 %1052 }
0x146b   :  { %v1055_v53 = vmul.f32 %v1053_v52, %v1033_v34 }
0x146d   :  { %v1057_v54 = vrot.slane %v1055_v53, 6 }
0x146f   :  { %1058 = vrot.lane.b32.xlu0 %v1057_v54, %s3276_s11 }
0x147b   :  { %v786_v55 = vpop.f32.mrf.mxu2 }
0x147c   :  { %v3687_v56 = vadd.f32 %v3600_v42, %v786_v55 }
0x14e1   :  { %v1059_v29 = vpop.permute.xlu0 %1058 }
0x14e2   :  { %2777 = vmatmul.msk.f32.vlgmr.msrb.gmra.mxu0 %vm189_vm6, %v1059_v29 }
0x155f   :  { %v1079_v57 = vpop.f32.mrf.mxu0 }
0x1560   :  { %v1082_v58 = vadd.f32 %v1079_v57, %v3687_v56 }
0x1562   :  { %2944 = vtanh.f32 %v1082_v58  ;;  %v2778_v60 = vmul.f32 -1.442695, %v1082_v58 }
0x1564   :  { %2946 = vpow2.f32 %v2778_v60 }
0x1568   :  { %v2945_v59 = vpop.eup %2944 }
0x1569   :  { %1108 = vrot.lane.b32.xlu1 %v2945_v59, %s3275_s27 }
0x156a   :  { %v2947_v61 = vpop.eup %2946 }
0x156b   :  { %v1086_v1 = vadd.f32 1.0, %v2947_v61 }
0x156d   :  { %2948 = vrcp.f32 %v1086_v1  ;;  %v1098_v42 = vand.u32 2147483648, %v1086_v1  ;;  %vm1092_vm8 = vweird.f32 %v1086_v1  ;;  %v1096_v4 = vand.u32 2147483647, %v1086_v1 }
0x156f   :  { %v1099_v6 = vor.u32 1.1754944e-38, %v1098_v42  ;;  %vm1097_vm10 = vcmp.eq.f32.partialorder %v1096_v4, 8.507059e+37 }
0x1573   :  { %v2949_v62 = vpop.eup %2948 }
0x1574   :  { %v1088_v63 = vmul.f32 %v2949_v62, %v1086_v1  ;;  %vm1093_vm5 = vweird.f32 %v2949_v62 }
0x1575   :  { %vm1094_vm9 = vmor %vm1092_vm8, %vm1093_vm5 }
0x1576   :  { %v1089_v0 = vsub.f32 1.0, %v1088_v63 }
0x1578   :  { %v1090_v2 = vmul.f32 %v2949_v62, %v1089_v0 }
0x157a   :  { %v1091_v3 = vadd.f32 %v2949_v62, %v1090_v2 }
0x157c   :  { %v1095_v5 = vsel %vm1094_vm9, %v2949_v62, %v1091_v3 }
0x157d   :  { %v1100_v10 = vsel %vm1097_vm10, %v1099_v6, %v1095_v5  ;;  %v1423_v5 = vrot.slane %v3672_v27, 6  ;;  %v3113_v27 = vld [vmem:[%s4151_s7 + $0x8] sm:$0xff] }
0x157e   :  { %v1106_v15 = vmul.f32 %v1104_v14, %v1100_v10  ;;  %v3112_v14 = vld [vmem:[%s4151_s7] sm:$0xff]  ;;  %s4156_s7 = sld [smem:[#allocation21_spill]] }
0x15db   :  { %v1109_v7 = vpop.permute.xlu1 %1108 }
0x15dc   :  { %v1111_v12 = vmul.f32 %v1109_v7, %v1100_v10 }
0x15de   :  { %1113 = vrot.lane.b32.xlu2 %v1111_v12, %s3276_s11 }
0x15e6   :  { %1377 = vrot.lane.b32.xlu2 %v1376_v13, %s3276_s11  ;;  %v1343_v13 = vld [vmem:[%s4155_s12] sm:$0xf] }
0x15e7   :  { %2785 = vmatpush.msk.msra.mxu0 %vm162_vm0, %v1343_v13 }
0x15e8   :  { %2786 = vmatmul.msk.f32.vlgmr.msra.gmra.mxu0 %vm155_vm1, %v3112_v14 }
0x15e9   :  { %1805 = vmatpush.msrb.mxu0 %v3698_v21 }
0x15eb   :  { %1806 = vmatpush.msrb.mxu0 %v3700_v23 }
0x15ed   :  { %1807 = vmatpush.msrb.mxu0 %v3704_v24 }
0x15ef   :  { %1808 = vmatpush.msrb.mxu0 %v3709_v26 }
0x15f0   :  { %2787 = vmatmul.msk.f32.gmra.mxu0 %vm155_vm1, %v3113_v27 }
0x1638   :  { %v1114_v9 = vpop.permute.xlu2 %1113 }
0x1639   :  { %v3693_v38 = vadd.f32 %v1114_v9, %v1106_v15 }
0x163b   :  { %2950 = vtanh.f32 %v3693_v38  ;;  %v1173_v0 = vrot.slane %v3693_v38, 6 }
0x1640   :  { %v1378_v28 = vpop.permute.xlu2 %1377 }
0x1641   :  { %v2951_v17 = vpop.eup %2950 }
0x1642   :  { %1119 = vrot.lane.b32.xlu0 %v2951_v17, %s3275_s27 }
0x16b4   :  { %v1120_v19 = vpop.permute.xlu0 %1119 }
0x16b5   :  { %v1122_v20 = vmul.f32 %v1120_v19, %v1100_v10 }
0x16b7   :  { %1124 = vrot.lane.b32.xlu1 %v1122_v20, %s3276_s11 }
0x1729   :  { %v1125_v18 = vpop.permute.xlu1 %1124 }
0x172a   :  { %2779 = vmatmul.msk.f32.vlgmr.msra.gmra.mxu1 %vm189_vm6, %v1125_v18 }
0x172b   :  { %1599 = vmatpush.msra.mxu1 %v3698_v21 }
0x172d   :  { %1600 = vmatpush.msra.mxu1 %v3700_v23 }
0x172f   :  { %1601 = vmatpush.msra.mxu1 %v3704_v24 }
0x1731   :  { %1602 = vmatpush.msra.mxu1 %v3709_v26 }
0x1732   :  { %2788 = vmatmul.msk.f32.vlgmr.msrb.gmra.mxu1 %vm189_vm6, %v1378_v28  ;;  %v3776_v28 = vpop.f32.mrf.mxu0 }
0x1733   :  { %1875 = vmatpush.msrb.mxu1 %v3698_v21 }
0x1735   :  { %1876 = vmatpush.msrb.mxu1 %v3700_v23 }
0x1737   :  { %1877 = vmatpush.msrb.mxu1 %v3704_v24 }
0x1739   :  { %1878 = vmatpush.msrb.mxu1 %v3709_v26 }
0x17a7   :  { %v1145_v22 = vpop.f32.mrf.mxu1 }
0x17a8   :  { %v1149_v30 = vrot.slane %v1145_v22, 6 }
0x17aa   :  { %v1151_v31 = vadd.f32 %v1149_v30, %v3687_v56 }
0x17ac   :  { %2952 = vtanh.f32 %v1151_v31  ;;  %v2780_v40 = vmul.f32 -1.442695, %v1151_v31 }
0x17af   :  { %v1398_v8 = vpop.f32.mrf.mxu1 }
0x17b0   :  { %v1401_v16 = vadd.f32 %v3732_v39, %v1398_v8  ;;  %v1367_v8 = vpop.f32.mrf.mxu0 }
0x17b2   :  { %v2953_v32 = vpop.eup %2952  ;;  %2954 = vtanh.f32 %v1401_v16  ;;  %v2789_v41 = vmul.f32 -1.442695, %v1401_v16  ;;  %v3780_v16 = vadd.f32 %v3732_v39, %v1367_v8 }
0x17b3   :  { %1177 = vrot.lane.b32.xlu0 %v2953_v32, %s3275_s27  ;;  %2956 = vpow2.f32 %v2780_v40 }
0x17b4   :  { %2958 = vpow2.f32 %v2789_v41 }
0x17b8   :  { %v2955_v25 = vpop.eup %2954 }
0x17b9   :  { %1427 = vrot.lane.b32.xlu1 %v2955_v25, %s3275_s27  ;;  %v2957_v43 = vpop.eup %2956 }
0x17ba   :  { %v1155_v36 = vadd.f32 1.0, %v2957_v43  ;;  %v2959_v44 = vpop.eup %2958 }
0x17bb   :  { %v1405_v33 = vadd.f32 1.0, %v2959_v44 }
0x17bc   :  { %2960 = vrcp.f32 %v1155_v36  ;;  %v1167_v50 = vand.u32 2147483648, %v1155_v36  ;;  %vm1161_vm12 = vweird.f32 %v1155_v36  ;;  %v1165_v11 = vand.u32 2147483647, %v1155_v36 }
0x17bd   :  { %2962 = vrcp.f32 %v1405_v33  ;;  %v1417_v57 = vand.u32 2147483648, %v1405_v33  ;;  %vm1411_vm3 = vweird.f32 %v1405_v33  ;;  %v1415_v59 = vand.u32 2147483647, %v1405_v33 }
0x17be   :  { %v1168_v53 = vor.u32 1.1754944e-38, %v1167_v50  ;;  %vm1166_vm14 = vcmp.eq.f32.partialorder %v1165_v11, 8.507059e+37 }
0x17bf   :  { %v1418_v61 = vor.u32 1.1754944e-38, %v1417_v57  ;;  %vm1416_vm5 = vcmp.eq.f32.partialorder %v1415_v59, 8.507059e+37 }
0x17c2   :  { %v2961_v34 = vpop.eup %2960 }
0x17c3   :  { %v1157_v35 = vmul.f32 %v2961_v34, %v1155_v36  ;;  %v2963_v45 = vpop.eup %2962  ;;  %vm1162_vm11 = vweird.f32 %v2961_v34 }
0x17c4   :  { %v1407_v46 = vmul.f32 %v2963_v45, %v1405_v33  ;;  %vm1163_vm13 = vmor %vm1161_vm12, %vm1162_vm11  ;;  %vm1412_vm2 = vweird.f32 %v2963_v45 }
0x17c5   :  { %v1158_v37 = vsub.f32 1.0, %v1157_v35  ;;  %vm1413_vm4 = vmor %vm1411_vm3, %vm1412_vm2 }
0x17c6   :  { %v1408_v48 = vsub.f32 1.0, %v1407_v46 }
0x17c7   :  { %v1159_v47 = vmul.f32 %v2961_v34, %v1158_v37 }
0x17c8   :  { %v1409_v51 = vmul.f32 %v2963_v45, %v1408_v48 }
0x17c9   :  { %v1160_v49 = vadd.f32 %v2961_v34, %v1159_v47 }
0x17ca   :  { %v1410_v54 = vadd.f32 %v2963_v45, %v1409_v51 }
0x17cb   :  { %v1164_v52 = vsel %vm1163_vm13, %v2961_v34, %v1160_v49 }
0x17cc   :  { %v1169_v55 = vsel %vm1166_vm14, %v1168_v53, %v1164_v52  ;;  %v1414_v60 = vsel %vm1413_vm4, %v2963_v45, %v1410_v54 }
0x17cd   :  { %v1419_v62 = vsel %vm1416_vm5, %v1418_v61, %v1414_v60  ;;  %v1175_v2 = vmul.f32 %v1173_v0, %v1169_v55 }
0x17ce   :  { %v1425_v6 = vmul.f32 %v1423_v5, %v1419_v62 }
0x1825   :  { %v1178_v29 = vpop.permute.xlu0 %1177 }
0x1826   :  { %v1180_v58 = vmul.f32 %v1178_v29, %v1169_v55 }
0x1828   :  { %1182 = vrot.lane.b32.xlu2 %v1180_v58, %s3276_s11 }
0x182b   :  { %v1428_v1 = vpop.permute.xlu1 %1427 }
0x182c   :  { %v1430_v63 = vmul.f32 %v1428_v1, %v1419_v62 }
0x182e   :  { %1432 = vrot.lane.b32.xlu0 %v1430_v63, %s3276_s11 }
0x1882   :  { %v1183_v3 = vpop.permute.xlu2 %1182 }
0x1883   :  { %v3740_v42 = vadd.f32 %v1183_v3, %v1175_v2 }
0x1885   :  { %2964 = vtanh.f32 %v3740_v42 }
0x188b   :  { %v2965_v4 = vpop.eup %2964 }
0x188c   :  { %1188 = vrot.lane.b32.xlu1 %v2965_v4, %s3275_s27  ;;  %v1243_v4 = vrot.slane %v3740_v42, 6 }
0x18a0   :  { %v1433_v7 = vpop.permute.xlu0 %1432 }
0x18a1   :  { %v3745_v10 = vadd.f32 %v1433_v7, %v1425_v6 }
0x18a3   :  { %2966 = vtanh.f32 %v3745_v10 }
0x18a9   :  { %v2967_v12 = vpop.eup %2966 }
0x18aa   :  { %1438 = vrot.lane.b32.xlu2 %v2967_v12, %s3275_s27  ;;  %v1492_v12 = vrot.slane %v3745_v10, 2 }
0x18fe   :  { %v1189_v15 = vpop.permute.xlu1 %1188 }
0x18ff   :  { %v1191_v9 = vmul.f32 %v1189_v15, %v1169_v55 }
0x1901   :  { %v1193_v38 = vrot.slane %v1191_v9, 2 }
0x1903   :  { %1194 = vrot.lane.b32.xlu0 %v1193_v38, %s3276_s11 }
0x1904   :  { %v1439_v17 = vpop.permute.xlu2 %1438 }
0x1905   :  { %v3766_v19 = vmul.f32 %v1439_v17, %v1419_v62 }
0x1907   :  { %1443 = vrot.lane.b32.xlu1 %v3766_v19, %s3276_s11 }
0x1975   :  { %v1195_v20 = vpop.permute.xlu0 %1194 }
0x1976   :  { %2781 = vmatmul.msk.f32.vlgmr.msra.gmra.mxu2 %vm189_vm6, %v1195_v20 }
0x1977   :  { %1669 = vmatpush.msra.mxu2 %v3698_v21 }
0x1979   :  { %1670 = vmatpush.msra.mxu2 %v3700_v23  ;;  %v1444_v18 = vpop.permute.xlu1 %1443 }
0x197b   :  { %1671 = vmatpush.msra.mxu2 %v3704_v24 }
0x197d   :  { %1672 = vmatpush.msra.mxu2 %v3709_v26 }
0x197e   :  { %2790 = vmatmul.msk.f32.vlgmr.msrb.gmra.mxu2 %vm189_vm6, %v1444_v18 }
0x19f9   :  { %v1215_v22 = vpop.f32.mrf.mxu2 }
0x19fa   :  { %v1219_v30 = vrot.slane %v1215_v22, 4 }
0x19fc   :  { %v1221_v31 = vadd.f32 %v1219_v30, %v3687_v56 }
0x19fe   :  { %2968 = vtanh.f32 %v1221_v31  ;;  %v2782_v36 = vmul.f32 -1.442695, %v1221_v31 }
0x1a01   :  { %v1464_v32 = vpop.f32.mrf.mxu2 }
0x1a02   :  { %v1468_v25 = vrot.slane %v1464_v32, 2 }
0x1a04   :  { %v2969_v40 = vpop.eup %2968  ;;  %v1470_v41 = vadd.f32 %v1468_v25, %v3780_v16 }
0x1a05   :  { %1247 = vrot.lane.b32.xlu2 %v2969_v40, %s3275_s27 }
0x1a06   :  { %2970 = vtanh.f32 %v1470_v41  ;;  %v2791_v37 = vmul.f32 -1.442695, %v1470_v41 }
0x1a07   :  { %2972 = vpow2.f32 %v2782_v36 }
0x1a0c   :  { %v2971_v43 = vpop.eup %2970 }
0x1a0d   :  { %1496 = vrot.lane.b32.xlu0 %v2971_v43, %s3275_s27  ;;  %v2973_v44 = vpop.eup %2972 }
0x1a0e   :  { %v1225_v33 = vadd.f32 1.0, %v2973_v44 }
0x1a10   :  { %2974 = vrcp.f32 %v1225_v33  ;;  %v1237_v48 = vand.u32 2147483648, %v1225_v33  ;;  %vm1231_vm9 = vweird.f32 %v1225_v33  ;;  %v1235_v49 = vand.u32 2147483647, %v1225_v33 }
0x1a11   :  { %2976 = vpow2.f32 %v2791_v37 }
0x1a12   :  { %v1238_v51 = vor.u32 1.1754944e-38, %v1237_v48  ;;  %vm1236_vm11 = vcmp.eq.f32.partialorder %v1235_v49, 8.507059e+37 }
0x1a16   :  { %v2975_v34 = vpop.eup %2974 }
0x1a17   :  { %v1227_v35 = vmul.f32 %v2975_v34, %v1225_v33  ;;  %vm1232_vm8 = vweird.f32 %v2975_v34  ;;  %v2977_v50 = vpop.eup %2976 }
0x1a18   :  { %vm1233_vm10 = vmor %vm1231_vm9, %vm1232_vm8  ;;  %v1474_v52 = vadd.f32 1.0, %v2977_v50 }
0x1a19   :  { %v1228_v45 = vsub.f32 1.0, %v1227_v35 }
0x1a1a   :  { %2978 = vrcp.f32 %v1474_v52  ;;  %v1486_v61 = vand.u32 2147483648, %v1474_v52  ;;  %vm1480_vm13 = vweird.f32 %v1474_v52  ;;  %v1484_v1 = vand.u32 2147483647, %v1474_v52 }
0x1a1b   :  { %v1229_v46 = vmul.f32 %v2975_v34, %v1228_v45 }
0x1a1c   :  { %v1487_v63 = vor.u32 1.1754944e-38, %v1486_v61  ;;  %vm1485_vm2 = vcmp.eq.f32.partialorder %v1484_v1, 8.507059e+37 }
0x1a1d   :  { %v1230_v47 = vadd.f32 %v2975_v34, %v1229_v46 }
0x1a1f   :  { %v1234_v11 = vsel %vm1233_vm10, %v2975_v34, %v1230_v47 }
0x1a20   :  { %v1239_v54 = vsel %vm1236_vm11, %v1238_v51, %v1234_v11  ;;  %v2979_v55 = vpop.eup %2978 }
0x1a21   :  { %v1476_v57 = vmul.f32 %v2979_v55, %v1474_v52  ;;  %vm1481_vm12 = vweird.f32 %v2979_v55  ;;  %v1245_v5 = vmul.f32 %v1243_v4, %v1239_v54 }
0x1a22   :  { %vm1482_vm14 = vmor %vm1480_vm13, %vm1481_vm12 }
0x1a23   :  { %v1477_v58 = vsub.f32 1.0, %v1476_v57 }
0x1a25   :  { %v1478_v59 = vmul.f32 %v2979_v55, %v1477_v58 }
0x1a27   :  { %v1479_v60 = vadd.f32 %v2979_v55, %v1478_v59 }
0x1a29   :  { %v1483_v62 = vsel %vm1482_vm14, %v2979_v55, %v1479_v60 }
0x1a2a   :  { %v1488_v2 = vsel %vm1485_vm2, %v1487_v63, %v1483_v62 }
0x1a2b   :  { %v1494_v13 = vmul.f32 %v1492_v12, %v1488_v2 }
0x1a5f   :  { %v1248_v53 = vpop.permute.xlu2 %1247 }
0x1a60   :  { %v1250_v29 = vmul.f32 %v1248_v53, %v1239_v54 }
0x1a62   :  { %1252 = vrot.lane.b32.xlu1 %v1250_v29, %s3276_s11 }
0x1a7f   :  { %v1497_v0 = vpop.permute.xlu0 %1496 }
0x1a80   :  { %v1499_v3 = vmul.f32 %v1497_v0, %v1488_v2 }
0x1a82   :  { %1501 = vrot.lane.b32.xlu2 %v1499_v3, %s3276_s11 }
0x1ad4   :  { %v1253_v6 = vpop.permute.xlu1 %1252 }
0x1ad5   :  { %v3788_v7 = vadd.f32 %v1253_v6, %v1245_v5 }
0x1ad7   :  { %2980 = vtanh.f32 %v3788_v7 }
0x1adc   :  { %v1502_v14 = vpop.permute.xlu2 %1501 }
0x1add   :  { %v2981_v27 = vpop.eup %2980  ;;  %v1504_v15 = vadd.f32 %v1502_v14, %v1494_v13 }
0x1ade   :  { %1258 = vrot.lane.b32.xlu0 %v2981_v27, %s3275_s27 }
0x1adf   :  { %2982 = vtanh.f32 %v1504_v15  ;;  %v1562_v48 = vrot.slane %v1504_v15, 2 }
0x1ae5   :  { %v2983_v9 = vpop.eup %2982 }
0x1ae6   :  { %1507 = vrot.lane.b32.xlu1 %v2983_v9, %s3275_s27 }
0x1b50   :  { %v1259_v38 = vpop.permute.xlu0 %1258 }
0x1b51   :  { %v1261_v42 = vmul.f32 %v1259_v38, %v1239_v54 }
0x1b53   :  { %v1263_v17 = vrot.slane %v1261_v42, 4 }
0x1b55   :  { %1264 = vrot.lane.b32.xlu2 %v1263_v17, %s3276_s11 }
0x1b58   :  { %v1508_v20 = vpop.permute.xlu1 %1507 }
0x1b59   :  { %v1510_v18 = vmul.f32 %v1508_v20, %v1488_v2 }
0x1b5b   :  { %v1512_v22 = vrot.slane %v1510_v18, 6  ;;  %v1927_v52 = vrot.slane %v1510_v18, 4 }
0x1b5d   :  { %1513 = vrot.lane.b32.xlu0 %v1512_v22, %s3276_s11  ;;  %v1936_v29 = vsel %vm736_vm15, %v3766_v19, %v1927_v52 }
0x1baf   :  { %v1265_v10 = vpop.permute.xlu2 %1264 }
0x1bb0   :  { %2783 = vmatmul.msk.f32.vlgmr.msra.gmra.mxu3 %vm189_vm6, %v1265_v10 }
0x1bb1   :  { %1735 = vmatpush.msra.mxu3 %v3698_v21 }
0x1bb3   :  { %1736 = vmatpush.msra.mxu3 %v3700_v23 }
0x1bb5   :  { %1737 = vmatpush.msra.mxu3 %v3704_v24 }
0x1bb7   :  { %1738 = vmatpush.msra.mxu3 %v3709_v26 }
0x1bcf   :  { %v1514_v30 = vpop.permute.xlu0 %1513 }
0x1bd0   :  { %2792 = vmatmul.msk.f32.vlgmr.msrb.gmra.mxu3 %vm189_vm6, %v1514_v30 }
0x1c33   :  { %v3802_v31 = vpop.f32.mrf.mxu3 }
0x1c34   :  { %v1289_v18 = vrot.slane %v3802_v31, 2 }
0x1c36   :  { %v1291_v22 = vadd.f32 %v1289_v18, %v3687_v56 }
0x1c38   :  { %v2784_v56 = vmul.f32 -1.442695, %v1291_v22 }
0x1c53   :  { %v1534_v8 = vpop.f32.mrf.mxu3 }
0x1c54   :  { %v1538_v32 = vrot.slane %v1534_v8, 4 }
0x1c56   :  { %v1540_v25 = vadd.f32 %v1538_v32, %v3780_v16 }
0x1c58   :  { %2984 = vtanh.f32 %v1540_v25  ;;  %v2793_v21 = vmul.f32 -1.442695, %v1540_v25 }
0x1c5a   :  { %2986 = vpow2.f32 %v2793_v21 }
0x1c5e   :  { %v2985_v40 = vpop.eup %2984 }
0x1c5f   :  { %1566 = vrot.lane.b32.xlu1 %v2985_v40, %s3275_s27 }
0x1c60   :  { %v2987_v23 = vpop.eup %2986 }
0x1c61   :  { %v1544_v41 = vadd.f32 1.0, %v2987_v23 }
0x1c63   :  { %2988 = vrcp.f32 %v1544_v41  ;;  %v1556_v33 = vand.u32 2147483648, %v1544_v41  ;;  %vm1550_vm4 = vweird.f32 %v1544_v41  ;;  %v1554_v34 = vand.u32 2147483647, %v1544_v41 }
0x1c65   :  { %v1557_v45 = vor.u32 1.1754944e-38, %v1556_v33  ;;  %vm1555_vm8 = vcmp.eq.f32.partialorder %v1554_v34, 8.507059e+37 }
0x1c69   :  { %v2989_v24 = vpop.eup %2988 }
0x1c6a   :  { %v1546_v26 = vmul.f32 %v2989_v24, %v1544_v41  ;;  %vm1551_vm3 = vweird.f32 %v2989_v24 }
0x1c6b   :  { %vm1552_vm5 = vmor %vm1550_vm4, %vm1551_vm3 }
0x1c6c   :  { %v1547_v43 = vsub.f32 1.0, %v1546_v26 }
0x1c6e   :  { %v1548_v36 = vmul.f32 %v2989_v24, %v1547_v43 }
0x1c70   :  { %v1549_v44 = vadd.f32 %v2989_v24, %v1548_v36 }
0x1c72   :  { %v1553_v35 = vsel %vm1552_vm5, %v2989_v24, %v1549_v44 }
0x1c73   :  { %v1558_v46 = vsel %vm1555_vm8, %v1557_v45, %v1553_v35 }
0x1c74   :  { %v1564_v49 = vmul.f32 %v1562_v48, %v1558_v46 }
0x1cd1   :  { %v1567_v37 = vpop.permute.xlu1 %1566 }
0x1cd2   :  { %v1569_v47 = vmul.f32 %v1567_v37, %v1558_v46 }
0x1cd4   :  { %1571 = vrot.lane.b32.xlu2 %v1569_v47, %s3276_s11 }
0x1d2e   :  { %v1572_v50 = vpop.permute.xlu2 %1571 }
0x1d2f   :  { %v1574_v11 = vadd.f32 %v1572_v50, %v1564_v49 }
0x1d31   :  { %2990 = vtanh.f32 %v1574_v11  ;;  %v1632_v38 = vrot.slane %v1574_v11, 2 }
0x1d37   :  { %v2991_v51 = vpop.eup %2990 }
0x1d38   :  { %1577 = vrot.lane.b32.xlu0 %v2991_v51, %s3275_s27 }
0x1daa   :  { %v1578_v53 = vpop.permute.xlu0 %1577 }
0x1dab   :  { %v1580_v54 = vmul.f32 %v1578_v53, %v1558_v46 }
0x1dad   :  { %v1582_v55 = vrot.slane %v1580_v54, 4  ;;  %v1937_v57 = vsel %vm162_vm0, %v1936_v29, %v1580_v54 }
0x1daf   :  { %1583 = vrot.lane.b32.xlu1 %v1582_v55, %s3276_s11 }
0x1e21   :  { %v1584_v58 = vpop.permute.xlu1 %1583 }
0x1e22   :  { %2794 = vmatmul.msk.f32.vlgmr.msra.gmra.mxu1 %vm189_vm6, %v1584_v58 }
0x1e9f   :  { %v1604_v59 = vpop.f32.mrf.mxu1 }
0x1ea0   :  { %v1608_v60 = vrot.slane %v1604_v59, 6 }
0x1ea2   :  { %v1610_v61 = vadd.f32 %v1608_v60, %v3780_v16 }
0x1ea4   :  { %2992 = vtanh.f32 %v1610_v61  ;;  %v2795_v62 = vmul.f32 -1.442695, %v1610_v61 }
0x1ea6   :  { %2994 = vpow2.f32 %v2795_v62 }
0x1eaa   :  { %v2993_v1 = vpop.eup %2992 }
0x1eab   :  { %1636 = vrot.lane.b32.xlu2 %v2993_v1, %s3275_s27 }
0x1eac   :  { %v2995_v63 = vpop.eup %2994 }
0x1ead   :  { %v1614_v19 = vadd.f32 1.0, %v2995_v63  ;;  %v1313_v63 = vrot.slane %v3788_v7, 6 }
0x1eaf   :  { %2996 = vrcp.f32 %v1614_v19  ;;  %v1626_v6 = vand.u32 2147483648, %v1614_v19  ;;  %vm1620_vm10 = vweird.f32 %v1614_v19  ;;  %v1624_v12 = vand.u32 2147483647, %v1614_v19 }
0x1eb1   :  { %v1627_v14 = vor.u32 1.1754944e-38, %v1626_v6  ;;  %vm1625_vm12 = vcmp.eq.f32.partialorder %v1624_v12, 8.507059e+37 }
0x1eb5   :  { %v2997_v0 = vpop.eup %2996 }
0x1eb6   :  { %v1616_v2 = vmul.f32 %v2997_v0, %v1614_v19  ;;  %vm1621_vm9 = vweird.f32 %v2997_v0 }
0x1eb7   :  { %vm1622_vm11 = vmor %vm1620_vm10, %vm1621_vm9 }
0x1eb8   :  { %v1617_v3 = vsub.f32 1.0, %v1616_v2 }
0x1eba   :  { %v1618_v4 = vmul.f32 %v2997_v0, %v1617_v3 }
0x1ebc   :  { %v1619_v5 = vadd.f32 %v2997_v0, %v1618_v4 }
0x1ebe   :  { %v1623_v13 = vsel %vm1622_vm11, %v2997_v0, %v1619_v5 }
0x1ebf   :  { %v1628_v15 = vsel %vm1625_vm12, %v1627_v14, %v1623_v13 }
0x1ec0   :  { %v1634_v42 = vmul.f32 %v1632_v38, %v1628_v15  ;;  %v1948_v38 = vld [vmem:[#allocation9 + $0x8] sm:$0xff] }
0x1f05   :  { %v1637_v27 = vpop.permute.xlu2 %1636 }
0x1f06   :  { %v1639_v9 = vmul.f32 %v1637_v27, %v1628_v15 }
0x1f08   :  { %1641 = vrot.lane.b32.xlu0 %v1639_v9, %s3276_s11  ;;  %v1949_v9 = vld [vmem:[#allocation9 + $0x10] sm:$0xff] }
0x1f7a   :  { %v1642_v17 = vpop.permute.xlu0 %1641 }
0x1f7b   :  { %v3816_v20 = vadd.f32 %v1642_v17, %v1634_v42  ;;  %v1947_v42 = vld [vmem:[#allocation9] sm:$0xff] }
0x1f7d   :  { %2998 = vtanh.f32 %v3816_v20  ;;  %v1699_v4 = vrot.slane %v3816_v20, 2 }
0x1f7e   :  { %3000 = vtanh.f32 %v1291_v22  ;;  %v3853_v22 = vld [vmem:[#allocation10 + $0x18] sm:$0xff] }
0x1f7f   :  { %3002 = vpow2.f32 %v2784_v56  ;;  %2004 = vmatpush.msrb.mxu3 %v3853_v22  ;;  %2070 = vmatpush.msra.mxu0 %v3853_v22  ;;  %v3897_v56 = vld [vmem:[%s4121_s13] ss:$0 sm:$0xff]  ;;  %s3277_s13 = smov [#allocation12]  }
0x1f80   :  { %2140 = vmatpush.msra.mxu1 %v3853_v22  ;;  %s2712_s29 = sshll.u32 %s3277_s13, 4  ;;  %s2713_s29 = int_to_ptr.vmem [resolvable:$true] %s2712_s29 }
0x1f83   :  { %v2999_v10 = vpop.eup %2998 }
0x1f84   :  { %1647 = vrot.lane.b32.xlu1 %v2999_v10, %s3275_s27  ;;  %v3001_v30 = vpop.eup %3000  ;;  %v3855_v10 = vld [vmem:[#allocation10 + $0x10] sm:$0xff] }
0x1f85   :  { %v3003_v23 = vpop.eup %3002  ;;  %2005 = vmatpush.msrb.mxu3 %v3855_v10  ;;  %2071 = vmatpush.msra.mxu0 %v3855_v10 }
0x1f86   :  { %v1295_v41 = vadd.f32 1.0, %v3003_v23  ;;  %2141 = vmatpush.msra.mxu1 %v3855_v10 }
0x1f88   :  { %3004 = vrcp.f32 %v1295_v41  ;;  %v1307_v45 = vand.u32 2147483648, %v1295_v41  ;;  %vm1301_vm14 = vweird.f32 %v1295_v41  ;;  %v1305_v37 = vand.u32 2147483647, %v1295_v41 }
0x1f8a   :  { %v1308_v47 = vor.u32 1.1754944e-38, %v1307_v45  ;;  %vm1306_vm3 = vcmp.eq.f32.partialorder %v1305_v37, 8.507059e+37 }
0x1f8c   :  { %1317 = vrot.lane.b32.xlu1 %v3001_v30, %s3275_s27  ;;  %v3859_v30 = vld [vmem:[#allocation10 + $0x8] sm:$0xff] }
0x1f8d   :  { %2006 = vmatpush.msrb.mxu3 %v3859_v30  ;;  %2072 = vmatpush.msra.mxu0 %v3859_v30 }
0x1f8e   :  { %v3005_v24 = vpop.eup %3004  ;;  %2142 = vmatpush.msra.mxu1 %v3859_v30 }
0x1f8f   :  { %v1297_v26 = vmul.f32 %v3005_v24, %v1295_v41  ;;  %vm1302_vm13 = vweird.f32 %v3005_v24 }
0x1f90   :  { %vm1303_vm2 = vmor %vm1301_vm14, %vm1302_vm13 }
0x1f91   :  { %v1298_v43 = vsub.f32 1.0, %v1297_v26 }
0x1f93   :  { %v1299_v33 = vmul.f32 %v3005_v24, %v1298_v43 }
0x1f95   :  { %v1300_v34 = vadd.f32 %v3005_v24, %v1299_v33 }
0x1f97   :  { %v1304_v46 = vsel %vm1303_vm2, %v3005_v24, %v1300_v34 }
0x1f98   :  { %v1309_v49 = vsel %vm1306_vm3, %v1308_v47, %v1304_v46 }
0x1f99   :  { %v1315_v19 = vmul.f32 %v1313_v63, %v1309_v49 }
0x1ff6   :  { %v1648_v8 = vpop.permute.xlu1 %1647 }
0x1ff7   :  { %v1650_v32 = vmul.f32 %v1648_v8, %v1628_v15  ;;  %v1950_v15 = vld [vmem:[#allocation9 + $0x18] sm:$0xff]  ;;  %v3865_v8 = vld [vmem:[#allocation10] sm:$0xff] }
0x1ff8   :  { %1976 = vmatpush.msrb.mxu2 %v1950_v15  ;;  %2007 = vmatpush.msrb.mxu3 %v3865_v8 }
0x1ff9   :  { %v1652_v25 = vrot.slane %v1650_v32, 2  ;;  %v1929_v40 = vrot.slane %v1650_v32, 4  ;;  %2073 = vmatpush.msra.mxu0 %v3865_v8  ;;  %2143 = vmatpush.msra.mxu1 %v3865_v8 }
0x1ffa   :  { %1977 = vmatpush.msrb.mxu2 %v1949_v9 }
0x1ffb   :  { %1653 = vrot.lane.b32.xlu2 %v1652_v25, %s3276_s11  ;;  %v3825_v21 = vsel %vm739_vm7, %v1937_v57, %v1929_v40 }
0x1ffc   :  { %1978 = vmatpush.msrb.mxu2 %v1948_v38 }
0x1ffe   :  { %v1318_v48 = vpop.permute.xlu1 %1317  ;;  %1979 = vmatpush.msrb.mxu2 %v1947_v42 }
0x1fff   :  { %v1320_v50 = vmul.f32 %v1318_v48, %v1309_v49 }
0x2055   :  { %v1654_v31 = vpop.permute.xlu2 %1653 }
0x2056   :  { %2796 = vmatmul.msk.f32.vlgmr.msra.gmra.mxu2 %vm189_vm6, %v1654_v31 }
0x2057   :  { %2416 = vmatpush.msra.mxu2 %v3853_v22 }
0x2059   :  { %2417 = vmatpush.msra.mxu2 %v3855_v10 }
0x205b   :  { %2418 = vmatpush.msra.mxu2 %v3859_v30 }
0x205d   :  { %2419 = vmatpush.msra.mxu2 %v3865_v8 }
0x20d9   :  { %v1674_v36 = vpop.f32.mrf.mxu2 }
0x20da   :  { %v1677_v44 = vadd.f32 %v1674_v36, %v3780_v16 }
0x20dc   :  { %3006 = vtanh.f32 %v1677_v44  ;;  %v2797_v16 = vmul.f32 -1.442695, %v1677_v44 }
0x20de   :  { %3008 = vpow2.f32 %v2797_v16 }
0x20e2   :  { %v3007_v35 = vpop.eup %3006 }
0x20e3   :  { %1703 = vrot.lane.b32.xlu0 %v3007_v35, %s3275_s27 }
0x20e4   :  { %v3009_v11 = vpop.eup %3008 }
0x20e5   :  { %v1681_v51 = vadd.f32 1.0, %v3009_v11 }
0x20e7   :  { %3010 = vrcp.f32 %v1681_v51  ;;  %v1693_v57 = vand.u32 2147483648, %v1681_v51  ;;  %vm1687_vm5 = vweird.f32 %v1681_v51  ;;  %v1691_v58 = vand.u32 2147483647, %v1681_v51 }
0x20e9   :  { %v1694_v60 = vor.u32 1.1754944e-38, %v1693_v57  ;;  %vm1692_vm9 = vcmp.eq.f32.partialorder %v1691_v58, 8.507059e+37 }
0x20eb   :  { %1322 = vrot.lane.b32.xlu0 %v1320_v50, %s3276_s11 }
0x20ed   :  { %v3011_v52 = vpop.eup %3010 }
0x20ee   :  { %v1683_v53 = vmul.f32 %v3011_v52, %v1681_v51  ;;  %vm1688_vm4 = vweird.f32 %v3011_v52 }
0x20ef   :  { %vm1689_vm8 = vmor %vm1687_vm5, %vm1688_vm4 }
0x20f0   :  { %v1684_v54 = vsub.f32 1.0, %v1683_v53 }
0x20f2   :  { %v1685_v29 = vmul.f32 %v3011_v52, %v1684_v54 }
0x20f4   :  { %v1686_v55 = vadd.f32 %v3011_v52, %v1685_v29 }
0x20f6   :  { %v1690_v59 = vsel %vm1689_vm8, %v3011_v52, %v1686_v55 }
0x20f7   :  { %v1695_v1 = vsel %vm1692_vm9, %v1694_v60, %v1690_v59 }
0x20f8   :  { %v1701_v5 = vmul.f32 %v1699_v4, %v1695_v1 }
0x2155   :  { %v1704_v61 = vpop.permute.xlu0 %1703 }
0x2156   :  { %v1706_v62 = vmul.f32 %v1704_v61, %v1695_v1 }
0x2158   :  { %1708 = vrot.lane.b32.xlu2 %v1706_v62, %s3276_s11 }
0x215d   :  { %v1323_v0 = vpop.permute.xlu0 %1322 }
0x215e   :  { %v3833_v2 = vadd.f32 %v1323_v0, %v1315_v19 }
0x2160   :  { %3012 = vtanh.f32 %v3833_v2 }
0x2166   :  { %v3013_v3 = vpop.eup %3012 }
0x2167   :  { %1328 = vrot.lane.b32.xlu2 %v3013_v3, %s3275_s27 }
0x21b2   :  { %v1709_v6 = vpop.permute.xlu2 %1708 }
0x21b3   :  { %v3838_v12 = vadd.f32 %v1709_v6, %v1701_v5 }
0x21b5   :  { %3014 = vtanh.f32 %v3838_v12  ;;  %v1768_v3 = vrot.slane %v3838_v12, 2 }
0x21bb   :  { %v3015_v13 = vpop.eup %3014 }
0x21bc   :  { %1714 = vrot.lane.b32.xlu1 %v3015_v13, %s3275_s27 }
0x21c1   :  { %v1329_v7 = vpop.permute.xlu2 %1328 }
0x21c2   :  { %v3842_v14 = vmul.f32 %v1329_v7, %v1309_v49  ;;  %v2034_v7 = vrot.slane %v3833_v2, 6 }
0x21c4   :  { %v1987_v27 = vrot.slane %v3842_v14, 6  ;;  %1956 = vrot.lane.b32.xlu1 %v3825_v21, %s3276_s11  ;;  %v3892_v21 = vadd.f32 %v3732_v39, %v3776_v28 }
0x21c6   :  { %1988 = vrot.lane.b32.xlu2 %v1987_v27, %s3276_s11 }
0x2220   :  { %v3881_v25 = vpop.permute.xlu2 %1988 }
0x222e   :  { %v1715_v17 = vpop.permute.xlu1 %1714 }
0x222f   :  { %v3848_v20 = vmul.f32 %v1715_v17, %v1695_v1 }
0x2231   :  { %1719 = vrot.lane.b32.xlu0 %v3848_v20, %s3276_s11 }
0x2236   :  { %v1957_v18 = vpop.permute.xlu1 %1956 }
0x2237   :  { %2804 = vmatmul.msk.f32.vlgmr.msrb.gmra.mxu2 %vm189_vm6, %v1957_v18 }
0x22a3   :  { %v1720_v32 = vpop.permute.xlu0 %1719 }
0x22a4   :  { %2798 = vmatmul.msk.f32.vlgmr.msra.gmra.mxu3 %vm189_vm6, %v1720_v32 }
0x22a5   :  { %2210 = vmatpush.msra.mxu3 %v3853_v22 }
0x22a7   :  { %2211 = vmatpush.msra.mxu3 %v3855_v10 }
0x22a9   :  { %2212 = vmatpush.msra.mxu3 %v3859_v30 }
0x22ab   :  { %2213 = vmatpush.msra.mxu3 %v3865_v8 }
0x22ac   :  { %2806 = vmatmul.msk.f32.vlgmr.msrb.gmra.mxu3 %vm189_vm6, %v3881_v25 }
0x22ad   :  { %2486 = vmatpush.msrb.mxu3 %v3853_v22 }
0x22af   :  { %2487 = vmatpush.msrb.mxu3 %v3855_v10 }
0x22b1   :  { %2488 = vmatpush.msrb.mxu3 %v3859_v30 }
0x22b3   :  { %2489 = vmatpush.msrb.mxu3 %v3865_v8 }
0x22ba   :  { %v1981_v41 = vpop.f32.mrf.mxu2 }
0x22bb   :  { %v3901_v24 = vadd.f32 %v3897_v56, %v1981_v41 }
0x2327   :  { %v1740_v40 = vpop.f32.mrf.mxu3 }
0x2328   :  { %v1744_v31 = vrot.slane %v1740_v40, 2 }
0x232a   :  { %v1746_v23 = vadd.f32 %v1744_v31, %v3892_v21 }
0x232c   :  { %3016 = vtanh.f32 %v1746_v23  ;;  %v2799_v28 = vmul.f32 -1.442695, %v1746_v23 }
0x232f   :  { %v2009_v26 = vpop.f32.mrf.mxu3 }
0x2330   :  { %v2012_v43 = vadd.f32 %v2009_v26, %v3901_v24 }
0x2332   :  { %v3017_v36 = vpop.eup %3016  ;;  %3018 = vtanh.f32 %v2012_v43  ;;  %v2807_v44 = vmul.f32 -1.442695, %v2012_v43 }
0x2333   :  { %1772 = vrot.lane.b32.xlu0 %v3017_v36, %s3275_s27  ;;  %3020 = vpow2.f32 %v2799_v28 }
0x2334   :  { %3022 = vpow2.f32 %v2807_v44 }
0x2338   :  { %v3019_v39 = vpop.eup %3018 }
0x2339   :  { %2038 = vrot.lane.b32.xlu1 %v3019_v39, %s3275_s27  ;;  %v3021_v33 = vpop.eup %3020 }
0x233a   :  { %v1750_v34 = vadd.f32 1.0, %v3021_v33  ;;  %v3023_v35 = vpop.eup %3022 }
0x233b   :  { %v2016_v45 = vadd.f32 1.0, %v3023_v35 }
0x233c   :  { %3024 = vrcp.f32 %v1750_v34  ;;  %v1762_v51 = vand.u32 2147483648, %v1750_v34  ;;  %vm1756_vm11 = vweird.f32 %v1750_v34  ;;  %v1760_v52 = vand.u32 2147483647, %v1750_v34 }
0x233d   :  { %3026 = vrcp.f32 %v2016_v45  ;;  %v2028_v59 = vand.u32 2147483648, %v2016_v45  ;;  %vm2022_vm2 = vweird.f32 %v2016_v45  ;;  %v2026_v61 = vand.u32 2147483647, %v2016_v45 }
0x233e   :  { %v1763_v29 = vor.u32 1.1754944e-38, %v1762_v51  ;;  %vm1761_vm13 = vcmp.eq.f32.partialorder %v1760_v52, 8.507059e+37 }
0x233f   :  { %v2029_v62 = vor.u32 1.1754944e-38, %v2028_v59  ;;  %vm2027_vm4 = vcmp.eq.f32.partialorder %v2026_v61, 8.507059e+37 }
0x2342   :  { %v3025_v37 = vpop.eup %3024 }
0x2343   :  { %v1752_v46 = vmul.f32 %v3025_v37, %v1750_v34  ;;  %v3027_v47 = vpop.eup %3026  ;;  %vm1757_vm10 = vweird.f32 %v3025_v37 }
0x2344   :  { %v2018_v49 = vmul.f32 %v3027_v47, %v2016_v45  ;;  %vm1758_vm12 = vmor %vm1756_vm11, %vm1757_vm10  ;;  %vm2023_vm14 = vweird.f32 %v3027_v47 }
0x2345   :  { %v1753_v48 = vsub.f32 1.0, %v1752_v46  ;;  %vm2024_vm3 = vmor %vm2022_vm2, %vm2023_vm14 }
0x2346   :  { %v2019_v16 = vsub.f32 1.0, %v2018_v49 }
0x2347   :  { %v1754_v50 = vmul.f32 %v3025_v37, %v1753_v48 }
0x2348   :  { %v2020_v53 = vmul.f32 %v3027_v47, %v2019_v16 }
0x2349   :  { %v1755_v11 = vadd.f32 %v3025_v37, %v1754_v50 }
0x234a   :  { %v2021_v55 = vadd.f32 %v3027_v47, %v2020_v53 }
0x234b   :  { %v1759_v54 = vsel %vm1758_vm12, %v3025_v37, %v1755_v11 }
0x234c   :  { %v1764_v58 = vsel %vm1761_vm13, %v1763_v29, %v1759_v54  ;;  %v2025_v1 = vsel %vm2024_vm3, %v3027_v47, %v2021_v55 }
0x234d   :  { %v2030_v19 = vsel %vm2027_vm4, %v2029_v62, %v2025_v1  ;;  %v1770_v4 = vmul.f32 %v1768_v3, %v1764_v58 }
0x234e   :  { %v2036_v27 = vmul.f32 %v2034_v7, %v2030_v19 }
0x23a5   :  { %v1773_v57 = vpop.permute.xlu0 %1772 }
0x23a6   :  { %v1775_v60 = vmul.f32 %v1773_v57, %v1764_v58 }
0x23a8   :  { %1777 = vrot.lane.b32.xlu2 %v1775_v60, %s3276_s11 }
0x23ab   :  { %v2039_v63 = vpop.permute.xlu1 %2038 }
0x23ac   :  { %v2041_v0 = vmul.f32 %v2039_v63, %v2030_v19 }
0x23ae   :  { %2043 = vrot.lane.b32.xlu0 %v2041_v0, %s3276_s11 }
0x2402   :  { %v1778_v5 = vpop.permute.xlu2 %1777 }
0x2403   :  { %v3909_v6 = vadd.f32 %v1778_v5, %v1770_v4 }
0x2405   :  { %3028 = vtanh.f32 %v3909_v6  ;;  %v1838_v4 = vrot.slane %v3909_v6, 2 }
0x240b   :  { %v3029_v13 = vpop.eup %3028 }
0x240c   :  { %1783 = vrot.lane.b32.xlu1 %v3029_v13, %s3275_s27 }
0x2420   :  { %v2044_v15 = vpop.permute.xlu0 %2043 }
0x2421   :  { %v3914_v9 = vadd.f32 %v2044_v15, %v2036_v27 }
0x2423   :  { %3030 = vtanh.f32 %v3914_v9  ;;  %v2103_v27 = vrot.slane %v3914_v9, 6 }
0x2429   :  { %v3031_v38 = vpop.eup %3030 }
0x242a   :  { %2049 = vrot.lane.b32.xlu2 %v3031_v38, %s3275_s27 }
0x247e   :  { %v1784_v12 = vpop.permute.xlu1 %1783 }
0x247f   :  { %v3918_v42 = vmul.f32 %v1784_v12, %v1764_v58 }
0x2481   :  { %v1788_v17 = vrot.slane %v3918_v42, 6  ;;  %v1931_v6 = vrot.slane %v3918_v42, 4 }
0x2483   :  { %1789 = vrot.lane.b32.xlu0 %v1788_v17, %s3276_s11 }
0x2484   :  { %v2050_v18 = vpop.permute.xlu2 %2049 }
0x2485   :  { %v3922_v32 = vmul.f32 %v2050_v18, %v2030_v19 }
0x2487   :  { %2054 = vrot.lane.b32.xlu1 %v3922_v32, %s3276_s11 }
0x24f5   :  { %v1790_v2 = vpop.permute.xlu0 %1789 }
0x24f6   :  { %2800 = vmatmul.msk.f32.vlgmr.msrb.gmra.mxu0 %vm189_vm6, %v1790_v2 }
0x24f7   :  { %2280 = vmatpush.msrb.mxu0 %v3853_v22 }
0x24f9   :  { %2281 = vmatpush.msrb.mxu0 %v3855_v10  ;;  %v2055_v40 = vpop.permute.xlu1 %2054 }
0x24fb   :  { %2282 = vmatpush.msrb.mxu0 %v3859_v30 }
0x24fd   :  { %2283 = vmatpush.msrb.mxu0 %v3865_v8 }
0x24fe   :  { %2808 = vmatmul.msk.f32.vlgmr.msra.gmra.mxu0 %vm189_vm6, %v2055_v40 }
0x2573   :  { %v1810_v31 = vpop.f32.mrf.mxu0 }
0x2574   :  { %v1814_v23 = vrot.slane %v1810_v31, 4  ;;  %v1939_v31 = vsel %vm736_vm15, %v3848_v20, %v1931_v6 }
0x2576   :  { %v1816_v41 = vadd.f32 %v1814_v23, %v3892_v21 }
0x2578   :  { %3032 = vtanh.f32 %v1816_v41  ;;  %v2801_v44 = vmul.f32 -1.442695, %v1816_v41 }
0x257b   :  { %v2075_v26 = vpop.f32.mrf.mxu0 }
0x257c   :  { %v2079_v43 = vrot.slane %v2075_v26, 6 }
0x257e   :  { %v3033_v36 = vpop.eup %3032  ;;  %v2081_v39 = vadd.f32 %v2079_v43, %v3901_v24 }
0x257f   :  { %1842 = vrot.lane.b32.xlu2 %v3033_v36, %s3275_s27 }
0x2580   :  { %3034 = vtanh.f32 %v2081_v39  ;;  %v2809_v46 = vmul.f32 -1.442695, %v2081_v39 }
0x2581   :  { %3036 = vpow2.f32 %v2801_v44 }
0x2586   :  { %v3035_v28 = vpop.eup %3034 }
0x2587   :  { %2107 = vrot.lane.b32.xlu0 %v3035_v28, %s3275_s27  ;;  %v3037_v33 = vpop.eup %3036 }
0x2588   :  { %v1820_v34 = vadd.f32 1.0, %v3037_v33 }
0x258a   :  { %3038 = vrcp.f32 %v1820_v34  ;;  %v1832_v49 = vand.u32 2147483648, %v1820_v34  ;;  %vm1826_vm8 = vweird.f32 %v1820_v34  ;;  %v1830_v50 = vand.u32 2147483647, %v1820_v34 }
0x258b   :  { %3040 = vpow2.f32 %v2809_v46 }
0x258c   :  { %v1833_v51 = vor.u32 1.1754944e-38, %v1832_v49  ;;  %vm1831_vm10 = vcmp.eq.f32.partialorder %v1830_v50, 8.507059e+37 }
0x2590   :  { %v3039_v35 = vpop.eup %3038 }
0x2591   :  { %v1822_v45 = vmul.f32 %v3039_v35, %v1820_v34  ;;  %vm1827_vm5 = vweird.f32 %v3039_v35  ;;  %v3041_v16 = vpop.eup %3040 }
0x2592   :  { %vm1828_vm9 = vmor %vm1826_vm8, %vm1827_vm5  ;;  %v2085_v52 = vadd.f32 1.0, %v3041_v16 }
0x2593   :  { %v1823_v37 = vsub.f32 1.0, %v1822_v45 }
0x2594   :  { %3042 = vrcp.f32 %v2085_v52  ;;  %v2097_v61 = vand.u32 2147483648, %v2085_v52  ;;  %vm2091_vm12 = vweird.f32 %v2085_v52  ;;  %v2095_v1 = vand.u32 2147483647, %v2085_v52 }
0x2595   :  { %v1824_v47 = vmul.f32 %v3039_v35, %v1823_v37 }
0x2596   :  { %v2098_v63 = vor.u32 1.1754944e-38, %v2097_v61  ;;  %vm2096_vm14 = vcmp.eq.f32.partialorder %v2095_v1, 8.507059e+37 }
0x2597   :  { %v1825_v48 = vadd.f32 %v3039_v35, %v1824_v47 }
0x2599   :  { %v1829_v11 = vsel %vm1828_vm9, %v3039_v35, %v1825_v48 }
0x259a   :  { %v1834_v53 = vsel %vm1831_vm10, %v1833_v51, %v1829_v11  ;;  %v3043_v55 = vpop.eup %3042 }
0x259b   :  { %v2087_v57 = vmul.f32 %v3043_v55, %v2085_v52  ;;  %vm2092_vm11 = vweird.f32 %v3043_v55  ;;  %v1840_v5 = vmul.f32 %v1838_v4, %v1834_v53 }
0x259c   :  { %vm2093_vm13 = vmor %vm2091_vm12, %vm2092_vm11 }
0x259d   :  { %v2088_v58 = vsub.f32 1.0, %v2087_v57 }
0x259f   :  { %v2089_v59 = vmul.f32 %v3043_v55, %v2088_v58 }
0x25a1   :  { %v2090_v60 = vadd.f32 %v3043_v55, %v2089_v59 }
0x25a3   :  { %v2094_v62 = vsel %vm2093_vm13, %v3043_v55, %v2090_v60 }
0x25a4   :  { %v2099_v0 = vsel %vm2096_vm14, %v2098_v63, %v2094_v62 }
0x25a5   :  { %v2105_v15 = vmul.f32 %v2103_v27, %v2099_v0 }
0x25d9   :  { %v1843_v54 = vpop.permute.xlu2 %1842 }
0x25da   :  { %v1845_v29 = vmul.f32 %v1843_v54, %v1834_v53 }
0x25dc   :  { %1847 = vrot.lane.b32.xlu1 %v1845_v29, %s3276_s11 }
0x25f9   :  { %v2108_v19 = vpop.permute.xlu0 %2107 }
0x25fa   :  { %v2110_v3 = vmul.f32 %v2108_v19, %v2099_v0 }
0x25fc   :  { %2112 = vrot.lane.b32.xlu2 %v2110_v3, %s3276_s11 }
0x264e   :  { %v1848_v13 = vpop.permute.xlu1 %1847 }
0x264f   :  { %v3939_v7 = vadd.f32 %v1848_v13, %v1840_v5 }
0x2651   :  { %3044 = vtanh.f32 %v3939_v7 }
0x2656   :  { %v2113_v38 = vpop.permute.xlu2 %2112 }
0x2657   :  { %v3045_v12 = vpop.eup %3044  ;;  %v2115_v17 = vadd.f32 %v2113_v38, %v2105_v15 }
0x2658   :  { %1853 = vrot.lane.b32.xlu0 %v3045_v12, %s3275_s27 }
0x2659   :  { %3046 = vtanh.f32 %v2115_v17  ;;  %v2173_v54 = vrot.slane %v2115_v17, 6 }
0x265f   :  { %v3047_v18 = vpop.eup %3046 }
0x2660   :  { %2118 = vrot.lane.b32.xlu1 %v3047_v18, %s3275_s27 }
0x26ca   :  { %v1854_v2 = vpop.permute.xlu0 %1853 }
0x26cb   :  { %v1856_v40 = vmul.f32 %v1854_v2, %v1834_v53 }
0x26cd   :  { %v1858_v23 = vrot.slane %v1856_v40, 4  ;;  %v3949_v9 = vsel %vm162_vm0, %v1939_v31, %v1856_v40  ;;  %v1908_v31 = vrot.slane %v3939_v7, 2 }
0x26cf   :  { %1859 = vrot.lane.b32.xlu2 %v1858_v23, %s3276_s11 }
0x26d2   :  { %v2119_v41 = vpop.permute.xlu1 %2118 }
0x26d3   :  { %v3952_v26 = vmul.f32 %v2119_v41, %v2099_v0 }
0x26d5   :  { %v2123_v43 = vrot.slane %v3952_v26, 2 }
0x26d7   :  { %2124 = vrot.lane.b32.xlu0 %v2123_v43, %s3276_s11 }
0x2729   :  { %v1860_v36 = vpop.permute.xlu2 %1859 }
0x272a   :  { %2802 = vmatmul.msk.f32.vlgmr.msrb.gmra.mxu1 %vm189_vm6, %v1860_v36 }
0x272b   :  { %2346 = vmatpush.msrb.mxu1 %v3853_v22 }
0x272d   :  { %2347 = vmatpush.msrb.mxu1 %v3855_v10 }
0x272f   :  { %2348 = vmatpush.msrb.mxu1 %v3859_v30 }
0x2731   :  { %2349 = vmatpush.msrb.mxu1 %v3865_v8 }
0x2749   :  { %v2125_v20 = vpop.permute.xlu0 %2124 }
0x274a   :  { %2810 = vmatmul.msk.f32.vlgmr.msra.gmra.mxu1 %vm189_vm6, %v2125_v20 }
0x27a7   :  { %v1880_v42 = vpop.f32.mrf.mxu1 }
0x27a8   :  { %v1884_v48 = vrot.slane %v1880_v42, 6 }
0x27aa   :  { %v1886_v16 = vadd.f32 %v1884_v48, %v3892_v21 }
0x27ac   :  { %v2803_v21 = vmul.f32 -1.442695, %v1886_v16 }
0x27c7   :  { %v2145_v39 = vpop.f32.mrf.mxu1 }
0x27c8   :  { %v2149_v28 = vrot.slane %v2145_v39, 4 }
0x27ca   :  { %v2151_v44 = vadd.f32 %v2149_v28, %v3901_v24 }
0x27cc   :  { %3048 = vtanh.f32 %v2151_v44  ;;  %v2811_v34 = vmul.f32 -1.442695, %v2151_v44 }
0x27ce   :  { %3050 = vpow2.f32 %v2811_v34 }
0x27d2   :  { %v3049_v33 = vpop.eup %3048 }
0x27d3   :  { %2177 = vrot.lane.b32.xlu1 %v3049_v33, %s3275_s27 }
0x27d4   :  { %v3051_v22 = vpop.eup %3050 }
0x27d5   :  { %v2155_v10 = vadd.f32 1.0, %v3051_v22 }
0x27d7   :  { %3052 = vrcp.f32 %v2155_v10  ;;  %v2167_v46 = vand.u32 2147483648, %v2155_v10  ;;  %vm2161_vm3 = vweird.f32 %v2155_v10  ;;  %v2165_v47 = vand.u32 2147483647, %v2155_v10 }
0x27d8   :  { %3054 = vtanh.f32 %v1886_v16 }
0x27d9   :  { %v2168_v50 = vor.u32 1.1754944e-38, %v2167_v46  ;;  %vm2166_vm5 = vcmp.eq.f32.partialorder %v2165_v47, 8.507059e+37 }
0x27dd   :  { %v3053_v30 = vpop.eup %3052 }
0x27de   :  { %v2157_v35 = vmul.f32 %v3053_v30, %v2155_v10  ;;  %vm2162_vm2 = vweird.f32 %v3053_v30  ;;  %v3055_v53 = vpop.eup %3054 }
0x27df   :  { %vm2163_vm4 = vmor %vm2161_vm3, %vm2162_vm2 }
0x27e0   :  { %v2158_v8 = vsub.f32 1.0, %v2157_v35 }
0x27e2   :  { %v2159_v45 = vmul.f32 %v3053_v30, %v2158_v8 }
0x27e4   :  { %v2160_v37 = vadd.f32 %v3053_v30, %v2159_v45 }
0x27e6   :  { %v2164_v49 = vsel %vm2163_vm4, %v3053_v30, %v2160_v37 }
0x27e7   :  { %v2169_v51 = vsel %vm2166_vm5, %v2168_v50, %v2164_v49 }
0x27e8   :  { %v2175_v29 = vmul.f32 %v2173_v54, %v2169_v51 }
0x2845   :  { %v2178_v11 = vpop.permute.xlu1 %2177 }
0x2846   :  { %v2180_v52 = vmul.f32 %v2178_v11, %v2169_v51 }
0x2848   :  { %2182 = vrot.lane.b32.xlu2 %v2180_v52, %s3276_s11 }
0x2850   :  { %1912 = vrot.lane.b32.xlu2 %v3055_v53, %s3275_s27 }
0x28a2   :  { %v2183_v55 = vpop.permute.xlu2 %2182 }
0x28a3   :  { %v3967_v57 = vadd.f32 %v2183_v55, %v2175_v29 }
0x28a5   :  { %3056 = vtanh.f32 %v3967_v57  ;;  %v2243_v50 = vrot.slane %v3967_v57, 6 }
0x28a6   :  { %3058 = vpow2.f32 %v2803_v21  ;;  %v2552_v21 = vrot.slane %v3922_v32, 2 }
0x28aa   :  { %v1913_v15 = vpop.permute.xlu2 %1912 }
0x28ab   :  { %v3057_v58 = vpop.eup %3056 }
0x28ac   :  { %2188 = vrot.lane.b32.xlu0 %v3057_v58, %s3275_s27  ;;  %v3059_v59 = vpop.eup %3058 }
0x28ad   :  { %v1890_v60 = vadd.f32 1.0, %v3059_v59 }
0x28af   :  { %3060 = vrcp.f32 %v1890_v60  ;;  %v1902_v5 = vand.u32 2147483648, %v1890_v60  ;;  %vm1896_vm9 = vweird.f32 %v1890_v60  ;;  %v1900_v13 = vand.u32 2147483647, %v1890_v60 }
0x28b1   :  { %v1903_v38 = vor.u32 1.1754944e-38, %v1902_v5  ;;  %vm1901_vm11 = vcmp.eq.f32.partialorder %v1900_v13, 8.507059e+37 }
0x28b5   :  { %v3061_v61 = vpop.eup %3060 }
0x28b6   :  { %v1892_v1 = vmul.f32 %v3061_v61, %v1890_v60  ;;  %vm1897_vm8 = vweird.f32 %v3061_v61 }
0x28b7   :  { %vm1898_vm10 = vmor %vm1896_vm9, %vm1897_vm8  ;;  %vm2631_vm9 = vcmask 17408  }
0x28b8   :  { %v1893_v62 = vsub.f32 1.0, %v1892_v1 }
0x28ba   :  { %v1894_v63 = vmul.f32 %v3061_v61, %v1893_v62 }
0x28bc   :  { %v1895_v3 = vadd.f32 %v3061_v61, %v1894_v63 }
0x28be   :  { %v1899_v27 = vsel %vm1898_vm10, %v3061_v61, %v1895_v3 }
0x28bf   :  { %v1904_v12 = vsel %vm1901_vm11, %v1903_v38, %v1899_v27 }
0x28c0   :  { %v1915_v17 = vmul.f32 %v1913_v15, %v1904_v12  ;;  %v1910_v41 = vmul.f32 %v1908_v31, %v1904_v12 }
0x291e   :  { %v2189_v19 = vpop.permute.xlu0 %2188 }
0x291f   :  { %v3971_v0 = vmul.f32 %v2189_v19, %v2169_v51 }
0x2921   :  { %v2193_v4 = vrot.slane %v3971_v0, 4  ;;  %v2548_v55 = vrot.slane %v3971_v0, 2 }
0x2923   :  { %2194 = vrot.lane.b32.xlu1 %v2193_v4, %s3276_s11 }
0x292b   :  { %1917 = vrot.lane.b32.xlu1 %v1915_v17, %s3276_s11 }
0x2995   :  { %v2195_v18 = vpop.permute.xlu1 %2194 }
0x2996   :  { %2812 = vmatmul.msk.f32.vlgmr.msra.gmra.mxu3 %vm189_vm6, %v2195_v18 }
0x299d   :  { %v1918_v23 = vpop.permute.xlu1 %1917 }
0x299e   :  { %v1920_v43 = vadd.f32 %v1918_v23, %v1910_v41 }
0x2a19   :  { %v2215_v6 = vpop.f32.mrf.mxu3 }
0x2a1a   :  { %v2219_v2 = vrot.slane %v2215_v6, 2 }
0x2a1c   :  { %v2221_v40 = vadd.f32 %v2219_v2, %v3901_v24 }
0x2a1e   :  { %3062 = vtanh.f32 %v2221_v40  ;;  %v2813_v42 = vmul.f32 -1.442695, %v2221_v40 }
0x2a1f   :  { %3064 = vtanh.f32 %v1920_v43 }
0x2a20   :  { %3066 = vpow2.f32 %v2813_v42  ;;  %v2606_v42 = vld [vmem:[%s4124_s16 + $0x18] sm:$0xff] }
0x2a21   :  { %2623 = vmatpush.msra.mxu1 %v2606_v42 }
0x2a24   :  { %v3063_v36 = vpop.eup %3062 }
0x2a25   :  { %2247 = vrot.lane.b32.xlu0 %v3063_v36, %s3275_s27  ;;  %v3065_v20 = vpop.eup %3064 }
0x2a26   :  { %v3067_v39 = vpop.eup %3066 }
0x2a27   :  { %v2225_v28 = vadd.f32 1.0, %v3067_v39  ;;  %v2605_v39 = vld [vmem:[%s4124_s16 + $0x10] sm:$0xff] }
0x2a28   :  { %2624 = vmatpush.msra.mxu1 %v2605_v39 }
0x2a29   :  { %3068 = vrcp.f32 %v2225_v28  ;;  %v2237_v22 = vand.u32 2147483648, %v2225_v28  ;;  %vm2231_vm13 = vweird.f32 %v2225_v28  ;;  %v2235_v10 = vand.u32 2147483647, %v2225_v28 }
0x2a2b   :  { %v2238_v35 = vor.u32 1.1754944e-38, %v2237_v22  ;;  %vm2236_vm2 = vcmp.eq.f32.partialorder %v2235_v10, 8.507059e+37  ;;  %v2842_v22 = vld [vmem:[%s4125_s17] ss:$0 sm:$0xff] }
0x2a2d   :  { %1923 = vrot.lane.b32.xlu0 %v3065_v20, %s3275_s27 }
0x2a2f   :  { %v3069_v44 = vpop.eup %3068 }
0x2a30   :  { %v2227_v24 = vmul.f32 %v3069_v44, %v2225_v28  ;;  %vm2232_vm12 = vweird.f32 %v3069_v44  ;;  %v2604_v28 = vld [vmem:[%s4124_s16 + $0x8] sm:$0xff] }
0x2a31   :  { %vm2233_vm14 = vmor %vm2231_vm13, %vm2232_vm12  ;;  %2625 = vmatpush.msra.mxu1 %v2604_v28 }
0x2a32   :  { %v2228_v33 = vsub.f32 1.0, %v2227_v24 }
0x2a34   :  { %v2229_v7 = vmul.f32 %v3069_v44, %v2228_v33 }
0x2a36   :  { %v2230_v34 = vadd.f32 %v3069_v44, %v2229_v7 }
0x2a38   :  { %v2234_v30 = vsel %vm2233_vm14, %v3069_v44, %v2230_v34  ;;  %v2603_v44 = vld [vmem:[%s4124_s16] sm:$0xff] }
0x2a39   :  { %v2239_v45 = vsel %vm2236_vm2, %v2238_v35, %v2234_v30  ;;  %2626 = vmatpush.msra.mxu1 %v2603_v44 }
0x2a3a   :  { %v2245_v16 = vmul.f32 %v2243_v50, %v2239_v45 }
0x2a97   :  { %v2248_v8 = vpop.permute.xlu0 %2247 }
0x2a98   :  { %v2250_v37 = vmul.f32 %v2248_v8, %v2239_v45 }
0x2a9a   :  { %2252 = vrot.lane.b32.xlu2 %v2250_v37, %s3276_s11 }
0x2a9f   :  { %v1924_v46 = vpop.permute.xlu0 %1923 }
0x2aa0   :  { %v1926_v47 = vmul.f32 %v1924_v46, %v1904_v12 }
0x2aa2   :  { %v1934_v48 = vrot.slane %v1926_v47, 4 }
0x2aa4   :  { %v1941_v49 = vsel %vm739_vm7, %v3949_v9, %v1934_v48  ;;  %v2550_v9 = vrot.slane %v3952_v26, 6 }
0x2aa5   :  { %1958 = vrot.lane.b32.xlu2 %v1941_v49, %s3276_s11 }
0x2af4   :  { %v2253_v11 = vpop.permute.xlu2 %2252 }
0x2af5   :  { %v2255_v51 = vadd.f32 %v2253_v11, %v2245_v16 }
0x2af7   :  { %3070 = vtanh.f32 %v2255_v51  ;;  %v2310_v40 = vrot.slane %v2255_v51, 6 }
0x2afd   :  { %v3071_v52 = vpop.eup %3070 }
0x2afe   :  { %2258 = vrot.lane.b32.xlu1 %v3071_v52, %s3275_s27 }
0x2aff   :  { %v1959_v53 = vpop.permute.xlu2 %1958 }
0x2b00   :  { %2805 = vmatmul.msk.f32.gmra.mxu2 %vm189_vm6, %v1959_v53 }
0x2b70   :  { %v2259_v54 = vpop.permute.xlu1 %2258 }
0x2b71   :  { %v2261_v29 = vmul.f32 %v2259_v54, %v2239_v45 }
0x2b73   :  { %v2263_v58 = vrot.slane %v2261_v29, 6 }
0x2b75   :  { %v2557_v57 = vsel %vm736_vm15, %v2263_v58, %v2548_v55  ;;  %2264 = vrot.lane.b32.xlu0 %v2263_v58, %s3276_s11 }
0x2b76   :  { %v2558_v59 = vsel %vm162_vm0, %v2557_v57, %v2550_v9 }
0x2b77   :  { %v3995_v60 = vsel %vm739_vm7, %v2558_v59, %v2552_v21 }
0x2b83   :  { %v1984_v1 = vpop.f32.mrf.mxu2 }
0x2b84   :  { %v3999_v62 = vadd.f32 %v3897_v56, %v1984_v1 }
0x2be7   :  { %v2265_v61 = vpop.permute.xlu0 %2264 }
0x2be8   :  { %2814 = vmatmul.msk.f32.vlgmr.msrb.gmra.mxu0 %vm189_vm6, %v2265_v61 }
0x2c65   :  { %v2285_v63 = vpop.f32.mrf.mxu0 }
0x2c66   :  { %v2288_v26 = vadd.f32 %v2285_v63, %v3999_v62 }
0x2c68   :  { %3072 = vtanh.f32 %v2288_v26  ;;  %v2815_v19 = vmul.f32 -1.442695, %v2288_v26 }
0x2c6a   :  { %3074 = vpow2.f32 %v2815_v19 }
0x2c6e   :  { %v3073_v32 = vpop.eup %3072 }
0x2c6f   :  { %2314 = vrot.lane.b32.xlu1 %v3073_v32, %s3275_s27 }
0x2c70   :  { %v3075_v0 = vpop.eup %3074 }
0x2c71   :  { %v2292_v3 = vadd.f32 1.0, %v3075_v0 }
0x2c73   :  { %3076 = vrcp.f32 %v2292_v3  ;;  %v2304_v56 = vand.u32 2147483648, %v2292_v3  ;;  %vm2298_vm4 = vweird.f32 %v2292_v3  ;;  %v2302_v38 = vand.u32 2147483647, %v2292_v3 }
0x2c75   :  { %v2305_v17 = vor.u32 1.1754944e-38, %v2304_v56  ;;  %vm2303_vm8 = vcmp.eq.f32.partialorder %v2302_v38, 8.507059e+37 }
0x2c79   :  { %v3077_v4 = vpop.eup %3076 }
0x2c7a   :  { %v2294_v5 = vmul.f32 %v3077_v4, %v2292_v3  ;;  %vm2299_vm3 = vweird.f32 %v3077_v4 }
0x2c7b   :  { %vm2300_vm5 = vmor %vm2298_vm4, %vm2299_vm3 }
0x2c7c   :  { %v2295_v13 = vsub.f32 1.0, %v2294_v5 }
0x2c7e   :  { %v2296_v27 = vmul.f32 %v3077_v4, %v2295_v13 }
0x2c80   :  { %v2297_v15 = vadd.f32 %v3077_v4, %v2296_v27 }
0x2c82   :  { %v2301_v12 = vsel %vm2300_vm5, %v3077_v4, %v2297_v15 }
0x2c83   :  { %v2306_v6 = vsel %vm2303_vm8, %v2305_v17, %v2301_v12 }
0x2c84   :  { %v2312_v31 = vmul.f32 %v2310_v40, %v2306_v6 }
0x2ce1   :  { %v2315_v18 = vpop.permute.xlu1 %2314 }
0x2ce2   :  { %v2317_v2 = vmul.f32 %v2315_v18, %v2306_v6 }
0x2ce4   :  { %2319 = vrot.lane.b32.xlu2 %v2317_v2, %s3276_s11 }
0x2d3e   :  { %v2320_v23 = vpop.permute.xlu2 %2319 }
0x2d3f   :  { %v2322_v41 = vadd.f32 %v2320_v23, %v2312_v31 }
0x2d41   :  { %3078 = vtanh.f32 %v2322_v41  ;;  %v2379_v29 = vrot.slane %v2322_v41, 6 }
0x2d47   :  { %v3079_v43 = vpop.eup %3078 }
0x2d48   :  { %2325 = vrot.lane.b32.xlu0 %v3079_v43, %s3275_s27 }
0x2dba   :  { %v2326_v36 = vpop.permute.xlu0 %2325 }
0x2dbb   :  { %v4005_v20 = vmul.f32 %v2326_v36, %v2306_v6 }
0x2dbd   :  { %2330 = vrot.lane.b32.xlu1 %v4005_v20, %s3276_s11 }
0x2e2f   :  { %v2331_v24 = vpop.permute.xlu1 %2330 }
0x2e30   :  { %2816 = vmatmul.msk.f32.vlgmr.msrb.gmra.mxu1 %vm189_vm6, %v2331_v24 }
0x2e38   :  { %2824 = vmatmul.msk.f32.vlgmr.msra.gmra.mxu1 %vm189_vm6, %v3881_v25 }
0x2ead   :  { %v2351_v33 = vpop.f32.mrf.mxu1 }
0x2eae   :  { %v2355_v7 = vrot.slane %v2351_v33, 6 }
0x2eb0   :  { %v2357_v34 = vadd.f32 %v2355_v7, %v3999_v62 }
0x2eb2   :  { %3080 = vtanh.f32 %v2357_v34  ;;  %v2817_v25 = vmul.f32 -1.442695, %v2357_v34 }
0x2eb4   :  { %3082 = vpow2.f32 %v2817_v25 }
0x2eb5   :  { %v2628_v10 = vpop.f32.mrf.mxu1 }
0x2eb6   :  { %v4028_v30 = vadd.f32 %v2842_v22, %v2628_v10 }
0x2eb8   :  { %v3081_v35 = vpop.eup %3080  ;;  %2632 = vst.msk [vmem:[#allocation13] sm:$0x3] %vm2631_vm9, %v4028_v30  ;;  %v2633_v22 = vsel %vm2631_vm9, %v4028_v30, -inf }
0x2eb9   :  { %2383 = vrot.lane.b32.xlu2 %v3081_v35, %s3275_s27 }
0x2eba   :  { %v3083_v8 = vpop.eup %3082 }
0x2ebb   :  { %v2361_v45 = vadd.f32 1.0, %v3083_v8 }
0x2ebd   :  { %3084 = vrcp.f32 %v2361_v45  ;;  %v2373_v50 = vand.u32 2147483648, %v2361_v45  ;;  %vm2367_vm11 = vweird.f32 %v2361_v45  ;;  %v2371_v16 = vand.u32 2147483647, %v2361_v45 }
0x2ebf   :  { %v2374_v51 = vor.u32 1.1754944e-38, %v2373_v50  ;;  %vm2372_vm13 = vcmp.eq.f32.partialorder %v2371_v16, 8.507059e+37 }
0x2ec3   :  { %v3085_v37 = vpop.eup %3084 }
0x2ec4   :  { %v2363_v46 = vmul.f32 %v3085_v37, %v2361_v45  ;;  %vm2368_vm10 = vweird.f32 %v3085_v37 }
0x2ec5   :  { %vm2369_vm12 = vmor %vm2367_vm11, %vm2368_vm10 }
0x2ec6   :  { %v2364_v47 = vsub.f32 1.0, %v2363_v46 }
0x2ec8   :  { %v2365_v48 = vmul.f32 %v3085_v37, %v2364_v47 }
0x2eca   :  { %v2366_v49 = vadd.f32 %v3085_v37, %v2365_v48 }
0x2ecc   :  { %v2370_v11 = vsel %vm2369_vm12, %v3085_v37, %v2366_v49 }
0x2ecd   :  { %v2375_v53 = vsel %vm2372_vm13, %v2374_v51, %v2370_v11 }
0x2ece   :  { %v2381_v55 = vmul.f32 %v2379_v29, %v2375_v53 }
0x2f13   :  { %v2384_v52 = vpop.permute.xlu2 %2383 }
0x2f14   :  { %v2386_v54 = vmul.f32 %v2384_v52, %v2375_v53 }
0x2f16   :  { %2388 = vrot.lane.b32.xlu0 %v2386_v54, %s3276_s11 }
0x2f88   :  { %v2389_v58 = vpop.permute.xlu0 %2388 }
0x2f89   :  { %v2391_v9 = vadd.f32 %v2389_v58, %v2381_v55 }
0x2f8b   :  { %3086 = vtanh.f32 %v2391_v9  ;;  %v2449_v31 = vrot.slane %v2391_v9, 6 }
0x2f91   :  { %v3087_v21 = vpop.eup %3086 }
0x2f92   :  { %2394 = vrot.lane.b32.xlu1 %v3087_v21, %s3275_s27 }
0x3004   :  { %v2395_v57 = vpop.permute.xlu1 %2394 }
0x3005   :  { %v4035_v59 = vmul.f32 %v2395_v57, %v2375_v53 }
0x3007   :  { %v2399_v61 = vrot.slane %v4035_v59, 2 }
0x3009   :  { %2400 = vrot.lane.b32.xlu2 %v2399_v61, %s3276_s11  ;;  %v2543_v61 = vrot.slane %v4035_v59, 6  ;;  %v2561_v59 = vld [vmem:[%s4122_s14 + $0x8] sm:$0xff] }
0x3063   :  { %v2401_v1 = vpop.permute.xlu2 %2400 }
0x3064   :  { %2818 = vmatmul.msk.f32.vlgmr.msra.gmra.mxu2 %vm189_vm6, %v2401_v1  ;;  %v2545_v1 = vrot.slane %v4005_v20, 2  ;;  %v2562_v20 = vld [vmem:[%s4122_s14 + $0x10] sm:$0xff] }
0x30e7   :  { %v2421_v63 = vpop.f32.mrf.mxu2 }
0x30e8   :  { %v2425_v26 = vrot.slane %v2421_v63, 4 }
0x30ea   :  { %v2427_v32 = vadd.f32 %v2425_v26, %v3999_v62 }
0x30ec   :  { %3088 = vtanh.f32 %v2427_v32  ;;  %v2819_v0 = vmul.f32 -1.442695, %v2427_v32 }
0x30ee   :  { %3090 = vpow2.f32 %v2819_v0 }
0x30f2   :  { %v3089_v19 = vpop.eup %3088 }
0x30f3   :  { %2453 = vrot.lane.b32.xlu0 %v3089_v19, %s3275_s27 }
0x30f4   :  { %v3091_v3 = vpop.eup %3090 }
0x30f5   :  { %v2431_v4 = vadd.f32 1.0, %v3091_v3  ;;  %v2563_v3 = vld [vmem:[%s4122_s14 + $0x18] sm:$0xff] }
0x30f6   :  { %2590 = vmatpush.msra.mxu0 %v2563_v3 }
0x30f7   :  { %3092 = vrcp.f32 %v2431_v4  ;;  %v2443_v38 = vand.u32 2147483648, %v2431_v4  ;;  %vm2437_vm2 = vweird.f32 %v2431_v4  ;;  %v2441_v12 = vand.u32 2147483647, %v2431_v4 }
0x30f8   :  { %2591 = vmatpush.msra.mxu0 %v2562_v20 }
0x30f9   :  { %v2444_v18 = vor.u32 1.1754944e-38, %v2443_v38  ;;  %vm2442_vm4 = vcmp.eq.f32.partialorder %v2441_v12, 8.507059e+37 }
0x30fa   :  { %2592 = vmatpush.msra.mxu0 %v2561_v59 }
0x30fd   :  { %v3093_v5 = vpop.eup %3092 }
0x30fe   :  { %v2433_v13 = vmul.f32 %v3093_v5, %v2431_v4  ;;  %vm2438_vm14 = vweird.f32 %v3093_v5 }
0x30ff   :  { %vm2439_vm3 = vmor %vm2437_vm2, %vm2438_vm14  ;;  %vm2705_vm14 = vcmask 1024  }
0x3100   :  { %v2434_v27 = vsub.f32 1.0, %v2433_v13 }
0x3102   :  { %v2435_v15 = vmul.f32 %v3093_v5, %v2434_v27 }
0x3104   :  { %v2436_v56 = vadd.f32 %v3093_v5, %v2435_v15  ;;  %v2670_v15 = vld [vmem:[%s4156_s7] sm:$0x3] }
0x3106   :  { %v2440_v17 = vsel %vm2439_vm3, %v3093_v5, %v2436_v56  ;;  %v2843_v56 = vld [vmem:[%s4128_s20] ss:$0 sm:$0xff] }
0x3107   :  { %v2445_v2 = vsel %vm2442_vm4, %v2444_v18, %v2440_v17  ;;  %v2675_v38 = vmul.f32 %v2843_v56, %v2670_v15 }
0x3108   :  { %v2451_v23 = vmul.f32 %v2449_v31, %v2445_v2 }
0x3165   :  { %v2454_v6 = vpop.permute.xlu0 %2453 }
0x3166   :  { %v2456_v40 = vmul.f32 %v2454_v6, %v2445_v2 }
0x3168   :  { %2458 = vrot.lane.b32.xlu1 %v2456_v40, %s3276_s11 }
0x31da   :  { %v2459_v41 = vpop.permute.xlu1 %2458 }
0x31db   :  { %v2461_v43 = vadd.f32 %v2459_v41, %v2451_v23 }
0x31dd   :  { %3094 = vtanh.f32 %v2461_v43  ;;  %v2519_v52 = vrot.slane %v2461_v43, 6 }
0x31e3   :  { %v3095_v36 = vpop.eup %3094 }
0x31e4   :  { %2464 = vrot.lane.b32.xlu2 %v3095_v36, %s3275_s27 }
0x323e   :  { %v2465_v42 = vpop.permute.xlu2 %2464 }
0x323f   :  { %v2467_v39 = vmul.f32 %v2465_v42, %v2445_v2  ;;  %v2844_v42 = vld [vmem:[%s4126_s18] ss:$0 sm:$0xff]  ;;  %s2727_s18 = sshll.u32 %s4131_s24, 4  ;;  %s2728_s18 = int_to_ptr.hbm [resolvable:$true] %s2727_s18 }
0x3240   :  { %2730 = dma.vmem_to_hbm [thread:$0]  %s2726_s26, 32, %s2728_s18, [#allocation14]  }
0x3241   :  { %v2469_v28 = vrot.slane %v2467_v39, 4  ;;  %v2541_v21 = vrot.slane %v2467_v39, 2 }
0x3243   :  { %2470 = vrot.lane.b32.xlu0 %v2469_v28, %s3276_s11 }
0x32b5   :  { %v2471_v44 = vpop.permute.xlu0 %2470 }
0x32b6   :  { %2820 = vmatmul.msk.f32.vlgmr.msrb.gmra.mxu3 %vm189_vm6, %v2471_v44 }
0x3339   :  { %v2491_v24 = vpop.f32.mrf.mxu3 }
0x333a   :  { %v2495_v33 = vrot.slane %v2491_v24, 2 }
0x333c   :  { %v2497_v7 = vadd.f32 %v2495_v33, %v3999_v62  ;;  %v2845_v33 = vld [vmem:[%s4123_s15] ss:$0 sm:$0xff] }
0x333e   :  { %3096 = vtanh.f32 %v2497_v7  ;;  %v2821_v10 = vmul.f32 -1.442695, %v2497_v7 }
0x3340   :  { %3098 = vpow2.f32 %v2821_v10 }
0x3344   :  { %v3097_v34 = vpop.eup %3096 }
0x3345   :  { %2523 = vrot.lane.b32.xlu1 %v3097_v34, %s3275_s27 }
0x3346   :  { %v3099_v35 = vpop.eup %3098 }
0x3347   :  { %v2501_v25 = vadd.f32 1.0, %v3099_v35  ;;  %v2846_v35 = vld [vmem:[#allocation3] ss:$0 sm:$0xff] }
0x3349   :  { %3100 = vrcp.f32 %v2501_v25  ;;  %v2513_v62 = vand.u32 2147483648, %v2501_v25  ;;  %vm2507_vm8 = vweird.f32 %v2501_v25  ;;  %v2511_v48 = vand.u32 2147483647, %v2501_v25 }
0x334b   :  { %v2514_v50 = vor.u32 1.1754944e-38, %v2513_v62  ;;  %vm2512_vm11 = vcmp.eq.f32.partialorder %v2511_v48, 8.507059e+37 }
0x334f   :  { %v3101_v8 = vpop.eup %3100 }
0x3350   :  { %v2503_v45 = vmul.f32 %v3101_v8, %v2501_v25  ;;  %vm2508_vm5 = vweird.f32 %v3101_v8 }
0x3351   :  { %vm2509_vm10 = vmor %vm2507_vm8, %vm2508_vm5 }
0x3352   :  { %v2504_v37 = vsub.f32 1.0, %v2503_v45 }
0x3354   :  { %v2505_v46 = vmul.f32 %v3101_v8, %v2504_v37 }
0x3356   :  { %v2506_v47 = vadd.f32 %v3101_v8, %v2505_v46 }
0x3358   :  { %v2510_v49 = vsel %vm2509_vm10, %v3101_v8, %v2506_v47  ;;  %v2847_v8 = vld [vmem:[#allocation2] ss:$0 sm:$0xff] }
0x3359   :  { %v2515_v11 = vsel %vm2512_vm11, %v2514_v50, %v2510_v49 }
0x335a   :  { %v2521_v53 = vmul.f32 %v2519_v52, %v2515_v11 }
0x336f   :  { %2634 = vmax.xlane.f32.xlu1 %v2633_v22 }
0x33b7   :  { %v2524_v16 = vpop.permute.xlu1 %2523 }
0x33b8   :  { %v2526_v51 = vmul.f32 %v2524_v16, %v2515_v11 }
0x33ba   :  { %2528 = vrot.lane.b32.xlu2 %v2526_v51, %s3276_s11 }
0x33e2   :  { %v2635_v19 = vpop.xlane.xlu1 %2634 }
0x33e3   :  { %v2636_v0 = vsub.f32 %v4028_v30, %v2635_v19  ;;  %v2560_v30 = vld [vmem:[%s4122_s14] sm:$0xff] }
0x33e4   :  { %2593 = vmatpush.msra.mxu0 %v2560_v30 }
0x3414   :  { %v2529_v54 = vpop.permute.xlu2 %2528 }
0x3415   :  { %v2531_v29 = vadd.f32 %v2529_v54, %v2521_v53 }
0x3417   :  { %3102 = vtanh.f32 %v2531_v29 }
0x341d   :  { %v3103_v55 = vpop.eup %3102 }
0x341e   :  { %2534 = vrot.lane.b32.xlu0 %v3103_v55, %s3275_s27 }
0x3426   :  { %2572 = vrot.lane.b32.xlu0 %v3995_v60, %s3276_s11  ;;  %v2637_v60 = vmul.f32 1.442695, %v2636_v0 }
0x3428   :  { %3104 = vpow2.f32 %v2637_v60 }
0x342e   :  { %v3105_v4 = vpop.eup %3104 }
0x342f   :  { %v2639_v5 = vsel %vm2631_vm9, %v3105_v4, 0.0 }
0x3490   :  { %v2535_v58 = vpop.permute.xlu0 %2534 }
0x3491   :  { %v2537_v9 = vmul.f32 %v2535_v58, %v2515_v11 }
0x3493   :  { %v2539_v57 = vrot.slane %v2537_v9, 6 }
0x3495   :  { %v2554_v63 = vsel %vm736_vm15, %v2539_v57, %v2541_v21  ;;  %vm1336_vm15 = vcmask 261126  }
0x3496   :  { %v2555_v26 = vsel %vm162_vm0, %v2554_v63, %v2543_v61  ;;  %vm2676_vm0 = vcmask 33792  }
0x3497   :  { %v2556_v32 = vsel %vm739_vm7, %v2555_v26, %v2545_v1  ;;  %v2677_v12 = vsel %vm2676_vm0, %v2675_v38, 0.0 }
0x3498   :  { %2570 = vrot.lane.b32.xlu2 %v2556_v32, %s3276_s11  ;;  %v2573_v27 = vpop.permute.xlu0 %2572  ;;  %2678 = vadd.xlane.f32.xlu1 %v2677_v12 }
0x34c1   :  { %2640 = vadd.xlane.f32.xlu2 %v2639_v5 }
0x34d9   :  { %1333 = vrot.lane.b32.xlu2 %v3842_v14, %s3276_s11 }
0x34f2   :  { %v2571_v13 = vpop.permute.xlu2 %2570 }
0x34f3   :  { %2822 = vmatmul.msk.f32.vlgmr.msra.gmra.mxu0 %vm189_vm6, %v2571_v13 }
0x34fb   :  { %2823 = vmatmul.msk.f32.gmra.mxu0 %vm189_vm6, %v2573_v27 }
0x350b   :  { %v2679_v25 = vpop.xlane.xlu1 %2678 }
0x350c   :  { %v2684_v45 = vadd.f32 %v2846_v35, %v2679_v25 }
0x3534   :  { %v2641_v17 = vpop.xlane.xlu2 %2640 }
0x3535   :  { %3106 = vrcp.f32 %v2641_v17  ;;  %v2653_v40 = vand.u32 2147483648, %v2641_v17  ;;  %v2651_v23 = vand.u32 2147483647, %v2641_v17  ;;  %vm2647_vm7 = vweird.f32 %v2641_v17 }
0x3537   :  { %v2654_v43 = vor.u32 1.1754944e-38, %v2653_v40  ;;  %vm2652_vm13 = vcmp.eq.f32.partialorder %v2651_v23, 8.507059e+37 }
0x353b   :  { %v3107_v14 = vpop.eup %3106 }
0x353c   :  { %v2643_v18 = vmul.f32 %v3107_v14, %v2641_v17  ;;  %v1334_v6 = vpop.permute.xlu2 %1333  ;;  %vm2648_vm6 = vweird.f32 %v3107_v14 }
0x353d   :  { %1337 = vst.msk [vmem:[#allocation12 - $0x6] sm:$0xc0] %vm1336_vm15, %v1334_v6  ;;  %vm2649_vm12 = vmor %vm2647_vm7, %vm2648_vm6 }
0x353e   :  { %v2644_v2 = vsub.f32 1.0, %v2643_v18  ;;  %2717 = dma.vmem_to_hbm [thread:$0]  %s2713_s29, 32, %s2715_s30, [#allocation6]  }
0x3540   :  { %v2645_v31 = vmul.f32 %v3107_v14, %v2644_v2 }
0x3542   :  { %v2646_v41 = vadd.f32 %v3107_v14, %v2645_v31 }
0x3544   :  { %v2650_v36 = vsel %vm2649_vm12, %v3107_v14, %v2646_v41 }
0x3545   :  { %v2655_v39 = vsel %vm2652_vm13, %v2654_v43, %v2650_v36 }
0x3546   :  { %v2656_v28 = vmul.f32 %v3105_v4, %v2655_v39 }
0x3548   :  { %v2661_v44 = vmul.f32 %v2844_v42, %v2656_v28 }
0x354a   :  { %v2662_v24 = vsel %vm2631_vm9, %v2661_v44, 0.0 }
0x354b   :  { %2663 = vadd.xlane.f32.xlu0 %v2662_v24 }
0x3570   :  { %v2595_v7 = vpop.f32.mrf.mxu0 }
0x3571   :  { %v2596_v34 = vadd.f32 %v2845_v33, %v2595_v7 }
0x3573   :  { %2601 = vst.msk [vmem:[%s4130_s23] sm:$0xff] %vm155_vm1, %v2596_v34 }
0x3578   :  { %v2598_v22 = vpop.f32.mrf.mxu0 }
0x3579   :  { %v2599_v10 = vadd.f32 %v2845_v33, %v2598_v22 }
0x357b   :  { %2602 = vst.msk [vmem:[%s4130_s23 + $0x8] sm:$0xff] %vm155_vm1, %v2599_v10 }
0x35be   :  { %v2664_v37 = vpop.xlane.xlu0 %2663 }
0x35bf   :  { %v2669_v46 = vadd.f32 %v2847_v8, %v2664_v37 }
0x35c1   :  { %v2685_v47 = vadd.f32 %v2684_v45, %v2669_v46 }
0x35c3   :  { %v2825_v62 = vmul.f32 -1.442695, %v2685_v47 }
0x35c5   :  { %3108 = vpow2.f32 %v2825_v62 }
0x35cb   :  { %v3109_v48 = vpop.eup %3108 }
0x35cc   :  { %v2689_v49 = vadd.f32 1.0, %v3109_v48 }
0x35ce   :  { %3110 = vrcp.f32 %v2689_v49  ;;  %v2701_v51 = vand.u32 2147483648, %v2689_v49  ;;  %v2699_v53 = vand.u32 2147483647, %v2689_v49  ;;  %vm2695_vm1 = vweird.f32 %v2689_v49 }
0x35d0   :  { %v2702_v29 = vor.u32 1.1754944e-38, %v2701_v51  ;;  %vm2700_vm3 = vcmp.eq.f32.partialorder %v2699_v53, 8.507059e+37 }
0x35d4   :  { %v3111_v50 = vpop.eup %3110 }
0x35d5   :  { %v2691_v16 = vmul.f32 %v3111_v50, %v2689_v49  ;;  %vm2696_vm9 = vweird.f32 %v3111_v50 }
0x35d6   :  { %vm2697_vm2 = vmor %vm2695_vm1, %vm2696_vm9 }
0x35d7   :  { %v2692_v11 = vsub.f32 1.0, %v2691_v16 }
0x35d9   :  { %v2693_v52 = vmul.f32 %v3111_v50, %v2692_v11 }
0x35db   :  { %v2694_v54 = vadd.f32 %v3111_v50, %v2693_v52 }
0x35dd   :  { %v2698_v55 = vsel %vm2697_vm2, %v3111_v50, %v2694_v54 }
0x35de   :  { %v2703_v58 = vsel %vm2700_vm3, %v2702_v29, %v2698_v55 }
0x35df   :  { %2706 = vst.msk [vmem:[%s4132_s25] sm:$0x3] %vm2705_vm14, %v2703_v58 }
0x35e0   :  { %3264 = dma.done.wait [#allocation6], 32  }
0x35e1   :  { %3265 = vsyncadd [#allocation6], 4294967264 }
0x35e2   :  { %3266 = dma.done.wait [#allocation14], 32  }
0x35e3   :  { %3267 = vsyncadd [#allocation14], 4294967264 }
0x35e4   :  { %2745 = vsyncpa [#allocation5], 1 }
0x35e5   :  { %2746 = vsyncpa [#allocation8], 1 }
0x35e6   :  { %2747 = vsyncpa [#allocation11], 1 }
0x35e7   :  { %2748 = vsyncpa [#allocation6], 1 }
0x35e8   :  { %2749 = vsyncpa [#allocation14], 1 }

</bundles_post_ra>
